<compile_context>
chip_gen: v7x
topology: tpu7x:2x2x1
jax: 0.10.0
libtpu: 0.0.40
codegen_flags: <defaults>
</compile_context>

<pallas_src>
import functools
import math

import jax
import jax.numpy as jnp
from jax.experimental import pallas as pl
from jax.experimental.pallas import tpu as pltpu


# ----------------------------------------------------------------------------
# helpers
# ----------------------------------------------------------------------------
_VMEM_LIMIT = 32 * 1024 * 1024          # safe default on v5e / v6e / v7x
_BLOCK_BYTE_BUDGET = 6 * 1024 * 1024    # per-step working-set cap (pre double-buffer)


def _pick_block(n, rows_per_example, bytes_per_example=0, target_rows=256):
    """Examples per grid step: divides `n`, aims for >= target_rows matmul rows,
    and keeps the per-step block bytes under the VMEM budget."""
    want = max(1, target_rows // max(rows_per_example, 1))
    if bytes_per_example > 0:
        want = min(want, max(1, _BLOCK_BYTE_BUDGET // bytes_per_example))
    want = min(want, n)
    b = max(1, want)
    while n % b:
        b -= 1
    return b


def _softmax(x, axis):
    """Numerically stable softmax in f32 (explicit, Mosaic-friendly)."""
    m = jnp.max(x, axis=axis, keepdims=True)
    e = jnp.exp(x - m)
    return e / jnp.sum(e, axis=axis, keepdims=True)


# ----------------------------------------------------------------------------
# Kernel 1: token-level self attention + fused SegmentPooler
# ----------------------------------------------------------------------------
def _token_attn_pool_kernel(x_ref, mkey_ref, mrow_ref, bias_ref,
                            wqkv_ref, bqkv_ref, wp_ref, bp_ref,
                            tok_ref, utt_ref,
                            *, num_heads, head_dim, hidden_size):
    nb, T, d = x_ref.shape

    # --- fused QKV projection: bf16 on the MXU, f32 accumulation ---
    x2 = x_ref[...].reshape(nb * T, d)                                   # bf16
    qkv = jnp.dot(x2, wqkv_ref[...],
                  preferred_element_type=jnp.float32) + bqkv_ref[...]    # (nb*T, 3d) f32

    # --- additive key mask built in-kernel from the raw 0/1 mask ---
    add_mask = (1.0 - mkey_ref[...].astype(jnp.float32)) * -10000.0      # (nb, 1, T)
    bias = bias_ref[...]                                                 # (nb, H, T, T) bf16

    ctx_heads = []
    for h in range(num_heads):                                           # static, unrolled
        lo = h * head_dim
        qh = qkv[:, lo:lo + head_dim].reshape(nb, T, head_dim)
        kh = qkv[:, d + lo:d + lo + head_dim].reshape(nb, T, head_dim)
        vh = qkv[:, 2 * d + lo:2 * d + lo + head_dim].reshape(nb, T, head_dim)
        # 1/sqrt(head_dim) already folded into the query weight/bias.
        s = jnp.einsum('bqd,bkd->bqk',
                       qh.astype(jnp.bfloat16), kh.astype(jnp.bfloat16),
                       preferred_element_type=jnp.float32)               # (nb, T, T)
        s = s + add_mask + bias[:, h].astype(jnp.float32)
        p = _softmax(s, axis=-1)                                         # f32
        ctx_heads.append(jnp.einsum('bqk,bkd->bqd',
                                    p.astype(jnp.bfloat16),
                                    vh.astype(jnp.bfloat16),
                                    preferred_element_type=jnp.float32))
    ctx = jnp.concatenate(ctx_heads, axis=-1)                            # (nb, T, d) f32
    tok_ref[...] = ctx.astype(tok_ref.dtype)

    # --- fused SegmentPooler (f32 elementwise math) ---
    m_row = mrow_ref[...].astype(jnp.float32)                            # (nb, T, 1)
    denom = 1e-06 + jnp.sum(m_row, axis=1, keepdims=True)                # (nb, 1, 1)
    avg = jnp.sum(m_row * ctx, axis=1, keepdims=True) / denom            # (nb, 1, d)
    scores = jnp.sum(ctx * avg, axis=-1, keepdims=True)                  # (nb, T, 1)
    scores = scores * (1.0 / math.sqrt(hidden_size))
    scores = scores + m_row        # reference adds the 0/1 mask as a value (quirk kept)
    scores = _softmax(scores, axis=1)
    pooled = jnp.sum(ctx * scores, axis=1)                               # (nb, d)
    utt = jnp.dot(pooled.astype(jnp.bfloat16), wp_ref[...],
                  preferred_element_type=jnp.float32) + bp_ref[...]      # (nb, d)
    utt_ref[...] = utt[:, None, :].astype(utt_ref.dtype)


def token_attention_pool_pallas(x, mask_keys, mask_rows, position_bias,
                                params, num_heads):
    N, T, d = x.shape
    H = num_heads
    dh = d // H
    # dominant per-example bytes: x + tok out (bf16) + position bias (bf16)
    per_ex_bytes = 2 * (2 * T * d + H * T * T)
    nb = _pick_block(N, T, per_ex_bytes)
    grid = (N // nb,)
    kernel = functools.partial(_token_attn_pool_kernel,
                               num_heads=H, head_dim=dh, hidden_size=d)
    tok, utt = pl.pallas_call(
        kernel,
        out_shape=(jax.ShapeDtypeStruct((N, T, d), jnp.bfloat16),
                   jax.ShapeDtypeStruct((N, 1, d), jnp.bfloat16)),
        grid_spec=pltpu.PrefetchScalarGridSpec(
            num_scalar_prefetch=0,
            grid=grid,
            in_specs=[
                pl.BlockSpec((nb, T, d), lambda i: (i, 0, 0)),          # x (bf16)
                pl.BlockSpec((nb, 1, T), lambda i: (i, 0, 0)),          # mask (keys)
                pl.BlockSpec((nb, T, 1), lambda i: (i, 0, 0)),          # mask (rows)
                pl.BlockSpec((nb, H, T, T), lambda i: (i, 0, 0, 0)),    # position bias
                pl.BlockSpec((d, 3 * d), lambda i: (0, 0)),             # fused Wqkv^T
                pl.BlockSpec((1, 3 * d), lambda i: (0, 0)),             # fused bqkv
                pl.BlockSpec((d, d), lambda i: (0, 0)),                 # pooler W^T
                pl.BlockSpec((1, d), lambda i: (0, 0)),                 # pooler b
            ],
            out_specs=[
                pl.BlockSpec((nb, T, d), lambda i: (i, 0, 0)),          # token states
                pl.BlockSpec((nb, 1, d), lambda i: (i, 0, 0)),          # utterance states
            ],
        ),
        compiler_params=pltpu.CompilerParams(
            dimension_semantics=("parallel",),
            vmem_limit_bytes=_VMEM_LIMIT),
    )(x, mask_keys, mask_rows, position_bias,
      params["wqkv_t"], params["bqkv"], params["pool_w_t"], params["pool_b"])
    return tok, utt


# ----------------------------------------------------------------------------
# Kernel 2: utterance-level self attention (no position bias, optional causal)
# ----------------------------------------------------------------------------
def _utt_attn_kernel(x_ref, mkey_ref, wqkv_ref, bqkv_ref, o_ref,
                     *, num_heads, head_dim, causal):
    bb, S, d = x_ref.shape
    x2 = x_ref[...].reshape(bb * S, d)                                   # bf16
    qkv = jnp.dot(x2, wqkv_ref[...],
                  preferred_element_type=jnp.float32) + bqkv_ref[...]    # (bb*S, 3d) f32

    add_mask = (1.0 - mkey_ref[...].astype(jnp.float32)) * -10000.0      # (bb, 1, S)
    if causal:
        qi = jax.lax.broadcasted_iota(jnp.int32, (S, S), 0)
        ki = jax.lax.broadcasted_iota(jnp.int32, (S, S), 1)
        causal_add = jnp.where(ki <= qi, 0.0, -10000.0)[None, :, :]      # (1, S, S)
    ctx_heads = []
    for h in range(num_heads):
        lo = h * head_dim
        qh = qkv[:, lo:lo + head_dim].reshape(bb, S, head_dim)
        kh = qkv[:, d + lo:d + lo + head_dim].reshape(bb, S, head_dim)
        vh = qkv[:, 2 * d + lo:2 * d + lo + head_dim].reshape(bb, S, head_dim)
        s = jnp.einsum('bqd,bkd->bqk',
                       qh.astype(jnp.bfloat16), kh.astype(jnp.bfloat16),
                       preferred_element_type=jnp.float32)               # (bb, S, S)
        s = s + add_mask
        if causal:
            s = s + causal_add
        p = _softmax(s, axis=-1)
        ctx_heads.append(jnp.einsum('bqk,bkd->bqd',
                                    p.astype(jnp.bfloat16),
                                    vh.astype(jnp.bfloat16),
                                    preferred_element_type=jnp.float32))
    o_ref[...] = jnp.concatenate(ctx_heads, axis=-1).astype(o_ref.dtype)


def utterance_attention_pallas(x, mask_keys, params, num_heads, causal):
    B, S, d = x.shape
    H = num_heads
    dh = d // H
    per_ex_bytes = 2 * (2 * S * d)
    bb = _pick_block(B, S, per_ex_bytes)
    grid = (B // bb,)
    kernel = functools.partial(_utt_attn_kernel,
                               num_heads=H, head_dim=dh, causal=causal)
    return pl.pallas_call(
        kernel,
        out_shape=jax.ShapeDtypeStruct((B, S, d), jnp.bfloat16),
        grid_spec=pltpu.PrefetchScalarGridSpec(
            num_scalar_prefetch=0,
            grid=grid,
            in_specs=[
                pl.BlockSpec((bb, S, d), lambda i: (i, 0, 0)),          # utterance states
                pl.BlockSpec((bb, 1, S), lambda i: (i, 0, 0)),          # utterance mask
                pl.BlockSpec((d, 3 * d), lambda i: (0, 0)),             # fused Wqkv^T
                pl.BlockSpec((1, 3 * d), lambda i: (0, 0)),             # fused bqkv
            ],
            out_specs=pl.BlockSpec((bb, S, d), lambda i: (i, 0, 0)),
        ),
        compiler_params=pltpu.CompilerParams(
            dimension_semantics=("parallel",),
            vmem_limit_bytes=_VMEM_LIMIT),
    )(x, mask_keys, params["wqkv_t"], params["bqkv"])


# ----------------------------------------------------------------------------
# Kernel 3: SegmentUpdater + LayerNorm (fused)
# ----------------------------------------------------------------------------
def _updater_ln_kernel(u_ref, ts_ref, mrow_ref, g_ref, b_ref, o_ref,
                       *, hidden_size, eps):
    u = u_ref[...].astype(jnp.float32)                                   # (nb, 1, d)
    ts = ts_ref[...].astype(jnp.float32)                                 # (nb, T, d)
    m = mrow_ref[...].astype(jnp.float32)                                # (nb, T, 1)
    scores = jnp.sum(ts * u, axis=-1, keepdims=True)                     # (nb, T, 1)
    scores = scores * (1.0 / math.sqrt(hidden_size))
    scores = scores + jnp.exp((1.0 - m) * -100000.0)   # == 1 where mask==1, 0 else
    scores = _softmax(scores, axis=1)
    h = ts + scores * u                                                  # (nb, T, d)
    mean = jnp.mean(h, axis=-1, keepdims=True)
    var = jnp.mean(jnp.square(h - mean), axis=-1, keepdims=True)
    out = (h - mean) * jax.lax.rsqrt(var + eps) * g_ref[...] + b_ref[...]
    o_ref[...] = out.astype(o_ref.dtype)


def segment_updater_ln_pallas(u, token_states, mask_rows, params, eps):
    N, T, d = token_states.shape
    per_ex_bytes = T * d * (2 + 4)          # bf16 in + f32 out
    nb = _pick_block(N, T, per_ex_bytes)
    grid = (N // nb,)
    kernel = functools.partial(_updater_ln_kernel, hidden_size=d, eps=eps)
    return pl.pallas_call(
        kernel,
        out_shape=jax.ShapeDtypeStruct((N, T, d), jnp.float32),
        grid_spec=pltpu.PrefetchScalarGridSpec(
            num_scalar_prefetch=0,
            grid=grid,
            in_specs=[
                pl.BlockSpec((nb, 1, d), lambda i: (i, 0, 0)),          # utterance state
                pl.BlockSpec((nb, T, d), lambda i: (i, 0, 0)),          # token states
                pl.BlockSpec((nb, T, 1), lambda i: (i, 0, 0)),          # mask (rows)
                pl.BlockSpec((1, d), lambda i: (0, 0)),                 # LN gamma
                pl.BlockSpec((1, d), lambda i: (0, 0)),                 # LN beta
            ],
            out_specs=pl.BlockSpec((nb, T, d), lambda i: (i, 0, 0)),
        ),
        compiler_params=pltpu.CompilerParams(
            dimension_semantics=("parallel",),
            vmem_limit_bytes=_VMEM_LIMIT),
    )(u, token_states, mask_rows, params["ln_g"], params["ln_b"])


# ----------------------------------------------------------------------------
# HSSAAttention forward (glue in plain JAX, hot paths in Pallas)
# ----------------------------------------------------------------------------
def hssa_attention_forward(hidden_states, attention_mask, max_dia_len,
                           utterance_mask, position_bias, params, config):
    N, T, d = hidden_states.shape
    H = config["num_attention_heads"]

    # bf16 at the kernel boundary; raw 0/1 masks in the two broadcast
    # orientations needed in-kernel (no (N,T,T) mask materialized in HBM).
    x_bf = hidden_states.astype(jnp.bfloat16)
    bias_bf = position_bias.astype(jnp.bfloat16)
    am = attention_mask.astype(jnp.float32)
    mask_keys = am.reshape(N, 1, T)
    mask_rows = am.reshape(N, T, 1)

    # ---- token-level self attention + fused segment pooling ----
    token_states, utt = token_attention_pool_pallas(
        x_bf, mask_keys, mask_rows, bias_bf, params, H)
    utt = utt.reshape(-1, max_dia_len, d)                 # (B, S, d) bf16
    B, S, _ = utt.shape

    # ---- utterance-level self attention (bias-free, optional causal) ----
    um_keys = utterance_mask.astype(jnp.float32).reshape(B, 1, S)
    utt = utterance_attention_pallas(
        utt, um_keys, params, H,
        causal=bool(config["casual_utterance_attention"]))
    u = utt.reshape(N, 1, d)

    # ---- segment update + LayerNorm (fused kernel, f32 output) ----
    return segment_updater_ln_pallas(u, token_states, mask_rows, params,
                                     config["layer_norm_eps"])


# ----------------------------------------------------------------------------
# Deterministic parameter init (synthetic, not a checkpoint load)
# ----------------------------------------------------------------------------
def init_params(key, d, num_heads):
    ks = jax.random.split(key, 4)
    std = 0.02
    head_dim = d // num_heads
    scale = 1.0 / math.sqrt(head_dim)
    # Weights stored pre-transposed (W^T) so kernels compute y = x @ W^T (+ b),
    # matching nn.Linear semantics with no in-kernel transposes.  The attention
    # scale 1/sqrt(head_dim) is folded into the query weight AND bias.
    wq = std * jax.random.normal(ks[0], (d, d), jnp.float32) * scale
    wk = std * jax.random.normal(ks[1], (d, d), jnp.float32)
    wv = std * jax.random.normal(ks[2], (d, d), jnp.float32)
    bq = jnp.zeros((d,), jnp.float32) * scale
    bk = jnp.zeros((d,), jnp.float32)
    bv = jnp.zeros((d,), jnp.float32)
    wqkv_t = jnp.concatenate([wq, wk, wv], axis=1)                       # (d, 3d)
    bqkv = jnp.concatenate([bq, bk, bv]).reshape(1, 3 * d)               # (1, 3d)
    wp = std * jax.random.normal(ks[3], (d, d), jnp.float32)
    return {
        "wqkv_t": wqkv_t.astype(jnp.bfloat16),      # fused QKV weight (bf16 MXU)
        "bqkv": bqkv,                               # f32, added after f32 accumulation
        "pool_w_t": wp.astype(jnp.bfloat16),
        "pool_b": jnp.zeros((1, d), jnp.float32),
        "ln_g": jnp.ones((1, d), jnp.float32),
        "ln_b": jnp.zeros((1, d), jnp.float32),
    }


if __name__ == "__main__":
    B, S, T, d, H = 2, 4, 8, 32, 4
    config = {
        "hidden_size": d,
        "num_attention_heads": H,
        "layer_norm_eps": 1e-12,
        "casual_utterance_attention": False,
    }

    key = jax.random.PRNGKey(0)
    k_x, k_m, k_um, k_pb, k_p = jax.random.split(key, 5)

    hidden_states = jax.random.normal(k_x, (B * S, T, d), jnp.float32)
    attention_mask = (jax.random.uniform(k_m, (B * S, T)) > 0.2).astype(jnp.float32)
    attention_mask = attention_mask.at[:, 0].set(1.0)           # at least one token
    utterance_mask = (jax.random.uniform(k_um, (B, S)) > 0.2).astype(jnp.float32)
    utterance_mask = utterance_mask.at[:, 0].set(1.0)
    position_bias = 0.02 * jax.random.normal(k_pb, (B * S, H, T, T), jnp.float32)

    params = init_params(k_p, d, H)

    out = hssa_attention_forward(hidden_states, attention_mask, S,
                                 utterance_mask, position_bias, params, config)
    out = jax.block_until_ready(out)
    assert out.shape == (B * S, T, d)
    assert bool(jnp.all(jnp.isfinite(out)))
    print("KERNEL_OK")
</pallas_src>

<mosaic_0001>
module attributes {stable_mosaic.version = 11 : i64} {
  func.func @_token_attn_pool_kernel(%arg0: i32, %arg1: memref<8x8x32xbf16, #tpu.memory_space<vmem>>, %arg2: memref<8x1x8xf32, #tpu.memory_space<vmem>>, %arg3: memref<8x8x1xf32, #tpu.memory_space<vmem>>, %arg4: memref<8x4x8x8xbf16, #tpu.memory_space<vmem>>, %arg5: memref<32x96xbf16, #tpu.memory_space<vmem>>, %arg6: memref<1x96xf32, #tpu.memory_space<vmem>>, %arg7: memref<32x32xbf16, #tpu.memory_space<vmem>>, %arg8: memref<1x32xf32, #tpu.memory_space<vmem>>, %arg9: memref<8x8x32xbf16, #tpu.memory_space<vmem>>, %arg10: memref<8x1x32xbf16, #tpu.memory_space<vmem>>) attributes {dimension_semantics = [#tpu.dimension_semantics<parallel>], iteration_bounds = array<i64: 1>, scalar_prefetch = 0 : i64, scratch_operands = 0 : i64, tpu.core_type = #tpu.core_type<tc>, window_params = [{transform_indices = @transform_0, window_bounds = array<i64: 8, 8, 32>}, {transform_indices = @transform_1, window_bounds = array<i64: 8, 1, 8>}, {transform_indices = @transform_2, window_bounds = array<i64: 8, 8, 1>}, {transform_indices = @transform_3, window_bounds = array<i64: 8, 4, 8, 8>}, {pipeline_mode = #tpu.pipeline_mode<synchronous>, transform_indices = @transform_4, window_bounds = array<i64: 32, 96>}, {pipeline_mode = #tpu.pipeline_mode<synchronous>, transform_indices = @transform_5, window_bounds = array<i64: 1, 96>}, {pipeline_mode = #tpu.pipeline_mode<synchronous>, transform_indices = @transform_6, window_bounds = array<i64: 32, 32>}, {pipeline_mode = #tpu.pipeline_mode<synchronous>, transform_indices = @transform_7, window_bounds = array<i64: 1, 32>}, {transform_indices = @transform_8, window_bounds = array<i64: 8, 8, 32>}, {transform_indices = @transform_9, window_bounds = array<i64: 8, 1, 32>}]} {
    %c0 = arith.constant 0 : index
    %c0_0 = arith.constant 0 : index
    %c0_1 = arith.constant 0 : index
    %0 = vector.load %arg1[%c0, %c0_0, %c0_1] : memref<8x8x32xbf16, #tpu.memory_space<vmem>>, vector<8x8x32xbf16>
    %1 = vector.shape_cast %0 : vector<8x8x32xbf16> to vector<64x32xbf16>
    %c0_2 = arith.constant 0 : index
    %c0_3 = arith.constant 0 : index
    %2 = vector.load %arg5[%c0_2, %c0_3] : memref<32x96xbf16, #tpu.memory_space<vmem>>, vector<32x96xbf16>
    %cst = arith.constant dense<0.000000e+00> : vector<64x96xf32>
    %3 = tpu.matmul %1, %2, %cst {dimension_numbers = #tpu.dot_dimension_numbers<[1], [0], [0], [1], [0, 0, 1, 1], [], []>} : vector<64x32xbf16>, vector<32x96xbf16>, vector<64x96xf32> -> vector<64x96xf32>
    %c0_4 = arith.constant 0 : index
    %c0_5 = arith.constant 0 : index
    %4 = vector.load %arg6[%c0_4, %c0_5] : memref<1x96xf32, #tpu.memory_space<vmem>>, vector<1x96xf32>
    %5 = vector.broadcast %4 : vector<1x96xf32> to vector<64x96xf32>
    %6 = arith.addf %3, %5 : vector<64x96xf32>
    %c0_6 = arith.constant 0 : index
    %c0_7 = arith.constant 0 : index
    %c0_8 = arith.constant 0 : index
    %7 = vector.load %arg2[%c0_6, %c0_7, %c0_8] : memref<8x1x8xf32, #tpu.memory_space<vmem>>, vector<8x1x8xf32>
    %cst_9 = arith.constant 1.000000e+00 : f32
    %8 = vector.broadcast %cst_9 : f32 to vector<8x1x8xf32>
    %9 = arith.subf %8, %7 : vector<8x1x8xf32>
    %cst_10 = arith.constant -1.000000e+04 : f32
    %10 = vector.broadcast %cst_10 : f32 to vector<8x1x8xf32>
    %11 = arith.mulf %9, %10 : vector<8x1x8xf32>
    %c0_11 = arith.constant 0 : index
    %c0_12 = arith.constant 0 : index
    %c0_13 = arith.constant 0 : index
    %c0_14 = arith.constant 0 : index
    %12 = vector.load %arg4[%c0_11, %c0_12, %c0_13, %c0_14] : memref<8x4x8x8xbf16, #tpu.memory_space<vmem>>, vector<8x4x8x8xbf16>
    %13 = vector.extract_strided_slice %6 {offsets = [0, 0], sizes = [64, 8], strides = [1, 1]} : vector<64x96xf32> to vector<64x8xf32>
    %14 = vector.shape_cast %13 : vector<64x8xf32> to vector<8x8x8xf32>
    %15 = vector.extract_strided_slice %6 {offsets = [0, 32], sizes = [64, 8], strides = [1, 1]} : vector<64x96xf32> to vector<64x8xf32>
    %16 = vector.shape_cast %15 : vector<64x8xf32> to vector<8x8x8xf32>
    %17 = vector.extract_strided_slice %6 {offsets = [0, 64], sizes = [64, 8], strides = [1, 1]} : vector<64x96xf32> to vector<64x8xf32>
    %18 = vector.shape_cast %17 : vector<64x8xf32> to vector<8x8x8xf32>
    %19 = arith.truncf %14 : vector<8x8x8xf32> to vector<8x8x8xbf16>
    %20 = arith.truncf %16 : vector<8x8x8xf32> to vector<8x8x8xbf16>
    "tpu.trace_start"() <{level = 10 : i32, message = "bqd,bkd->bqk"}> : () -> ()
    %cst_15 = arith.constant dense<0.000000e+00> : vector<8x8x8xf32>
    %21 = tpu.matmul %19, %20, %cst_15 {dimension_numbers = #tpu.dot_dimension_numbers<[2], [2], [1], [1], [0, 0, 0, 1, 1, 1], [0], [0]>} : vector<8x8x8xbf16>, vector<8x8x8xbf16>, vector<8x8x8xf32> -> vector<8x8x8xf32>
    "tpu.trace_stop"() : () -> ()
    %22 = vector.broadcast %11 : vector<8x1x8xf32> to vector<8x8x8xf32>
    %23 = arith.addf %21, %22 : vector<8x8x8xf32>
    %24 = vector.extract_strided_slice %12 {offsets = [0, 0, 0, 0], sizes = [8, 1, 8, 8], strides = [1, 1, 1, 1]} : vector<8x4x8x8xbf16> to vector<8x1x8x8xbf16>
    %25 = vector.shape_cast %24 : vector<8x1x8x8xbf16> to vector<8x8x8xbf16>
    %26 = arith.extf %25 : vector<8x8x8xbf16> to vector<8x8x8xf32>
    %27 = arith.addf %23, %26 : vector<8x8x8xf32>
    %cst_16 = arith.constant dense<0xFF800000> : vector<8x8xf32>
    %28 = vector.multi_reduction <maximumf>, %27, %cst_16 [2] : vector<8x8x8xf32> to vector<8x8xf32>
    %29 = vector.shape_cast %28 : vector<8x8xf32> to vector<8x8x1xf32>
    %30 = vector.broadcast %29 : vector<8x8x1xf32> to vector<8x8x8xf32>
    %31 = arith.subf %27, %30 : vector<8x8x8xf32>
    %32 = math.exp %31 : vector<8x8x8xf32>
    %cst_17 = arith.constant dense<0.000000e+00> : vector<8x8xf32>
    %33 = vector.multi_reduction <add>, %32, %cst_17 [2] : vector<8x8x8xf32> to vector<8x8xf32>
    %34 = vector.shape_cast %33 : vector<8x8xf32> to vector<8x8x1xf32>
    %35 = vector.broadcast %34 : vector<8x8x1xf32> to vector<8x8x8xf32>
    %36 = arith.divf %32, %35 : vector<8x8x8xf32>
    %37 = arith.truncf %36 : vector<8x8x8xf32> to vector<8x8x8xbf16>
    %38 = arith.truncf %18 : vector<8x8x8xf32> to vector<8x8x8xbf16>
    "tpu.trace_start"() <{level = 10 : i32, message = "bqk,bkd->bqd"}> : () -> ()
    %cst_18 = arith.constant dense<0.000000e+00> : vector<8x8x8xf32>
    %39 = tpu.matmul %37, %38, %cst_18 {dimension_numbers = #tpu.dot_dimension_numbers<[2], [1], [1], [2], [0, 0, 0, 1, 1, 2], [0], [0]>} : vector<8x8x8xbf16>, vector<8x8x8xbf16>, vector<8x8x8xf32> -> vector<8x8x8xf32>
    "tpu.trace_stop"() : () -> ()
    %40 = vector.extract_strided_slice %6 {offsets = [0, 8], sizes = [64, 8], strides = [1, 1]} : vector<64x96xf32> to vector<64x8xf32>
    %41 = vector.shape_cast %40 : vector<64x8xf32> to vector<8x8x8xf32>
    %42 = vector.extract_strided_slice %6 {offsets = [0, 40], sizes = [64, 8], strides = [1, 1]} : vector<64x96xf32> to vector<64x8xf32>
    %43 = vector.shape_cast %42 : vector<64x8xf32> to vector<8x8x8xf32>
    %44 = vector.extract_strided_slice %6 {offsets = [0, 72], sizes = [64, 8], strides = [1, 1]} : vector<64x96xf32> to vector<64x8xf32>
    %45 = vector.shape_cast %44 : vector<64x8xf32> to vector<8x8x8xf32>
    %46 = arith.truncf %41 : vector<8x8x8xf32> to vector<8x8x8xbf16>
    %47 = arith.truncf %43 : vector<8x8x8xf32> to vector<8x8x8xbf16>
    "tpu.trace_start"() <{level = 10 : i32, message = "bqd,bkd->bqk"}> : () -> ()
    %cst_19 = arith.constant dense<0.000000e+00> : vector<8x8x8xf32>
    %48 = tpu.matmul %46, %47, %cst_19 {dimension_numbers = #tpu.dot_dimension_numbers<[2], [2], [1], [1], [0, 0, 0, 1, 1, 1], [0], [0]>} : vector<8x8x8xbf16>, vector<8x8x8xbf16>, vector<8x8x8xf32> -> vector<8x8x8xf32>
    "tpu.trace_stop"() : () -> ()
    %49 = vector.broadcast %11 : vector<8x1x8xf32> to vector<8x8x8xf32>
    %50 = arith.addf %48, %49 : vector<8x8x8xf32>
    %51 = vector.extract_strided_slice %12 {offsets = [0, 1, 0, 0], sizes = [8, 1, 8, 8], strides = [1, 1, 1, 1]} : vector<8x4x8x8xbf16> to vector<8x1x8x8xbf16>
    %52 = vector.shape_cast %51 : vector<8x1x8x8xbf16> to vector<8x8x8xbf16>
    %53 = arith.extf %52 : vector<8x8x8xbf16> to vector<8x8x8xf32>
    %54 = arith.addf %50, %53 : vector<8x8x8xf32>
    %cst_20 = arith.constant dense<0xFF800000> : vector<8x8xf32>
    %55 = vector.multi_reduction <maximumf>, %54, %cst_20 [2] : vector<8x8x8xf32> to vector<8x8xf32>
    %56 = vector.shape_cast %55 : vector<8x8xf32> to vector<8x8x1xf32>
    %57 = vector.broadcast %56 : vector<8x8x1xf32> to vector<8x8x8xf32>
    %58 = arith.subf %54, %57 : vector<8x8x8xf32>
    %59 = math.exp %58 : vector<8x8x8xf32>
    %cst_21 = arith.constant dense<0.000000e+00> : vector<8x8xf32>
    %60 = vector.multi_reduction <add>, %59, %cst_21 [2] : vector<8x8x8xf32> to vector<8x8xf32>
    %61 = vector.shape_cast %60 : vector<8x8xf32> to vector<8x8x1xf32>
    %62 = vector.broadcast %61 : vector<8x8x1xf32> to vector<8x8x8xf32>
    %63 = arith.divf %59, %62 : vector<8x8x8xf32>
    %64 = arith.truncf %63 : vector<8x8x8xf32> to vector<8x8x8xbf16>
    %65 = arith.truncf %45 : vector<8x8x8xf32> to vector<8x8x8xbf16>
    "tpu.trace_start"() <{level = 10 : i32, message = "bqk,bkd->bqd"}> : () -> ()
    %cst_22 = arith.constant dense<0.000000e+00> : vector<8x8x8xf32>
    %66 = tpu.matmul %64, %65, %cst_22 {dimension_numbers = #tpu.dot_dimension_numbers<[2], [1], [1], [2], [0, 0, 0, 1, 1, 2], [0], [0]>} : vector<8x8x8xbf16>, vector<8x8x8xbf16>, vector<8x8x8xf32> -> vector<8x8x8xf32>
    "tpu.trace_stop"() : () -> ()
    %67 = vector.extract_strided_slice %6 {offsets = [0, 16], sizes = [64, 8], strides = [1, 1]} : vector<64x96xf32> to vector<64x8xf32>
    %68 = vector.shape_cast %67 : vector<64x8xf32> to vector<8x8x8xf32>
    %69 = vector.extract_strided_slice %6 {offsets = [0, 48], sizes = [64, 8], strides = [1, 1]} : vector<64x96xf32> to vector<64x8xf32>
    %70 = vector.shape_cast %69 : vector<64x8xf32> to vector<8x8x8xf32>
    %71 = vector.extract_strided_slice %6 {offsets = [0, 80], sizes = [64, 8], strides = [1, 1]} : vector<64x96xf32> to vector<64x8xf32>
    %72 = vector.shape_cast %71 : vector<64x8xf32> to vector<8x8x8xf32>
    %73 = arith.truncf %68 : vector<8x8x8xf32> to vector<8x8x8xbf16>
    %74 = arith.truncf %70 : vector<8x8x8xf32> to vector<8x8x8xbf16>
    "tpu.trace_start"() <{level = 10 : i32, message = "bqd,bkd->bqk"}> : () -> ()
    %cst_23 = arith.constant dense<0.000000e+00> : vector<8x8x8xf32>
    %75 = tpu.matmul %73, %74, %cst_23 {dimension_numbers = #tpu.dot_dimension_numbers<[2], [2], [1], [1], [0, 0, 0, 1, 1, 1], [0], [0]>} : vector<8x8x8xbf16>, vector<8x8x8xbf16>, vector<8x8x8xf32> -> vector<8x8x8xf32>
    "tpu.trace_stop"() : () -> ()
    %76 = vector.broadcast %11 : vector<8x1x8xf32> to vector<8x8x8xf32>
    %77 = arith.addf %75, %76 : vector<8x8x8xf32>
    %78 = vector.extract_strided_slice %12 {offsets = [0, 2, 0, 0], sizes = [8, 1, 8, 8], strides = [1, 1, 1, 1]} : vector<8x4x8x8xbf16> to vector<8x1x8x8xbf16>
    %79 = vector.shape_cast %78 : vector<8x1x8x8xbf16> to vector<8x8x8xbf16>
    %80 = arith.extf %79 : vector<8x8x8xbf16> to vector<8x8x8xf32>
    %81 = arith.addf %77, %80 : vector<8x8x8xf32>
    %cst_24 = arith.constant dense<0xFF800000> : vector<8x8xf32>
    %82 = vector.multi_reduction <maximumf>, %81, %cst_24 [2] : vector<8x8x8xf32> to vector<8x8xf32>
    %83 = vector.shape_cast %82 : vector<8x8xf32> to vector<8x8x1xf32>
    %84 = vector.broadcast %83 : vector<8x8x1xf32> to vector<8x8x8xf32>
    %85 = arith.subf %81, %84 : vector<8x8x8xf32>
    %86 = math.exp %85 : vector<8x8x8xf32>
    %cst_25 = arith.constant dense<0.000000e+00> : vector<8x8xf32>
    %87 = vector.multi_reduction <add>, %86, %cst_25 [2] : vector<8x8x8xf32> to vector<8x8xf32>
    %88 = vector.shape_cast %87 : vector<8x8xf32> to vector<8x8x1xf32>
    %89 = vector.broadcast %88 : vector<8x8x1xf32> to vector<8x8x8xf32>
    %90 = arith.divf %86, %89 : vector<8x8x8xf32>
    %91 = arith.truncf %90 : vector<8x8x8xf32> to vector<8x8x8xbf16>
    %92 = arith.truncf %72 : vector<8x8x8xf32> to vector<8x8x8xbf16>
    "tpu.trace_start"() <{level = 10 : i32, message = "bqk,bkd->bqd"}> : () -> ()
    %cst_26 = arith.constant dense<0.000000e+00> : vector<8x8x8xf32>
    %93 = tpu.matmul %91, %92, %cst_26 {dimension_numbers = #tpu.dot_dimension_numbers<[2], [1], [1], [2], [0, 0, 0, 1, 1, 2], [0], [0]>} : vector<8x8x8xbf16>, vector<8x8x8xbf16>, vector<8x8x8xf32> -> vector<8x8x8xf32>
    "tpu.trace_stop"() : () -> ()
    %94 = vector.extract_strided_slice %6 {offsets = [0, 24], sizes = [64, 8], strides = [1, 1]} : vector<64x96xf32> to vector<64x8xf32>
    %95 = vector.shape_cast %94 : vector<64x8xf32> to vector<8x8x8xf32>
    %96 = vector.extract_strided_slice %6 {offsets = [0, 56], sizes = [64, 8], strides = [1, 1]} : vector<64x96xf32> to vector<64x8xf32>
    %97 = vector.shape_cast %96 : vector<64x8xf32> to vector<8x8x8xf32>
    %98 = vector.extract_strided_slice %6 {offsets = [0, 88], sizes = [64, 8], strides = [1, 1]} : vector<64x96xf32> to vector<64x8xf32>
    %99 = vector.shape_cast %98 : vector<64x8xf32> to vector<8x8x8xf32>
    %100 = arith.truncf %95 : vector<8x8x8xf32> to vector<8x8x8xbf16>
    %101 = arith.truncf %97 : vector<8x8x8xf32> to vector<8x8x8xbf16>
    "tpu.trace_start"() <{level = 10 : i32, message = "bqd,bkd->bqk"}> : () -> ()
    %cst_27 = arith.constant dense<0.000000e+00> : vector<8x8x8xf32>
    %102 = tpu.matmul %100, %101, %cst_27 {dimension_numbers = #tpu.dot_dimension_numbers<[2], [2], [1], [1], [0, 0, 0, 1, 1, 1], [0], [0]>} : vector<8x8x8xbf16>, vector<8x8x8xbf16>, vector<8x8x8xf32> -> vector<8x8x8xf32>
    "tpu.trace_stop"() : () -> ()
    %103 = vector.broadcast %11 : vector<8x1x8xf32> to vector<8x8x8xf32>
    %104 = arith.addf %102, %103 : vector<8x8x8xf32>
    %105 = vector.extract_strided_slice %12 {offsets = [0, 3, 0, 0], sizes = [8, 1, 8, 8], strides = [1, 1, 1, 1]} : vector<8x4x8x8xbf16> to vector<8x1x8x8xbf16>
    %106 = vector.shape_cast %105 : vector<8x1x8x8xbf16> to vector<8x8x8xbf16>
    %107 = arith.extf %106 : vector<8x8x8xbf16> to vector<8x8x8xf32>
    %108 = arith.addf %104, %107 : vector<8x8x8xf32>
    %cst_28 = arith.constant dense<0xFF800000> : vector<8x8xf32>
    %109 = vector.multi_reduction <maximumf>, %108, %cst_28 [2] : vector<8x8x8xf32> to vector<8x8xf32>
    %110 = vector.shape_cast %109 : vector<8x8xf32> to vector<8x8x1xf32>
    %111 = vector.broadcast %110 : vector<8x8x1xf32> to vector<8x8x8xf32>
    %112 = arith.subf %108, %111 : vector<8x8x8xf32>
    %113 = math.exp %112 : vector<8x8x8xf32>
    %cst_29 = arith.constant dense<0.000000e+00> : vector<8x8xf32>
    %114 = vector.multi_reduction <add>, %113, %cst_29 [2] : vector<8x8x8xf32> to vector<8x8xf32>
    %115 = vector.shape_cast %114 : vector<8x8xf32> to vector<8x8x1xf32>
    %116 = vector.broadcast %115 : vector<8x8x1xf32> to vector<8x8x8xf32>
    %117 = arith.divf %113, %116 : vector<8x8x8xf32>
    %118 = arith.truncf %117 : vector<8x8x8xf32> to vector<8x8x8xbf16>
    %119 = arith.truncf %99 : vector<8x8x8xf32> to vector<8x8x8xbf16>
    "tpu.trace_start"() <{level = 10 : i32, message = "bqk,bkd->bqd"}> : () -> ()
    %cst_30 = arith.constant dense<0.000000e+00> : vector<8x8x8xf32>
    %120 = tpu.matmul %118, %119, %cst_30 {dimension_numbers = #tpu.dot_dimension_numbers<[2], [1], [1], [2], [0, 0, 0, 1, 1, 2], [0], [0]>} : vector<8x8x8xbf16>, vector<8x8x8xbf16>, vector<8x8x8xf32> -> vector<8x8x8xf32>
    "tpu.trace_stop"() : () -> ()
    %121 = tpu.concatenate %39, %66, %93, %120 in 2 : vector<8x8x8xf32>, vector<8x8x8xf32>, vector<8x8x8xf32>, vector<8x8x8xf32> -> vector<8x8x32xf32>
    %122 = arith.truncf %121 : vector<8x8x32xf32> to vector<8x8x32xbf16>
    %c0_31 = arith.constant 0 : index
    %c0_32 = arith.constant 0 : index
    %c0_33 = arith.constant 0 : index
    %123 = vector.load %arg9[%c0_31, %c0_32, %c0_33] : memref<8x8x32xbf16, #tpu.memory_space<vmem>>, vector<8x8x32xbf16>
    tpu.vector_store %arg9[%c0_31, %c0_32, %c0_33], %122 {strides = array<i32>} : memref<8x8x32xbf16, #tpu.memory_space<vmem>>, vector<8x8x32xbf16>,
    %c0_34 = arith.constant 0 : index
    %c0_35 = arith.constant 0 : index
    %c0_36 = arith.constant 0 : index
    %124 = vector.load %arg3[%c0_34, %c0_35, %c0_36] : memref<8x8x1xf32, #tpu.memory_space<vmem>>, vector<8x8x1xf32>
    %cst_37 = arith.constant dense<0.000000e+00> : vector<8x1xf32>
    %125 = vector.multi_reduction <add>, %124, %cst_37 [1] : vector<8x8x1xf32> to vector<8x1xf32>
    %126 = vector.shape_cast %125 : vector<8x1xf32> to vector<8x1x1xf32>
    %cst_38 = arith.constant 9.99999997E-7 : f32
    %127 = vector.broadcast %cst_38 : f32 to vector<8x1x1xf32>
    %128 = arith.addf %127, %126 : vector<8x1x1xf32>
    %129 = vector.broadcast %124 : vector<8x8x1xf32> to vector<8x8x32xf32>
    %130 = arith.mulf %129, %121 : vector<8x8x32xf32>
    %cst_39 = arith.constant dense<0.000000e+00> : vector<8x32xf32>
    %131 = vector.multi_reduction <add>, %130, %cst_39 [1] : vector<8x8x32xf32> to vector<8x32xf32>
    %132 = vector.shape_cast %131 : vector<8x32xf32> to vector<8x1x32xf32>
    %133 = vector.broadcast %128 : vector<8x1x1xf32> to vector<8x1x32xf32>
    %134 = arith.divf %132, %133 : vector<8x1x32xf32>
    %135 = vector.broadcast %134 : vector<8x1x32xf32> to vector<8x8x32xf32>
    %136 = arith.mulf %121, %135 : vector<8x8x32xf32>
    %cst_40 = arith.constant dense<0.000000e+00> : vector<8x8xf32>
    %137 = vector.multi_reduction <add>, %136, %cst_40 [2] : vector<8x8x32xf32> to vector<8x8xf32>
    %138 = vector.shape_cast %137 : vector<8x8xf32> to vector<8x8x1xf32>
    %cst_41 = arith.constant 0.176776692 : f32
    %139 = vector.broadcast %cst_41 : f32 to vector<8x8x1xf32>
    %140 = arith.mulf %138, %139 : vector<8x8x1xf32>
    %141 = arith.addf %140, %124 : vector<8x8x1xf32>
    %cst_42 = arith.constant dense<0xFF800000> : vector<8x1xf32>
    %142 = vector.multi_reduction <maximumf>, %141, %cst_42 [1] : vector<8x8x1xf32> to vector<8x1xf32>
    %143 = vector.shape_cast %142 : vector<8x1xf32> to vector<8x1x1xf32>
    %144 = vector.broadcast %143 : vector<8x1x1xf32> to vector<8x8x1xf32>
    %145 = arith.subf %141, %144 : vector<8x8x1xf32>
    %146 = math.exp %145 : vector<8x8x1xf32>
    %cst_43 = arith.constant dense<0.000000e+00> : vector<8x1xf32>
    %147 = vector.multi_reduction <add>, %146, %cst_43 [1] : vector<8x8x1xf32> to vector<8x1xf32>
    %148 = vector.shape_cast %147 : vector<8x1xf32> to vector<8x1x1xf32>
    %149 = vector.broadcast %148 : vector<8x1x1xf32> to vector<8x8x1xf32>
    %150 = arith.divf %146, %149 : vector<8x8x1xf32>
    %151 = vector.broadcast %150 : vector<8x8x1xf32> to vector<8x8x32xf32>
    %152 = arith.mulf %121, %151 : vector<8x8x32xf32>
    %cst_44 = arith.constant dense<0.000000e+00> : vector<8x32xf32>
    %153 = vector.multi_reduction <add>, %152, %cst_44 [1] : vector<8x8x32xf32> to vector<8x32xf32>
    %154 = arith.truncf %153 : vector<8x32xf32> to vector<8x32xbf16>
    %c0_45 = arith.constant 0 : index
    %c0_46 = arith.constant 0 : index
    %155 = vector.load %arg7[%c0_45, %c0_46] : memref<32x32xbf16, #tpu.memory_space<vmem>>, vector<32x32xbf16>
    %cst_47 = arith.constant dense<0.000000e+00> : vector<8x32xf32>
    %156 = tpu.matmul %154, %155, %cst_47 {dimension_numbers = #tpu.dot_dimension_numbers<[1], [0], [0], [1], [0, 0, 1, 1], [], []>} : vector<8x32xbf16>, vector<32x32xbf16>, vector<8x32xf32> -> vector<8x32xf32>
    %c0_48 = arith.constant 0 : index
    %c0_49 = arith.constant 0 : index
    %157 = vector.load %arg8[%c0_48, %c0_49] : memref<1x32xf32, #tpu.memory_space<vmem>>, vector<1x32xf32>
    %158 = vector.broadcast %157 : vector<1x32xf32> to vector<8x32xf32>
    %159 = arith.addf %156, %158 : vector<8x32xf32>
    %160 = vector.shape_cast %159 : vector<8x32xf32> to vector<8x1x32xf32>
    %161 = arith.truncf %160 : vector<8x1x32xf32> to vector<8x1x32xbf16>
    %c0_50 = arith.constant 0 : index
    %c0_51 = arith.constant 0 : index
    %c0_52 = arith.constant 0 : index
    %162 = vector.load %arg10[%c0_50, %c0_51, %c0_52] : memref<8x1x32xbf16, #tpu.memory_space<vmem>>, vector<8x1x32xbf16>
    tpu.vector_store %arg10[%c0_50, %c0_51, %c0_52], %161 {strides = array<i32>} : memref<8x1x32xbf16, #tpu.memory_space<vmem>>, vector<8x1x32xbf16>,
    return
  }
  func.func @transform_0(%arg0: i32) -> (i32, i32, i32) {
    %c0_i32 = arith.constant 0 : i32
    %c0_i32_0 = arith.constant 0 : i32
    %c0_i32_1 = arith.constant 0 : i32
    return %arg0, %c0_i32, %c0_i32_0 : i32, i32, i32
  }
  func.func @transform_1(%arg0: i32) -> (i32, i32, i32) {
    %c0_i32 = arith.constant 0 : i32
    %c0_i32_0 = arith.constant 0 : i32
    %c0_i32_1 = arith.constant 0 : i32
    return %arg0, %c0_i32, %c0_i32_0 : i32, i32, i32
  }
  func.func @transform_2(%arg0: i32) -> (i32, i32, i32) {
    %c0_i32 = arith.constant 0 : i32
    %c0_i32_0 = arith.constant 0 : i32
    %c0_i32_1 = arith.constant 0 : i32
    return %arg0, %c0_i32, %c0_i32_0 : i32, i32, i32
  }
  func.func @transform_3(%arg0: i32) -> (i32, i32, i32, i32) {
    %c0_i32 = arith.constant 0 : i32
    %c0_i32_0 = arith.constant 0 : i32
    %c0_i32_1 = arith.constant 0 : i32
    %c0_i32_2 = arith.constant 0 : i32
    return %arg0, %c0_i32, %c0_i32_0, %c0_i32_1 : i32, i32, i32, i32
  }
  func.func @transform_4(%arg0: i32) -> (i32, i32) {
    %c0_i32 = arith.constant 0 : i32
    %c0_i32_0 = arith.constant 0 : i32
    %c0_i32_1 = arith.constant 0 : i32
    return %c0_i32, %c0_i32_0 : i32, i32
  }
  func.func @transform_5(%arg0: i32) -> (i32, i32) {
    %c0_i32 = arith.constant 0 : i32
    %c0_i32_0 = arith.constant 0 : i32
    %c0_i32_1 = arith.constant 0 : i32
    return %c0_i32, %c0_i32_0 : i32, i32
  }
  func.func @transform_6(%arg0: i32) -> (i32, i32) {
    %c0_i32 = arith.constant 0 : i32
    %c0_i32_0 = arith.constant 0 : i32
    %c0_i32_1 = arith.constant 0 : i32
    return %c0_i32, %c0_i32_0 : i32, i32
  }
  func.func @transform_7(%arg0: i32) -> (i32, i32) {
    %c0_i32 = arith.constant 0 : i32
    %c0_i32_0 = arith.constant 0 : i32
    %c0_i32_1 = arith.constant 0 : i32
    return %c0_i32, %c0_i32_0 : i32, i32
  }
  func.func @transform_8(%arg0: i32) -> (i32, i32, i32) {
    %c0_i32 = arith.constant 0 : i32
    %c0_i32_0 = arith.constant 0 : i32
    %c0_i32_1 = arith.constant 0 : i32
    return %arg0, %c0_i32, %c0_i32_0 : i32, i32, i32
  }
  func.func @transform_9(%arg0: i32) -> (i32, i32, i32) {
    %c0_i32 = arith.constant 0 : i32
    %c0_i32_0 = arith.constant 0 : i32
    %c0_i32_1 = arith.constant 0 : i32
    return %arg0, %c0_i32, %c0_i32_0 : i32, i32, i32
  }
}

</mosaic_0001>

<bundles_post_ra>
// kernel: tpu_custom_call.1
= control target key start
LH: loop header
LB: loop body
LE: loop exit
PB: predicated region body
PF: predicated region fallthrough
CT: control target
= control target key end

     0   :  { %15 = vsyncpa [#allocation3], 0  ;;  %s7196_s0 = inlined_call_operand.vmem [shape: bf16[8,8,32], index: 0, kind: input, shape index: {}]   ;;  %s7197_s1 = inlined_call_operand.vmem [shape: f32[8,1,8], index: 1, kind: input, shape index: {}]   ;;  %s7198_s2 = inlined_call_operand.vmem [shape: f32[8,8,1], index: 2, kind: input, shape index: {}]   ;;  %s7199_s3 = inlined_call_operand.hbm [shape: bf16[8,4,8,8], index: 3, kind: input, shape index: {}]   ;;  %s7200_s4 = inlined_call_operand.vmem [shape: bf16[32,96], index: 4, kind: input, shape index: {}]   ;;  %s7201_s5 = inlined_call_operand.vmem [shape: f32[1,96], index: 5, kind: input, shape index: {}]   ;;  %s7202_s6 = inlined_call_operand.vmem [shape: bf16[32,32], index: 6, kind: input, shape index: {}]   ;;  %s7203_s7 = inlined_call_operand.vmem [shape: f32[1,32], index: 7, kind: input, shape index: {}]   ;;  %s7204_s8 = inlined_call_operand.hbm [shape: bf16[8,8,32], index: 8, kind: output, shape index: {0}]   ;;  %s7205_s9 = inlined_call_operand.vmem [shape: bf16[8,1,32], index: 9, kind: output, shape index: {1}]  }
   0x1   :  { %16 = vsyncpa [#allocation4], 0  ;;  %s5715_s30 = smov [#allocation2]   ;;  %s5667_s13 = scalar_lea.hbm %s7199_s3, 2048 }
   0x2   :  { %s28_s10 = sshll.u32 %s5715_s30, 4  ;;  %p5668_p0 = scmp.ne.s32.totalorder %s7199_s3, %s5667_s13  ;;  %s29_s10 = int_to_ptr.vmem [resolvable:$true] %s28_s10 }
   0x3   :  { %p5671_p1 = scmp.lt.u32.totalorder %s5667_s13, %s7199_s3 }
   0x5   :  { %p5673_p2 = pnand %p5671_p1, %p5668_p0 }
   0x7   :  { %5676 = shalt.err (!%p5673_p2)
}
   0x8   :  { %s5677_s18 = scalar_lea.vmem %s29_s10, 2048  ;;  %p5682_p4 = scmp.lt.s32.totalorder %s29_s10, %s29_s10 }
   0x9   :  { %p5678_p3 = scmp.ne.s32.totalorder %s29_s10, %s5677_s18  ;;  %p5683_p5 = scmp.lt.s32.totalorder %s5677_s18, %s5677_s18 }
   0xb   :  { %p5684_p6 = por %p5683_p5, %p5682_p4 }
   0xd   :  { %p5685_p7 = pnand %p5684_p6, %p5678_p3 }
   0xf   :  { %5688 = shalt.err (!%p5685_p7)
}
  0x10   :  { %s5716_s19 = smov 64   ;;  %s5717_s20 = smov 4  }
  0x11   :  { %34 = dma.hbm_to_vmem [thread:$0]  %s7199_s3, 2048, %s29_s10, [#allocation3], %s5716_s19, %s5716_s19, %s5717_s20  }
  0x12   :  { %5711 = dma.done.wait [#allocation3], 2048  }
  0x13   :  { %5712 = vsyncadd [#allocation3], 4294965248  ;;  %v5483_v0 = vld [vmem:[%s7200_s4] sm:$0xff]   ;;  %v5484_v1 = vld [vmem:[%s7200_s4 + $0x8] sm:$0xff]   ;;  %vm98_vm0 = vcmask 261120   ;;  %v5718_v6 = vmov 0.0   ;;  %v248_v52 = vlaneseq }
  0x14   :  { %5056 = vmatprep.subr.bf16.mxu0 %v5483_v0  ;;  %v5485_v2 = vld [vmem:[%s7196_s0] sm:$0xff]   ;;  %v5486_v3 = vld [vmem:[%s7196_s0 + $0x8] sm:$0xff]   ;;  %v5487_v4 = vld [vmem:[%s7196_s0 + $0x10] sm:$0xff]   ;;  %5068 = vmatprep.subr.bf16.mxu1 %v5718_v6  ;;  %vm5719_vm1 = vmmov 0   ;;  %vm291_vm2 = vcmask 64512   ;;  %vm798_vm3 = vcmask 1043456  }
  0x15   :  { %5057 = vmatpush3.bf16.msra.mxu0 %v5483_v0  ;;  %5060 = vmatprep.mubr.msk.bf16.mxu0 %vm98_vm0, %v5485_v2  ;;  %v5488_v5 = vld [vmem:[%s7196_s0 + $0x18] sm:$0xff]   ;;  %v4761_v7 = vld [vmem:[%s7201_s5] ss:$0 sm:$0xff]  ;;  %s5720_s0 = smov 96   ;;  %v178_v53 = vld [vmem:[%s7197_s1 + $0x2] sm:$0x1] }
  0x16   :  { %5058 = vmatprep.subr.bf16.mxu0 %v5484_v1  ;;  %5070 = vmatprep.mubr.msk.bf16.mxu1 %vm5719_vm1, %v5718_v6  ;;  %v176_v54 = vld [vmem:[%s7197_s1] sm:$0x1]  ;;  %v186_v55 = vsub.f32 1.0, %v178_v53  ;;  %v5920_v56 = vshrl.u32 %v248_v52, 7  ;;  %v177_v61 = vld [vmem:[%s7197_s1 + $0x1] sm:$0x1] }
  0x17   :  { %v184_v57 = vsub.f32 1.0, %v176_v54  ;;  %v180_v62 = vld [vmem:[%s7197_s1 + $0x4] sm:$0x1]  ;;  %v185_v2 = vsub.f32 1.0, %v177_v61  ;;  %v181_v52 = vld [vmem:[%s7197_s1 + $0x5] sm:$0x1] }
  0x18   :  { %v194_v58 = vmul.f32 -10000.0, %v186_v55  ;;  %v5923_v59 = vsub.s32 0, %v5920_v56  ;;  %v5931_v63 = vld [vmem:[#allocation2 + $0x20] sm:$0xff]   ;;  %s5722_s30 = smov 120   ;;  %s5723_s10 = smov 56   ;;  %vm4013_vm4 = vcmask 7168  }
  0x19   :  { %5059 = vmatpush3.bf16.msra.mxu0 %v5484_v1  ;;  %v192_v60 = vmul.f32 -10000.0, %v184_v57  ;;  %s5724_s4 = smov 80   ;;  %s5725_s11 = smov 112   ;;  %vm3970_vm5 = vcmask 130048   ;;  %vm3979_vm6 = vcmask 195584   ;;  %vm3996_vm7 = vcmask 257024  }
  0x1a   :  { %5080 = vmatprep.subr.bf16.mxu0 %v5718_v6  ;;  %v5934_v0 = vrot.slane %v194_v58, %v5923_v59  ;;  %v5981_v58 = vld [vmem:[#allocation2 + $0x30] sm:$0xff]   ;;  %s5726_s12 = smov 48   ;;  %s5727_s13 = smov 72   ;;  %vm4577_vm8 = vcmask 1041409   ;;  %vm4579_vm9 = vcmask 1042434   ;;  %vm4581_vm10 = vcmask 1043459  }
  0x1b   :  { %v5937_v1 = vrot.slane %v192_v60, %v5923_v59  ;;  %v5983_v60 = vld [vmem:[#allocation2 + $0x60] sm:$0xff]   ;;  %s5729_s5 = smov 40   ;;  %s5731_s26 = smov 8   ;;  %vm4583_vm11 = vcmask 1044484   ;;  %vm4585_vm12 = vcmask 1045509   ;;  %vm4587_vm13 = vcmask 1046534  }
  0x1c   :  { %5061 = vmatmul.mubr.msk.bf16.vlgmr.msra.gmra.mrb[0].mxu0 %vm98_vm0, %v5486_v3  ;;  %v188_v3 = vsub.f32 1.0, %v180_v62  ;;  %s5732_s3 = smov 16   ;;  %vm4589_vm14 = vcmask 1047559  }
  0x1d   :  { %5064 = vmatprep.mubr.msk.bf16.mxu0 %vm98_vm0, %v5487_v4  ;;  %v5939_v4 = vld [vmem:[#allocation2] sm:$0xff]  }
  0x24   :  { %5065 = vmatmul.mubr.msk.bf16.gmra.mrb[4].mxu0 %vm98_vm0, %v5488_v5  ;;  %v4858_v5 = vunpack.c.l.bf16 %v5931_v63 }
  0x25   :  { %5082 = vmatprep.mubr.msk.bf16.mxu0 %vm5719_vm1, %v5718_v6 }
  0xef   :  { %v5062_v8 = vpop.f32.mrb[0].mxu0 }
  0xf0   :  { %v154_v9 = vadd.f32 %v5062_v8, %v4761_v7  ;;  %v145_v10 = vpop.f32.mrb[1].mxu0 }
  0xf1   :  { %v146_v11 = vadd.f32 %v4761_v7, %v145_v10  ;;  %v5063_v12 = vpop.f32.mrb[2].mxu0 }
  0xf2   :  { %v5832_v13 = vpack.c.bf16 %v154_v9, %v154_v9  ;;  %v157_v14 = vadd.f32 %v5063_v12, %v4761_v7  ;;  %v148_v15 = vpop.f32.mrb[3].mxu0 }
  0xf3   :  { %v5834_v16 = vpack.c.bf16 %v146_v11, %v146_v11  ;;  %v149_v17 = vadd.f32 %v4761_v7, %v148_v15  ;;  %v4842_v11 = vunpack.c.l.bf16 %v5939_v4 }
  0xf4   :  { %388 = vrot.lane.b32.xlu1 %v5832_v13, %s5720_s0  ;;  %v5838_v18 = vpack.c.bf16 %v157_v14, %v157_v14 }
  0xf5   :  { %289 = vrot.lane.b32.xlu0 %v5834_v16, %s5720_s0  ;;  %v5840_v19 = vpack.c.bf16 %v149_v17, %v149_v17  ;;  %v193_v17 = vmul.f32 -10000.0, %v185_v2 }
  0xf7   :  { %v5066_v20 = vpop.f32.mrb[4].mxu0 }
  0xf8   :  { %437 = vrot.lane.b32.xlu1 %v5838_v18, %s5720_s0  ;;  %v161_v21 = vpop.f32.mrb[5].mxu0  ;;  %v170_v22 = vadd.f32 %v5066_v20, %v4761_v7  ;;  %v196_v20 = vmul.f32 -10000.0, %v188_v3  ;;  %v189_v3 = vsub.f32 1.0, %v181_v52 }
  0xf9   :  { %v162_v23 = vadd.f32 %v4761_v7, %v161_v21  ;;  %v5067_v24 = vpop.f32.mrb[6].mxu0  ;;  %339 = vrot.lane.b32.xlu0 %v5840_v19, %s5720_s0  ;;  %v179_v21 = vld [vmem:[%s7197_s1 + $0x3] sm:$0x1] }
  0xfa   :  { %v164_v25 = vpop.f32.mrb[7].mxu0  ;;  %v173_v27 = vadd.f32 %v5067_v24, %v4761_v7  ;;  %v5846_v29 = vpack.c.bf16 %v170_v22, %v170_v22 }
  0xfb   :  { %v5844_v26 = vpack.c.bf16 %v162_v23, %v162_v23  ;;  %v165_v28 = vadd.f32 %v4761_v7, %v164_v25  ;;  %v182_v25 = vld [vmem:[%s7197_s1 + $0x6] sm:$0x1] }
  0xfc   :  { %v5851_v31 = vpack.c.bf16 %v173_v27, %v173_v27 }
  0xfd   :  { %v5848_v30 = vpack.c.bf16 %v165_v28, %v165_v28  ;;  %486 = vrot.lane.b32.xlu0 %v5844_v26, %s5720_s0 }
  0xff   :  { %535 = vrot.lane.b32.xlu1 %v5848_v30, %s5720_s0 }
 0x101   :  { %584 = vrot.lane.b32.xlu0 %v5846_v29, %s5720_s0 }
 0x103   :  { %633 = vrot.lane.b32.xlu1 %v5851_v31, %s5720_s0  ;;  %s5728_s0 = smov 104  }
 0x105   :  { %842 = vrot.lane.b32.xlu0 %v5840_v19, %s5716_s19 }
 0x107   :  { %793 = vrot.lane.b32.xlu1 %v5834_v16, %s5716_s19 }
 0x10b   :  { %890 = vrot.lane.b32.xlu1 %v5832_v13, %s5716_s19 }
 0x166   :  { %v389_v32 = vpop.permute.xlu1 %388 }
 0x167   :  { %v394_v33 = vsel %vm291_vm2, %v389_v32, 0  ;;  %v290_v34 = vpop.permute.xlu0 %289 }
 0x168   :  { %5081 = vmatpush3.bf16.xpose.msra.mxu0 %v394_v33  ;;  %v296_v35 = vsel %vm291_vm2, %v290_v34, 0  ;;  %v5957_v33 = vld [vmem:[#allocation2 + $0x10] sm:$0xff]   ;;  %v187_v34 = vsub.f32 1.0, %v179_v21 }
 0x169   :  { %5069 = vmatpush3.bf16.xpose.msra.mxu1 %v296_v35  ;;  %5092 = vmatprep.subr.bf16.mxu0 %v5718_v6  ;;  %v5960_v35 = vrot.slane %v193_v17, %v5923_v59  ;;  %v197_v17 = vmul.f32 -10000.0, %v189_v3 }
 0x16a   :  { %5074 = vmatprep.subr.bf16.mxu1 %v5718_v6  ;;  %v438_v37 = vpop.permute.xlu1 %437 }
 0x16b   :  { %v340_v36 = vpop.permute.xlu0 %339  ;;  %v443_v45 = vsel %vm291_vm2, %v438_v37, 0  ;;  %v190_v37 = vsub.f32 1.0, %v182_v25 }
 0x16c   :  { %v345_v39 = vsel %vm291_vm2, %v340_v36, 0  ;;  %v5963_v36 = vrot.slane %v196_v20, %v5923_v59 }
 0x16f   :  { %5083 = vmatmul.mubr.msk.bf16.vlgmr.msra.gmra.mrb[8].mxu0 %vm291_vm2, %v5832_v13  ;;  %v487_v38 = vpop.permute.xlu0 %486 }
 0x170   :  { %v492_v40 = vsel %vm291_vm2, %v487_v38, 0  ;;  %5071 = vmatmul.mubr.msk.bf16.vlgmr.msra.gmra.mrb[0].mxu1 %vm291_vm2, %v5834_v16  ;;  %5094 = vmatprep.mubr.msk.bf16.mxu0 %vm5719_vm1, %v5718_v6  ;;  %v5965_v38 = vld [vmem:[#allocation2 + $0x40] sm:$0xff]  }
 0x171   :  { %v536_v41 = vpop.permute.xlu1 %535  ;;  %5075 = vmatpush3.bf16.xpose.msra.mxu1 %v345_v39  ;;  %5093 = vmatpush3.bf16.xpose.msra.mxu0 %v492_v40  ;;  %v4850_v39 = vunpack.c.l.bf16 %v5957_v33 }
 0x172   :  { %5076 = vmatprep.mubr.msk.bf16.mxu1 %vm5719_vm1, %v5718_v6  ;;  %5086 = vmatprep.subr.bf16.mxu1 %v5718_v6  ;;  %v541_v47 = vsel %vm291_vm2, %v536_v41, 0 }
 0x173   :  { %5104 = vmatprep.subr.bf16.mxu0 %v5718_v6  ;;  %v585_v42 = vpop.permute.xlu0 %584 }
 0x174   :  { %v590_v43 = vsel %vm291_vm2, %v585_v42, 0 }
 0x175   :  { %v634_v44 = vpop.permute.xlu1 %633 }
 0x176   :  { %v639_v49 = vsel %vm291_vm2, %v634_v44, 0 }
 0x177   :  { %v843_v50 = vpop.permute.xlu0 %842 }
 0x178   :  { %5077 = vmatmul.mubr.msk.bf16.vlgmr.msra.gmra.mrb[4].mxu1 %vm291_vm2, %v5840_v19  ;;  %5095 = vmatmul.mubr.msk.bf16.vlgmr.msra.gmra.mrb[12].mxu0 %vm291_vm2, %v5844_v26  ;;  %v848_v51 = vsel %vm798_vm3, %v843_v50, 0 }
 0x179   :  { %5087 = vmatpush3.bf16.xpose.msra.mxu1 %v443_v45  ;;  %5105 = vmatpush3.bf16.xpose.msra.mxu0 %v590_v43  ;;  %v794_v46 = vpop.permute.xlu1 %793  ;;  %v195_v43 = vmul.f32 -10000.0, %v187_v34  ;;  %v6003_v34 = vld [vmem:[#allocation2 + $0x50] sm:$0xff]  }
 0x17a   :  { %5088 = vmatprep.mubr.msk.bf16.mxu1 %vm5719_vm1, %v5718_v6  ;;  %5106 = vmatprep.mubr.msk.bf16.mxu0 %vm5719_vm1, %v5718_v6  ;;  %v800_v48 = vsel %vm798_vm3, %v794_v46, 0 }
 0x17b   :  { %5098 = vmatprep.subr.bf16.mxu1 %v5718_v6  ;;  %5116 = vmatprep.subr.bf16.mxu0 %v5718_v6  ;;  %v5979_v57 = vrot.slane %v195_v43, %v5923_v59 }
 0x180   :  { %5089 = vmatmul.mubr.msk.bf16.vlgmr.msra.gmra.mrb[8].mxu1 %vm291_vm2, %v5838_v18  ;;  %5107 = vmatmul.mubr.msk.bf16.vlgmr.msra.gmra.mrb[16].mxu0 %vm291_vm2, %v5846_v29 }
 0x181   :  { %5099 = vmatpush3.bf16.xpose.msra.mxu1 %v541_v47  ;;  %5117 = vmatpush3.bf16.msra.mxu0 %v800_v48  ;;  %v198_v48 = vmul.f32 -10000.0, %v190_v37 }
 0x182   :  { %5100 = vmatprep.mubr.msk.bf16.mxu1 %vm5719_vm1, %v5718_v6  ;;  %5110 = vmatprep.subr.bf16.mxu1 %v5718_v6 }
 0x183   :  { %5118 = vmatprep.mubr.msk.bf16.mxu0 %vm5719_vm1, %v5718_v6  ;;  %5128 = vmatprep.subr.bf16.mxu0 %v5718_v6  ;;  %v5988_v62 = vrot.slane %v198_v48, %v5923_v59 }
 0x188   :  { %5101 = vmatmul.mubr.msk.bf16.vlgmr.msra.gmra.mrb[12].mxu1 %vm291_vm2, %v5848_v30 }
 0x189   :  { %5111 = vmatpush3.bf16.xpose.msra.mxu1 %v639_v49  ;;  %5112 = vmatprep.mubr.msk.bf16.mxu1 %vm5719_vm1, %v5718_v6  ;;  %v4874_v49 = vunpack.c.l.bf16 %v5965_v38 }
 0x18a   :  { %5122 = vmatprep.subr.bf16.mxu1 %v5718_v6 }
 0x190   :  { %5113 = vmatmul.mubr.msk.bf16.vlgmr.msra.gmra.mrb[16].mxu1 %vm291_vm2, %v5851_v31 }
 0x191   :  { %5123 = vmatpush3.bf16.msra.mxu1 %v848_v51  ;;  %5124 = vmatprep.mubr.msk.bf16.mxu1 %vm5719_vm1, %v5718_v6 }
 0x192   :  { %5134 = vmatprep.subr.bf16.mxu1 %v5718_v6 }
 0x242   :  { %v430_v7 = vpop.f32.mrb[8].mxu0 }
 0x243   :  { %v431_v8 = vadd.f32 %v430_v7, %v5934_v0  ;;  %v332_v9 = vpop.f32.mrb[0].mxu1  ;;  %v5084_v10 = vpop.f32.mrb[9].mxu0  ;;  %v4890_v7 = vunpack.c.l.bf16 %v5983_v60 }
 0x244   :  { %v333_v12 = vadd.f32 %v332_v9, %v5937_v1  ;;  %v5072_v14 = vpop.f32.mrb[1].mxu1  ;;  %v433_v15 = vpop.f32.mrb[10].mxu0 }
 0x245   :  { %v335_v22 = vpop.f32.mrb[2].mxu1  ;;  %v5085_v23 = vpop.f32.mrb[11].mxu0  ;;  %v5948_v24 = vadd.f32 %v4858_v5, %v431_v8  ;;  %v4866_v5 = vunpack.c.l.bf16 %v5981_v58 }
 0x246   :  { %v5073_v27 = vpop.f32.mrb[3].mxu1  ;;  %v5955_v32 = vadd.f32 %v4842_v11, %v333_v12  ;;  %v183_v22 = vld [vmem:[%s7197_s1 + $0x7] sm:$0x1]  ;;  %s5721_s1 = smov 88  }
 0x247   :  { %v703_v28 = vsel %vm291_vm2, %v5948_v24, -inf }
 0x248   :  { %704 = vmax.xlane.f32.xlu0 %v703_v28  ;;  %v697_v42 = vsel %vm291_vm2, %v5955_v32, -inf }
 0x24b   :  { %v381_v40 = vpop.f32.mrb[4].mxu1  ;;  %v528_v41 = vpop.f32.mrb[12].mxu0 }
 0x24c   :  { %v382_v44 = vadd.f32 %v381_v40, %v5960_v35  ;;  %v529_v45 = vadd.f32 %v528_v41, %v5963_v36  ;;  %698 = vmax.xlane.f32.xlu0 %v697_v42  ;;  %v5078_v46 = vpop.f32.mrb[5].mxu1  ;;  %v5096_v47 = vpop.f32.mrb[13].mxu0  ;;  %v6009_v40 = vrot.slane %v197_v17, %v5923_v59  ;;  %v191_v41 = vsub.f32 1.0, %v183_v22 }
 0x24d   :  { %v384_v50 = vpop.f32.mrb[6].mxu1  ;;  %v531_v51 = vpop.f32.mrb[14].mxu0  ;;  %v4882_v42 = vunpack.c.l.bf16 %v6003_v34 }
 0x24e   :  { %v5079_v53 = vpop.f32.mrb[7].mxu1  ;;  %v5097_v54 = vpop.f32.mrb[15].mxu0  ;;  %v5976_v55 = vadd.f32 %v4850_v39, %v382_v44  ;;  %v5990_v2 = vadd.f32 %v4874_v49, %v529_v45  ;;  %v199_v46 = vmul.f32 -10000.0, %v191_v41  ;;  %v6013_v50 = vld [vmem:[#allocation2 + $0x70] sm:$0xff]  }
 0x24f   :  { %v4898_v53 = vunpack.c.l.bf16 %v6013_v50 }
 0x250   :  { %v700_v61 = vsel %vm291_vm2, %v5976_v55, -inf  ;;  %v709_v15 = vsel %vm291_vm2, %v5990_v2, -inf  ;;  %v6017_v52 = vrot.slane %v199_v46, %v5923_v59 }
 0x251   :  { %701 = vmax.xlane.f32.xlu1 %v700_v61 }
 0x253   :  { %v479_v8 = vpop.f32.mrb[8].mxu1  ;;  %v626_v9 = vpop.f32.mrb[16].mxu0 }
 0x254   :  { %v480_v10 = vadd.f32 %v479_v8, %v5979_v57  ;;  %v627_v11 = vadd.f32 %v626_v9, %v5988_v62  ;;  %v5090_v12 = vpop.f32.mrb[9].mxu1  ;;  %v5108_v14 = vpop.f32.mrb[17].mxu0 }
 0x255   :  { %v482_v20 = vpop.f32.mrb[10].mxu1  ;;  %710 = vmax.xlane.f32.xlu1 %v709_v15  ;;  %v629_v21 = vpop.f32.mrb[18].mxu0 }
 0x256   :  { %v5091_v23 = vpop.f32.mrb[11].mxu1  ;;  %v5109_v25 = vpop.f32.mrb[19].mxu0  ;;  %v692_v27 = vadd.f32 %v4866_v5, %v480_v10  ;;  %v6001_v28 = vadd.f32 %v4890_v7, %v627_v11 }
 0x257   :  { %v6027_v14 = vpop.permute.xlu1 %890 }
 0x258   :  { %v706_v37 = vsel %vm291_vm2, %v692_v27, -inf  ;;  %v715_v39 = vsel %vm291_vm2, %v6001_v28, -inf }
 0x259   :  { %707 = vmax.xlane.f32.xlu0 %v706_v37  ;;  %716 = vmax.xlane.f32.xlu1 %v715_v39 }
 0x25b   :  { %v577_v43 = vpop.f32.mrb[12].mxu1 }
 0x25c   :  { %v578_v44 = vadd.f32 %v577_v43, %v6009_v40  ;;  %v5102_v45 = vpop.f32.mrb[13].mxu1 }
 0x25d   :  { %v580_v47 = vpop.f32.mrb[14].mxu1 }
 0x25e   :  { %v5103_v48 = vpop.f32.mrb[15].mxu1  ;;  %v694_v49 = vadd.f32 %v4882_v42, %v578_v44 }
 0x260   :  { %v712_v51 = vsel %vm291_vm2, %v694_v49, -inf }
 0x261   :  { %713 = vmax.xlane.f32.xlu0 %v712_v51 }
 0x263   :  { %v675_v54 = vpop.f32.mrb[16].mxu1 }
 0x264   :  { %v676_v61 = vadd.f32 %v675_v54, %v6017_v52  ;;  %v5114_v3 = vpop.f32.mrb[17].mxu1 }
 0x265   :  { %v678_v5 = vpop.f32.mrb[18].mxu1 }
 0x266   :  { %v5115_v7 = vpop.f32.mrb[19].mxu1  ;;  %v696_v8 = vadd.f32 %v4898_v53, %v676_v61 }
 0x268   :  { %v718_v9 = vsel %vm291_vm2, %v696_v8, -inf }
 0x269   :  { %719 = vmax.xlane.f32.xlu0 %v718_v9 }
 0x26a   :  { %938 = vrot.lane.b32.xlu1 %v5838_v18, %s5716_s19 }
 0x27f   :  { %986 = vrot.lane.b32.xlu0 %v5844_v26, %s5716_s19 }
 0x2d5   :  { %v705_v59 = vpop.xlane.xlu0 %704 }
 0x2d6   :  { %v723_v10 = vsub.f32 %v5948_v24, %v705_v59 }
 0x2d8   :  { %v733_v11 = vmul.f32 1.442695, %v723_v10 }
 0x2d9   :  { %v699_v12 = vpop.xlane.xlu0 %698 }
 0x2da   :  { %5491 = vpow2.f32 %v733_v11  ;;  %v721_v15 = vsub.f32 %v5955_v32, %v699_v12 }
 0x2dc   :  { %v729_v17 = vmul.f32 1.442695, %v721_v15 }
 0x2de   :  { %5493 = vpow2.f32 %v729_v17  ;;  %v702_v20 = vpop.xlane.xlu1 %701 }
 0x2df   :  { %v722_v21 = vsub.f32 %v5976_v55, %v702_v20 }
 0x2e1   :  { %v731_v22 = vmul.f32 1.442695, %v722_v21 }
 0x2e2   :  { %v711_v51 = vpop.xlane.xlu1 %710 }
 0x2e3   :  { %5495 = vpow2.f32 %v731_v22 }
 0x2e4   :  { %v6031_v23 = vpop.eup %5491 }
 0x2e5   :  { %v751_v25 = vsel %vm291_vm2, %v6031_v23, 0.0 }
 0x2e6   :  { %752 = vadd.xlane.f32.xlu1 %v751_v25  ;;  %v708_v24 = vpop.xlane.xlu0 %707  ;;  %v717_v53 = vpop.xlane.xlu1 %716 }
 0x2e7   :  { %v724_v37 = vsub.f32 %v692_v27, %v708_v24  ;;  %v727_v61 = vsub.f32 %v6001_v28, %v717_v53 }
 0x2e8   :  { %v6035_v39 = vpop.eup %5493 }
 0x2e9   :  { %v735_v41 = vmul.f32 1.442695, %v724_v37  ;;  %v745_v32 = vsel %vm291_vm2, %v6035_v39, 0.0  ;;  %v741_v3 = vmul.f32 1.442695, %v727_v61 }
 0x2ea   :  { %746 = vadd.xlane.f32.xlu1 %v745_v32 }
 0x2eb   :  { %5497 = vpow2.f32 %v735_v41 }
 0x2ed   :  { %v6039_v42 = vpop.eup %5495 }
 0x2ee   :  { %v714_v55 = vpop.xlane.xlu0 %713  ;;  %v748_v43 = vsel %vm291_vm2, %v6039_v42, 0.0 }
 0x2ef   :  { %v726_v44 = vsub.f32 %v694_v49, %v714_v55  ;;  %749 = vadd.xlane.f32.xlu0 %v748_v43  ;;  %v725_v49 = vsub.f32 %v5990_v2, %v711_v51  ;;  %v896_v55 = vsel %vm798_vm3, %v6027_v14, 0 }
 0x2f1   :  { %v739_v45 = vmul.f32 1.442695, %v726_v44  ;;  %v737_v54 = vmul.f32 1.442695, %v725_v49 }
 0x2f3   :  { %5499 = vpow2.f32 %v739_v45 }
 0x2f4   :  { %5501 = vpow2.f32 %v737_v54 }
 0x2f5   :  { %v6043_v46 = vpop.eup %5497  ;;  %5503 = vpow2.f32 %v741_v3 }
 0x2f6   :  { %v754_v27 = vsel %vm291_vm2, %v6043_v46, 0.0  ;;  %v720_v7 = vpop.xlane.xlu0 %719 }
 0x2f7   :  { %755 = vadd.xlane.f32.xlu0 %v754_v27  ;;  %v728_v9 = vsub.f32 %v696_v8, %v720_v7  ;;  %v939_v8 = vpop.permute.xlu1 %938 }
 0x2f8   :  { %v944_v45 = vsel %vm798_vm3, %v939_v8, 0 }
 0x2f9   :  { %v743_v2 = vmul.f32 1.442695, %v728_v9 }
 0x2fa   :  { %v987_v20 = vpop.permute.xlu0 %986 }
 0x2fb   :  { %1034 = vrot.lane.b32.xlu1 %v5848_v30, %s5716_s19  ;;  %5505 = vpow2.f32 %v743_v2 }
 0x2fd   :  { %v6049_v47 = vpop.eup %5499 }
 0x2fe   :  { %v760_v48 = vsel %vm291_vm2, %v6049_v47, 0.0  ;;  %v6057_v5 = vpop.eup %5501 }
 0x2ff   :  { %761 = vadd.xlane.f32.xlu0 %v760_v48  ;;  %v757_v59 = vsel %vm291_vm2, %v6057_v5, 0.0  ;;  %v6061_v10 = vpop.eup %5503 }
 0x300   :  { %v763_v28 = vsel %vm291_vm2, %v6061_v10, 0.0 }
 0x305   :  { %v6065_v11 = vpop.eup %5505 }
 0x306   :  { %v766_v12 = vsel %vm291_vm2, %v6065_v11, 0.0 }
 0x315   :  { %1082 = vrot.lane.b32.xlu0 %v5846_v29, %s5716_s19 }
 0x31f   :  { %758 = vadd.xlane.f32.xlu1 %v757_v59 }
 0x323   :  { %764 = vadd.xlane.f32.xlu1 %v763_v28 }
 0x334   :  { %1130 = vrot.lane.b32.xlu1 %v5851_v31, %s5716_s19  ;;  %767 = vadd.xlane.f32.xlu0 %v766_v12 }
 0x338   :  { %1230 = vrot.lane.b32.xlu1 %v5840_v19, %s5721_s1 }
 0x33c   :  { %1280 = vrot.lane.b32.xlu1 %v5832_v13, %s5721_s1 }
 0x340   :  { %1330 = vrot.lane.b32.xlu1 %v5838_v18, %s5721_s1 }
 0x344   :  { %1380 = vrot.lane.b32.xlu1 %v5844_v26, %s5721_s1 }
 0x348   :  { %1430 = vrot.lane.b32.xlu1 %v5848_v30, %s5721_s1 }
 0x34a   :  { %1180 = vrot.lane.b32.xlu0 %v5834_v16, %s5721_s1 }
 0x34c   :  { %1480 = vrot.lane.b32.xlu1 %v5846_v29, %s5721_s1 }
 0x34e   :  { %1178 = vrot.lane.b32.xlu0 %v5834_v16, %s5722_s30 }
 0x350   :  { %1530 = vrot.lane.b32.xlu1 %v5851_v31, %s5721_s1 }
 0x352   :  { %1228 = vrot.lane.b32.xlu0 %v5840_v19, %s5722_s30 }
 0x354   :  { %1528 = vrot.lane.b32.xlu1 %v5851_v31, %s5722_s30 }
 0x356   :  { %1278 = vrot.lane.b32.xlu0 %v5832_v13, %s5722_s30 }
 0x358   :  { %1690 = vrot.lane.b32.xlu1 %v5834_v16, %s5723_s10 }
 0x35a   :  { %1328 = vrot.lane.b32.xlu0 %v5838_v18, %s5722_s30 }
 0x35c   :  { %1786 = vrot.lane.b32.xlu1 %v5832_v13, %s5723_s10 }
 0x35e   :  { %1378 = vrot.lane.b32.xlu0 %v5844_v26, %s5722_s30 }
 0x360   :  { %1834 = vrot.lane.b32.xlu1 %v5838_v18, %s5723_s10 }
 0x362   :  { %1428 = vrot.lane.b32.xlu0 %v5848_v30, %s5722_s30 }
 0x366   :  { %1478 = vrot.lane.b32.xlu0 %v5846_v29, %s5722_s30 }
 0x36a   :  { %1738 = vrot.lane.b32.xlu0 %v5840_v19, %s5723_s10 }
 0x373   :  { %v753_v15 = vpop.xlane.xlu1 %752 }
 0x377   :  { %v747_v17 = vpop.xlane.xlu1 %746 }
 0x378   :  { %5507 = vrcp.f32 %v747_v17 }
 0x379   :  { %5509 = vrcp.f32 %v753_v15 }
 0x37b   :  { %v1035_v51 = vpop.permute.xlu1 %1034 }
 0x37c   :  { %v750_v21 = vpop.xlane.xlu0 %749  ;;  %v1040_v53 = vsel %vm798_vm3, %v1035_v51, 0 }
 0x37d   :  { %5511 = vrcp.f32 %v750_v21 }
 0x382   :  { %v5508_v22 = vpop.eup %5507 }
 0x383   :  { %v770_v25 = vmul.f32 %v5508_v22, %v6035_v39  ;;  %v5510_v41 = vpop.eup %5509 }
 0x384   :  { %v756_v24 = vpop.xlane.xlu0 %755  ;;  %v774_v39 = vmul.f32 %v5510_v41, %v6031_v23 }
 0x385   :  { %v785_v37 = vpack.c.bf16 %v770_v25, %v770_v25  ;;  %5513 = vrcp.f32 %v756_v24 }
 0x386   :  { %v787_v14 = vpack.c.bf16 %v774_v39, %v774_v39 }
 0x387   :  { %v5512_v32 = vpop.eup %5511  ;;  %5119 = vmatmul.mubr.msk.bf16.vlgmr.msra.gmra.mrb[20].mxu0 %vm291_vm2, %v785_v37 }
 0x388   :  { %5129 = vmatpush3.bf16.msra.mxu0 %v896_v55  ;;  %v772_v43 = vmul.f32 %v5512_v32, %v6039_v42  ;;  %5130 = vmatprep.mubr.msk.bf16.mxu0 %vm5719_vm1, %v5718_v6  ;;  %v992_v42 = vsel %vm798_vm3, %v987_v20, 0 }
 0x389   :  { %5140 = vmatprep.subr.bf16.mxu0 %v5718_v6 }
 0x38a   :  { %v786_v44 = vpack.c.bf16 %v772_v43, %v772_v43 }
 0x38c   :  { %5125 = vmatmul.mubr.msk.bf16.vlgmr.msra.gmra.mrb[20].mxu1 %vm291_vm2, %v786_v44  ;;  %v762_v27 = vpop.xlane.xlu0 %761 }
 0x38d   :  { %5135 = vmatpush3.bf16.msra.mxu1 %v944_v45  ;;  %5515 = vrcp.f32 %v762_v27  ;;  %5136 = vmatprep.mubr.msk.bf16.mxu1 %vm5719_vm1, %v5718_v6 }
 0x38e   :  { %5146 = vmatprep.subr.bf16.mxu1 %v5718_v6 }
 0x38f   :  { %5131 = vmatmul.mubr.msk.bf16.vlgmr.msra.gmra.mrb[24].mxu0 %vm291_vm2, %v787_v14  ;;  %v5514_v48 = vpop.eup %5513 }
 0x390   :  { %5141 = vmatpush3.bf16.msra.mxu0 %v992_v42  ;;  %5142 = vmatprep.mubr.msk.bf16.mxu0 %vm5719_vm1, %v5718_v6  ;;  %v776_v23 = vmul.f32 %v5514_v48, %v6043_v46  ;;  %v1083_v12 = vpop.permute.xlu0 %1082 }
 0x391   :  { %5152 = vmatprep.subr.bf16.mxu0 %v5718_v6  ;;  %v1088_v17 = vsel %vm798_vm3, %v1083_v12, 0 }
 0x392   :  { %v788_v49 = vpack.c.bf16 %v776_v23, %v776_v23 }
 0x394   :  { %5137 = vmatmul.mubr.msk.bf16.vlgmr.msra.gmra.mrb[24].mxu1 %vm291_vm2, %v788_v49 }
 0x395   :  { %5147 = vmatpush3.bf16.msra.mxu1 %v1040_v53  ;;  %5148 = vmatprep.mubr.msk.bf16.mxu1 %vm5719_vm1, %v5718_v6 }
 0x396   :  { %5158 = vmatprep.subr.bf16.mxu1 %v5718_v6 }
 0x397   :  { %v5516_v54 = vpop.eup %5515 }
 0x398   :  { %v780_v61 = vmul.f32 %v5516_v54, %v6049_v47 }
 0x39a   :  { %v790_v3 = vpack.c.bf16 %v780_v61, %v780_v61 }
 0x39c   :  { %5149 = vmatmul.mubr.msk.bf16.vlgmr.msra.gmra.mrb[28].mxu1 %vm291_vm2, %v790_v3 }
 0x39d   :  { %5160 = vmatprep.mubr.msk.bf16.mxu1 %vm5719_vm1, %v5718_v6 }
 0x3ac   :  { %v759_v46 = vpop.xlane.xlu1 %758 }
 0x3ad   :  { %5517 = vrcp.f32 %v759_v46 }
 0x3b0   :  { %v765_v7 = vpop.xlane.xlu1 %764 }
 0x3b1   :  { %5519 = vrcp.f32 %v765_v7 }
 0x3b4   :  { %v1131_v9 = vpop.permute.xlu1 %1130 }
 0x3b5   :  { %v1136_v59 = vsel %vm798_vm3, %v1131_v9, 0 }
 0x3b6   :  { %5159 = vmatpush3.bf16.msra.mxu1 %v1136_v59 }
 0x3b7   :  { %v5518_v2 = vpop.eup %5517  ;;  %5170 = vmatprep.subr.bf16.mxu1 %v5718_v6 }
 0x3b8   :  { %v1231_v28 = vpop.permute.xlu1 %1230  ;;  %v778_v47 = vmul.f32 %v5518_v2, %v6057_v5 }
 0x3b9   :  { %v1236_v27 = vsel %vm291_vm2, %v1231_v28, 0 }
 0x3ba   :  { %v789_v8 = vpack.c.bf16 %v778_v47, %v778_v47 }
 0x3bb   :  { %v5520_v15 = vpop.eup %5519 }
 0x3bc   :  { %v1281_v20 = vpop.permute.xlu1 %1280  ;;  %5143 = vmatmul.mubr.msk.bf16.vlgmr.msra.gmra.mrb[28].mxu0 %vm291_vm2, %v789_v8  ;;  %v782_v21 = vmul.f32 %v5520_v15, %v6061_v10 }
 0x3bd   :  { %5153 = vmatpush3.bf16.msra.mxu0 %v1088_v17  ;;  %5154 = vmatprep.mubr.msk.bf16.mxu0 %vm5719_vm1, %v5718_v6  ;;  %v1286_v44 = vsel %vm291_vm2, %v1281_v20, 0 }
 0x3be   :  { %5164 = vmatprep.subr.bf16.mxu0 %v5718_v6  ;;  %v791_v5 = vpack.c.bf16 %v782_v21, %v782_v21 }
 0x3c0   :  { %v1331_v22 = vpop.permute.xlu1 %1330 }
 0x3c1   :  { %v768_v25 = vpop.xlane.xlu0 %767  ;;  %v1336_v51 = vsel %vm291_vm2, %v1331_v22, 0 }
 0x3c2   :  { %5521 = vrcp.f32 %v768_v25 }
 0x3c4   :  { %5155 = vmatmul.mubr.msk.bf16.vlgmr.msra.gmra.mrb[32].mxu0 %vm291_vm2, %v791_v5  ;;  %v1381_v24 = vpop.permute.xlu1 %1380 }
 0x3c5   :  { %v1181_v37 = vpop.permute.xlu0 %1180  ;;  %5166 = vmatprep.mubr.msk.bf16.mxu0 %vm5719_vm1, %v5718_v6  ;;  %v1386_v48 = vsel %vm291_vm2, %v1381_v24, 0 }
 0x3c6   :  { %v1186_v41 = vsel %vm291_vm2, %v1181_v37, 0 }
 0x3c7   :  { %5165 = vmatpush3.bf16.xpose.msra.mxu0 %v1186_v41 }
 0x3c8   :  { %5176 = vmatprep.subr.bf16.mxu0 %v5718_v6  ;;  %v1431_v10 = vpop.permute.xlu1 %1430 }
 0x3c9   :  { %v1179_v32 = vpop.permute.xlu0 %1178  ;;  %v1436_v3 = vsel %vm291_vm2, %v1431_v10, 0 }
 0x3cc   :  { %v5522_v55 = vpop.eup %5521  ;;  %v1481_v14 = vpop.permute.xlu1 %1480 }
 0x3cd   :  { %v1229_v43 = vpop.permute.xlu0 %1228  ;;  %v784_v39 = vmul.f32 %v5522_v55, %v6065_v11  ;;  %v1486_v54 = vsel %vm291_vm2, %v1481_v14, 0 }
 0x3ce   :  { %5167 = vmatmul.mubr.msk.bf16.vlgmr.msra.gmra.mrb[36].mxu0 %vm291_vm2, %v1179_v32 }
 0x3cf   :  { %5177 = vmatpush3.bf16.xpose.msra.mxu0 %v1286_v44  ;;  %v792_v45 = vpack.c.bf16 %v784_v39, %v784_v39  ;;  %5178 = vmatprep.mubr.msk.bf16.mxu0 %vm5719_vm1, %v5718_v6 }
 0x3d0   :  { %5188 = vmatprep.subr.bf16.mxu0 %v5718_v6  ;;  %v1531_v23 = vpop.permute.xlu1 %1530 }
 0x3d1   :  { %5161 = vmatmul.mubr.msk.bf16.vlgmr.msra.gmra.mrb[32].mxu1 %vm291_vm2, %v792_v45  ;;  %v1279_v42 = vpop.permute.xlu0 %1278  ;;  %v1536_v59 = vsel %vm291_vm2, %v1531_v23, 0 }
 0x3d2   :  { %5171 = vmatpush3.bf16.xpose.msra.mxu1 %v1236_v27  ;;  %5172 = vmatprep.mubr.msk.bf16.mxu1 %vm5719_vm1, %v5718_v6 }
 0x3d3   :  { %5182 = vmatprep.subr.bf16.mxu1 %v5718_v6 }
 0x3d4   :  { %v1529_v53 = vpop.permute.xlu1 %1528 }
 0x3d5   :  { %v1329_v11 = vpop.permute.xlu0 %1328 }
 0x3d6   :  { %5179 = vmatmul.mubr.msk.bf16.vlgmr.msra.gmra.mrb[40].mxu0 %vm291_vm2, %v1279_v42 }
 0x3d7   :  { %5189 = vmatpush3.bf16.xpose.msra.mxu0 %v1386_v48  ;;  %5190 = vmatprep.mubr.msk.bf16.mxu0 %vm5719_vm1, %v5718_v6 }
 0x3d8   :  { %5200 = vmatprep.subr.bf16.mxu0 %v5718_v6  ;;  %v1691_v46 = vpop.permute.xlu1 %1690 }
 0x3d9   :  { %5173 = vmatmul.mubr.msk.bf16.vlgmr.msra.gmra.mrb[36].mxu1 %vm291_vm2, %v1229_v43  ;;  %v1379_v49 = vpop.permute.xlu0 %1378  ;;  %v1696_v9 = vsel %vm798_vm3, %v1691_v46, 0 }
 0x3da   :  { %5183 = vmatpush3.bf16.xpose.msra.mxu1 %v1336_v51  ;;  %5184 = vmatprep.mubr.msk.bf16.mxu1 %vm5719_vm1, %v5718_v6 }
 0x3db   :  { %5194 = vmatprep.subr.bf16.mxu1 %v5718_v6 }
 0x3dd   :  { %v1429_v61 = vpop.permute.xlu0 %1428 }
 0x3de   :  { %5191 = vmatmul.mubr.msk.bf16.vlgmr.msra.gmra.mrb[44].mxu0 %vm291_vm2, %v1379_v49 }
 0x3df   :  { %5201 = vmatpush3.bf16.xpose.msra.mxu0 %v1486_v54  ;;  %5202 = vmatprep.mubr.msk.bf16.mxu0 %vm5719_vm1, %v5718_v6 }
 0x3e0   :  { %5212 = vmatprep.subr.bf16.mxu0 %v5718_v6 }
 0x3e1   :  { %5185 = vmatmul.mubr.msk.bf16.vlgmr.msra.gmra.mrb[40].mxu1 %vm291_vm2, %v1329_v11  ;;  %v1479_v7 = vpop.permute.xlu0 %1478 }
 0x3e2   :  { %5195 = vmatpush3.bf16.xpose.msra.mxu1 %v1436_v3  ;;  %5196 = vmatprep.mubr.msk.bf16.mxu1 %vm5719_vm1, %v5718_v6 }
 0x3e3   :  { %5206 = vmatprep.subr.bf16.mxu1 %v5718_v6 }
 0x3e5   :  { %v1739_v2 = vpop.permute.xlu0 %1738 }
 0x3e6   :  { %5203 = vmatmul.mubr.msk.bf16.vlgmr.msra.gmra.mrb[48].mxu0 %vm291_vm2, %v1479_v7  ;;  %v1744_v28 = vsel %vm798_vm3, %v1739_v2, 0 }
 0x3e7   :  { %5213 = vmatpush3.bf16.msra.mxu0 %v1696_v9  ;;  %5214 = vmatprep.mubr.msk.bf16.mxu0 %vm5719_vm1, %v5718_v6 }
 0x3e8   :  { %5224 = vmatprep.subr.bf16.mxu0 %v5718_v6 }
 0x3e9   :  { %5197 = vmatmul.mubr.msk.bf16.vlgmr.msra.gmra.mrb[44].mxu1 %vm291_vm2, %v1429_v61 }
 0x3ea   :  { %5207 = vmatpush3.bf16.xpose.msra.mxu1 %v1536_v59  ;;  %5208 = vmatprep.mubr.msk.bf16.mxu1 %vm5719_vm1, %v5718_v6 }
 0x3eb   :  { %5218 = vmatprep.subr.bf16.mxu1 %v5718_v6 }
 0x3f1   :  { %5209 = vmatmul.mubr.msk.bf16.vlgmr.msra.gmra.mrb[48].mxu1 %vm291_vm2, %v1529_v53  ;;  %v4843_v53 = vunpack.c.h.bf16 %v5939_v4 }
 0x3f2   :  { %5219 = vmatpush3.bf16.msra.mxu1 %v1744_v28  ;;  %5220 = vmatprep.mubr.msk.bf16.mxu1 %vm5719_vm1, %v5718_v6 }
 0x3f3   :  { %5230 = vmatprep.subr.bf16.mxu1 %v5718_v6 }
 0x45a   :  { %v6184_v47 = vpop.f32.mrb[20].mxu0 }
 0x45b   :  { %v5120_v12 = vpop.f32.mrb[21].mxu0 }
 0x45c   :  { %v839_v8 = vpop.f32.mrb[22].mxu0 }
 0x45d   :  { %v5121_v15 = vpop.f32.mrb[23].mxu0 }
 0x45e   :  { %v4859_v15 = vunpack.c.h.bf16 %v5931_v63 }
 0x45f   :  { %v6186_v17 = vpop.f32.mrb[20].mxu1 }
 0x460   :  { %v5126_v20 = vpop.f32.mrb[21].mxu1 }
 0x461   :  { %v887_v21 = vpop.f32.mrb[22].mxu1 }
 0x462   :  { %v5127_v22 = vpop.f32.mrb[23].mxu1  ;;  %v6188_v25 = vpop.f32.mrb[24].mxu0 }
 0x463   :  { %v5132_v5 = vpop.f32.mrb[25].mxu0 }
 0x464   :  { %v935_v24 = vpop.f32.mrb[26].mxu0  ;;  %v4851_v5 = vunpack.c.h.bf16 %v5957_v33 }
 0x465   :  { %v5133_v37 = vpop.f32.mrb[27].mxu0 }
 0x467   :  { %v6190_v41 = vpop.f32.mrb[24].mxu1 }
 0x468   :  { %v5138_v32 = vpop.f32.mrb[25].mxu1 }
 0x469   :  { %v983_v10 = vpop.f32.mrb[26].mxu1 }
 0x46a   :  { %v5139_v55 = vpop.f32.mrb[27].mxu1 }
 0x46f   :  { %v6192_v43 = vpop.f32.mrb[28].mxu1 }
 0x470   :  { %v5150_v39 = vpop.f32.mrb[29].mxu1 }
 0x471   :  { %v1079_v44 = vpop.f32.mrb[30].mxu1 }
 0x472   :  { %v5151_v45 = vpop.f32.mrb[31].mxu1 }
 0x48f   :  { %v6194_v27 = vpop.f32.mrb[28].mxu0 }
 0x490   :  { %v5144_v14 = vpop.f32.mrb[29].mxu0 }
 0x491   :  { %v1031_v42 = vpop.f32.mrb[30].mxu0  ;;  %v4875_v14 = vunpack.c.h.bf16 %v5965_v38 }
 0x492   :  { %v5145_v11 = vpop.f32.mrb[31].mxu0 }
 0x497   :  { %v6196_v48 = vpop.f32.mrb[32].mxu0 }
 0x498   :  { %v5156_v23 = vpop.f32.mrb[33].mxu0 }
 0x499   :  { %v1127_v51 = vpop.f32.mrb[34].mxu0 }
 0x49a   :  { %v5157_v49 = vpop.f32.mrb[35].mxu0 }
 0x49b   :  { %v4867_v49 = vunpack.c.h.bf16 %v5981_v58 }
 0x4a1   :  { %v1222_v54 = vpop.f32.mrb[36].mxu0 }
 0x4a2   :  { %v1223_v61 = vadd.f32 %v1222_v54, %v5937_v1  ;;  %v5168_v3 = vpop.f32.mrb[37].mxu0 }
 0x4a3   :  { %v1225_v46 = vpop.f32.mrb[38].mxu0 }
 0x4a4   :  { %v6200_v7 = vpop.f32.mrb[32].mxu1  ;;  %v5169_v9 = vpop.f32.mrb[39].mxu0  ;;  %v6202_v59 = vadd.f32 %v4843_v53, %v1223_v61 }
 0x4a5   :  { %v5162_v2 = vpop.f32.mrb[33].mxu1 }
 0x4a6   :  { %v1175_v28 = vpop.f32.mrb[34].mxu1  ;;  %v1594_v12 = vsel %vm291_vm2, %v6202_v59, -inf }
 0x4a7   :  { %v5163_v8 = vpop.f32.mrb[35].mxu1  ;;  %1595 = vmax.xlane.f32.xlu0 %v1594_v12  ;;  %v4891_v12 = vunpack.c.h.bf16 %v5983_v60 }
 0x4a9   :  { %v1322_v4 = vpop.f32.mrb[40].mxu0 }
 0x4aa   :  { %v1323_v20 = vadd.f32 %v1322_v4, %v5934_v0  ;;  %v5180_v21 = vpop.f32.mrb[41].mxu0 }
 0x4ab   :  { %v1325_v22 = vpop.f32.mrb[42].mxu0  ;;  %v4883_v21 = vunpack.c.h.bf16 %v6003_v34 }
 0x4ac   :  { %v1272_v24 = vpop.f32.mrb[36].mxu1  ;;  %v5181_v37 = vpop.f32.mrb[43].mxu0  ;;  %v6209_v32 = vadd.f32 %v4859_v15, %v1323_v20 }
 0x4ad   :  { %v1273_v10 = vadd.f32 %v1272_v24, %v5960_v35  ;;  %v5174_v55 = vpop.f32.mrb[37].mxu1 }
 0x4ae   :  { %v1275_v39 = vpop.f32.mrb[38].mxu1  ;;  %v1600_v44 = vsel %vm291_vm2, %v6209_v32, -inf }
 0x4af   :  { %v5175_v45 = vpop.f32.mrb[39].mxu1  ;;  %1601 = vmax.xlane.f32.xlu0 %v1600_v44  ;;  %v1587_v63 = vadd.f32 %v4851_v5, %v1273_v10 }
 0x4b1   :  { %v1422_v42 = vpop.f32.mrb[44].mxu0  ;;  %v1597_v11 = vsel %vm291_vm2, %v1587_v63, -inf }
 0x4b2   :  { %v1423_v33 = vadd.f32 %v1422_v42, %v5963_v36  ;;  %1598 = vmax.xlane.f32.xlu1 %v1597_v11  ;;  %v5192_v23 = vpop.f32.mrb[45].mxu0 }
 0x4b3   :  { %v1425_v51 = vpop.f32.mrb[46].mxu0 }
 0x4b4   :  { %v1372_v53 = vpop.f32.mrb[40].mxu1  ;;  %v5193_v54 = vpop.f32.mrb[47].mxu0  ;;  %v1590_v61 = vadd.f32 %v4875_v14, %v1423_v33  ;;  %v4899_v14 = vunpack.c.h.bf16 %v6013_v50 }
 0x4b5   :  { %v1373_v3 = vadd.f32 %v1372_v53, %v5979_v57  ;;  %v5186_v46 = vpop.f32.mrb[41].mxu1  ;;  %v6237_v54 = vpop.permute.xlu1 %1786 }
 0x4b6   :  { %v1375_v9 = vpop.f32.mrb[42].mxu1  ;;  %v1606_v2 = vsel %vm291_vm2, %v1590_v61, -inf }
 0x4b7   :  { %v5187_v38 = vpop.f32.mrb[43].mxu1  ;;  %1607 = vmax.xlane.f32.xlu1 %v1606_v2  ;;  %v1589_v28 = vadd.f32 %v4867_v49, %v1373_v3 }
 0x4b9   :  { %v1522_v8 = vpop.f32.mrb[48].mxu0  ;;  %v1603_v15 = vsel %vm291_vm2, %v1589_v28, -inf  ;;  %v6240_v46 = vpop.permute.xlu1 %1834 }
 0x4ba   :  { %v1523_v4 = vadd.f32 %v1522_v8, %v5988_v62  ;;  %1604 = vmax.xlane.f32.xlu0 %v1603_v15  ;;  %v5204_v58 = vpop.f32.mrb[49].mxu0 }
 0x4bb   :  { %v1525_v20 = vpop.f32.mrb[50].mxu0 }
 0x4bc   :  { %v1472_v22 = vpop.f32.mrb[44].mxu1  ;;  %v5205_v5 = vpop.f32.mrb[51].mxu0  ;;  %v6224_v24 = vadd.f32 %v4891_v12, %v1523_v4 }
 0x4bd   :  { %v1473_v37 = vadd.f32 %v1472_v22, %v6009_v40  ;;  %v5198_v10 = vpop.f32.mrb[45].mxu1 }
 0x4be   :  { %v1475_v55 = vpop.f32.mrb[46].mxu1  ;;  %v1612_v60 = vsel %vm291_vm2, %v6224_v24, -inf }
 0x4bf   :  { %v5199_v39 = vpop.f32.mrb[47].mxu1  ;;  %1613 = vmax.xlane.f32.xlu1 %v1612_v60  ;;  %v1591_v44 = vadd.f32 %v4883_v21, %v1473_v37 }
 0x4c1   :  { %v1609_v45 = vsel %vm291_vm2, %v1591_v44, -inf }
 0x4c2   :  { %1610 = vmax.xlane.f32.xlu0 %v1609_v45 }
 0x4c4   :  { %v1572_v34 = vpop.f32.mrb[48].mxu1 }
 0x4c5   :  { %v1573_v42 = vadd.f32 %v1572_v34, %v6017_v52  ;;  %v5210_v11 = vpop.f32.mrb[49].mxu1 }
 0x4c6   :  { %v1575_v33 = vpop.f32.mrb[50].mxu1 }
 0x4c7   :  { %v5211_v23 = vpop.f32.mrb[51].mxu1  ;;  %v1593_v51 = vadd.f32 %v4899_v14, %v1573_v42 }
 0x4c9   :  { %v1615_v49 = vsel %vm291_vm2, %v1593_v51, -inf }
 0x4ca   :  { %1616 = vmax.xlane.f32.xlu0 %v1615_v49 }
 0x4d0   :  { %1930 = vrot.lane.b32.xlu1 %v5848_v30, %s5723_s10 }
 0x4e0   :  { %1882 = vrot.lane.b32.xlu0 %v5844_v26, %s5723_s10 }
 0x534   :  { %v1596_v53 = vpop.xlane.xlu0 %1595 }
 0x535   :  { %v1618_v50 = vsub.f32 %v6202_v59, %v1596_v53 }
 0x537   :  { %v1626_v3 = vmul.f32 1.442695, %v1618_v50 }
 0x539   :  { %5523 = vpow2.f32 %v1626_v3 }
 0x53c   :  { %v1602_v9 = vpop.xlane.xlu0 %1601 }
 0x53d   :  { %v1620_v2 = vsub.f32 %v6209_v32, %v1602_v9 }
 0x53f   :  { %v1630_v38 = vmul.f32 1.442695, %v1620_v2  ;;  %v1599_v12 = vpop.xlane.xlu1 %1598 }
 0x540   :  { %v1619_v8 = vsub.f32 %v1587_v63, %v1599_v12 }
 0x541   :  { %5525 = vpow2.f32 %v1630_v38 }
 0x542   :  { %v1628_v15 = vmul.f32 1.442695, %v1619_v8 }
 0x543   :  { %v6243_v4 = vpop.eup %5523 }
 0x544   :  { %5527 = vpow2.f32 %v1628_v15  ;;  %v1608_v58 = vpop.xlane.xlu1 %1607  ;;  %v1642_v20 = vsel %vm291_vm2, %v6243_v4, 0.0 }
 0x545   :  { %v1622_v59 = vsub.f32 %v1590_v61, %v1608_v58  ;;  %1643 = vadd.xlane.f32.xlu1 %v1642_v20 }
 0x547   :  { %v1634_v21 = vmul.f32 1.442695, %v1622_v59  ;;  %v1605_v22 = vpop.xlane.xlu0 %1604 }
 0x548   :  { %v1621_v5 = vsub.f32 %v1589_v28, %v1605_v22 }
 0x549   :  { %5529 = vpow2.f32 %v1634_v21  ;;  %v1792_v21 = vsel %vm798_vm3, %v6237_v54, 0 }
 0x54a   :  { %v1632_v37 = vmul.f32 1.442695, %v1621_v5 }
 0x54b   :  { %v6247_v32 = vpop.eup %5525 }
 0x54c   :  { %5531 = vpow2.f32 %v1632_v37  ;;  %v1648_v63 = vsel %vm291_vm2, %v6247_v32, 0.0  ;;  %v1614_v11 = vpop.xlane.xlu1 %1613 }
 0x54d   :  { %1649 = vadd.xlane.f32.xlu1 %v1648_v63  ;;  %v1624_v33 = vsub.f32 %v6224_v24, %v1614_v11 }
 0x54e   :  { %v6251_v10 = vpop.eup %5527 }
 0x54f   :  { %v1611_v55 = vpop.xlane.xlu0 %1610  ;;  %v1645_v60 = vsel %vm291_vm2, %v6251_v10, 0.0  ;;  %v1638_v23 = vmul.f32 1.442695, %v1624_v33 }
 0x550   :  { %v1623_v61 = vsub.f32 %v1591_v44, %v1611_v55  ;;  %1646 = vadd.xlane.f32.xlu0 %v1645_v60 }
 0x552   :  { %v1636_v39 = vmul.f32 1.442695, %v1623_v61 }
 0x553   :  { %v6255_v45 = vpop.eup %5529 }
 0x554   :  { %5533 = vpow2.f32 %v1636_v39  ;;  %v1654_v28 = vsel %vm291_vm2, %v6255_v45, 0.0 }
 0x555   :  { %1655 = vadd.xlane.f32.xlu1 %v1654_v28  ;;  %5535 = vpow2.f32 %v1638_v23  ;;  %v1840_v28 = vsel %vm798_vm3, %v6240_v46, 0 }
 0x556   :  { %v6259_v14 = vpop.eup %5531 }
 0x557   :  { %v1651_v34 = vsel %vm291_vm2, %v6259_v14, 0.0  ;;  %v1617_v49 = vpop.xlane.xlu0 %1616 }
 0x558   :  { %1652 = vadd.xlane.f32.xlu0 %v1651_v34  ;;  %v1625_v53 = vsub.f32 %v1593_v51, %v1617_v49  ;;  %v1931_v51 = vpop.permute.xlu1 %1930 }
 0x55a   :  { %v1640_v50 = vmul.f32 1.442695, %v1625_v53 }
 0x55b   :  { %v1883_v12 = vpop.permute.xlu0 %1882 }
 0x55c   :  { %5537 = vpow2.f32 %v1640_v50  ;;  %v1888_v54 = vsel %vm798_vm3, %v1883_v12, 0 }
 0x55e   :  { %v6263_v42 = vpop.eup %5533 }
 0x55f   :  { %v1657_v44 = vsel %vm291_vm2, %v6263_v42, 0.0  ;;  %v6272_v3 = vpop.eup %5535 }
 0x560   :  { %1658 = vadd.xlane.f32.xlu0 %v1657_v44  ;;  %v1660_v9 = vsel %vm291_vm2, %v6272_v3, 0.0 }
 0x566   :  { %2026 = vrot.lane.b32.xlu1 %v5851_v31, %s5723_s10  ;;  %v6276_v2 = vpop.eup %5537 }
 0x567   :  { %v1663_v24 = vsel %vm291_vm2, %v6276_v2, 0.0 }
 0x576   :  { %1978 = vrot.lane.b32.xlu0 %v5846_v29, %s5723_s10 }
 0x58a   :  { %1661 = vadd.xlane.f32.xlu1 %v1660_v9 }
 0x595   :  { %1664 = vadd.xlane.f32.xlu0 %v1663_v24 }
 0x59b   :  { %2126 = vrot.lane.b32.xlu1 %v5840_v19, %s5724_s4 }
 0x59f   :  { %2176 = vrot.lane.b32.xlu1 %v5832_v13, %s5724_s4 }
 0x5a3   :  { %2226 = vrot.lane.b32.xlu1 %v5838_v18, %s5724_s4 }
 0x5a7   :  { %2276 = vrot.lane.b32.xlu1 %v5844_v26, %s5724_s4 }
 0x5ab   :  { %2326 = vrot.lane.b32.xlu1 %v5848_v30, %s5724_s4  ;;  %2076 = vrot.lane.b32.xlu0 %v5834_v16, %s5724_s4 }
 0x5af   :  { %2376 = vrot.lane.b32.xlu1 %v5846_v29, %s5724_s4  ;;  %2074 = vrot.lane.b32.xlu0 %v5834_v16, %s5725_s11 }
 0x5b3   :  { %2426 = vrot.lane.b32.xlu1 %v5851_v31, %s5724_s4  ;;  %2124 = vrot.lane.b32.xlu0 %v5840_v19, %s5725_s11 }
 0x5b7   :  { %2424 = vrot.lane.b32.xlu1 %v5851_v31, %s5725_s11  ;;  %2174 = vrot.lane.b32.xlu0 %v5832_v13, %s5725_s11 }
 0x5bb   :  { %2586 = vrot.lane.b32.xlu1 %v5834_v16, %s5726_s12  ;;  %2224 = vrot.lane.b32.xlu0 %v5838_v18, %s5725_s11 }
 0x5bf   :  { %2682 = vrot.lane.b32.xlu1 %v5832_v13, %s5726_s12  ;;  %2274 = vrot.lane.b32.xlu0 %v5844_v26, %s5725_s11 }
 0x5c3   :  { %2730 = vrot.lane.b32.xlu1 %v5838_v18, %s5726_s12  ;;  %2324 = vrot.lane.b32.xlu0 %v5848_v30, %s5725_s11 }
 0x5c7   :  { %2374 = vrot.lane.b32.xlu0 %v5846_v29, %s5725_s11 }
 0x5cb   :  { %2634 = vrot.lane.b32.xlu0 %v5840_v19, %s5726_s12 }
 0x5d2   :  { %v1644_v38 = vpop.xlane.xlu1 %1643 }
 0x5d3   :  { %5539 = vrcp.f32 %v1644_v38 }
 0x5da   :  { %v1650_v8 = vpop.xlane.xlu1 %1649 }
 0x5db   :  { %5541 = vrcp.f32 %v1650_v8 }
 0x5dd   :  { %v5540_v15 = vpop.eup %5539  ;;  %v1647_v58 = vpop.xlane.xlu0 %1646 }
 0x5de   :  { %5543 = vrcp.f32 %v1647_v58  ;;  %v1667_v20 = vmul.f32 %v5540_v15, %v6243_v4 }
 0x5e0   :  { %v1682_v59 = vpack.c.bf16 %v1667_v20, %v1667_v20 }
 0x5e2   :  { %5215 = vmatmul.mubr.msk.bf16.vlgmr.msra.gmra.mrb[52].mxu0 %vm291_vm2, %v1682_v59  ;;  %v1656_v22 = vpop.xlane.xlu1 %1655 }
 0x5e3   :  { %5225 = vmatpush3.bf16.msra.mxu0 %v1792_v21  ;;  %5545 = vrcp.f32 %v1656_v22  ;;  %5226 = vmatprep.mubr.msk.bf16.mxu0 %vm5719_vm1, %v5718_v6 }
 0x5e4   :  { %5236 = vmatprep.subr.bf16.mxu0 %v5718_v6 }
 0x5e5   :  { %v5542_v5 = vpop.eup %5541  ;;  %v1653_v37 = vpop.xlane.xlu0 %1652 }
 0x5e6   :  { %5547 = vrcp.f32 %v1653_v37  ;;  %v1671_v63 = vmul.f32 %v5542_v5, %v6247_v32  ;;  %v2027_v53 = vpop.permute.xlu1 %2026 }
 0x5e7   :  { %v2032_v9 = vsel %vm798_vm3, %v2027_v53, 0 }
 0x5e8   :  { %v5544_v4 = vpop.eup %5543  ;;  %v1684_v55 = vpack.c.bf16 %v1671_v63, %v1671_v63 }
 0x5e9   :  { %v1669_v60 = vmul.f32 %v5544_v4, %v6251_v10 }
 0x5ea   :  { %5227 = vmatmul.mubr.msk.bf16.vlgmr.msra.gmra.mrb[56].mxu0 %vm291_vm2, %v1684_v55 }
 0x5eb   :  { %5237 = vmatpush3.bf16.msra.mxu0 %v1888_v54  ;;  %v1683_v61 = vpack.c.bf16 %v1669_v60, %v1669_v60  ;;  %5238 = vmatprep.mubr.msk.bf16.mxu0 %vm5719_vm1, %v5718_v6 }
 0x5ec   :  { %5248 = vmatprep.subr.bf16.mxu0 %v5718_v6 }
 0x5ed   :  { %v5546_v39 = vpop.eup %5545  ;;  %5221 = vmatmul.mubr.msk.bf16.vlgmr.msra.gmra.mrb[52].mxu1 %vm291_vm2, %v1683_v61  ;;  %v1659_v32 = vpop.xlane.xlu0 %1658 }
 0x5ee   :  { %5231 = vmatpush3.bf16.msra.mxu1 %v1840_v28  ;;  %5549 = vrcp.f32 %v1659_v32  ;;  %v1675_v10 = vmul.f32 %v5546_v39, %v6255_v45  ;;  %5232 = vmatprep.mubr.msk.bf16.mxu1 %vm5719_vm1, %v5718_v6  ;;  %v1936_v45 = vsel %vm798_vm3, %v1931_v51, 0 }
 0x5ef   :  { %5242 = vmatprep.subr.bf16.mxu1 %v5718_v6 }
 0x5f0   :  { %v5548_v34 = vpop.eup %5547  ;;  %v1686_v44 = vpack.c.bf16 %v1675_v10, %v1675_v10 }
 0x5f1   :  { %v1979_v11 = vpop.permute.xlu0 %1978  ;;  %v1673_v33 = vmul.f32 %v5548_v34, %v6259_v14 }
 0x5f2   :  { %v1984_v23 = vsel %vm798_vm3, %v1979_v11, 0  ;;  %5239 = vmatmul.mubr.msk.bf16.vlgmr.msra.gmra.mrb[60].mxu0 %vm291_vm2, %v1686_v44 }
 0x5f3   :  { %5249 = vmatpush3.bf16.msra.mxu0 %v1984_v23  ;;  %v1685_v46 = vpack.c.bf16 %v1673_v33, %v1673_v33  ;;  %5250 = vmatprep.mubr.msk.bf16.mxu0 %vm5719_vm1, %v5718_v6 }
 0x5f4   :  { %5260 = vmatprep.subr.bf16.mxu0 %v5718_v6 }
 0x5f5   :  { %5233 = vmatmul.mubr.msk.bf16.vlgmr.msra.gmra.mrb[56].mxu1 %vm291_vm2, %v1685_v46 }
 0x5f6   :  { %5243 = vmatpush3.bf16.msra.mxu1 %v1936_v45  ;;  %5244 = vmatprep.mubr.msk.bf16.mxu1 %vm5719_vm1, %v5718_v6 }
 0x5f7   :  { %5254 = vmatprep.subr.bf16.mxu1 %v5718_v6 }
 0x5f8   :  { %v5550_v14 = vpop.eup %5549 }
 0x5f9   :  { %v1677_v49 = vmul.f32 %v5550_v14, %v6263_v42 }
 0x5fb   :  { %v1687_v50 = vpack.c.bf16 %v1677_v49, %v1677_v49 }
 0x5fd   :  { %5245 = vmatmul.mubr.msk.bf16.vlgmr.msra.gmra.mrb[60].mxu1 %vm291_vm2, %v1687_v50 }
 0x5fe   :  { %5255 = vmatpush3.bf16.msra.mxu1 %v2032_v9  ;;  %5256 = vmatprep.mubr.msk.bf16.mxu1 %vm5719_vm1, %v5718_v6 }
 0x5ff   :  { %5266 = vmatprep.subr.bf16.mxu1 %v5718_v6 }
 0x617   :  { %v1662_v24 = vpop.xlane.xlu1 %1661 }
 0x618   :  { %5551 = vrcp.f32 %v1662_v24 }
 0x61b   :  { %v2127_v51 = vpop.permute.xlu1 %2126 }
 0x61c   :  { %v2132_v60 = vsel %vm291_vm2, %v2127_v51, 0 }
 0x61f   :  { %v2177_v38 = vpop.permute.xlu1 %2176 }
 0x622   :  { %v5552_v12 = vpop.eup %5551  ;;  %v1665_v8 = vpop.xlane.xlu0 %1664 }
 0x623   :  { %5553 = vrcp.f32 %v1665_v8  ;;  %v2227_v42 = vpop.permute.xlu1 %2226  ;;  %v1679_v15 = vmul.f32 %v5552_v12, %v6272_v3  ;;  %v2182_v3 = vsel %vm291_vm2, %v2177_v38, 0 }
 0x624   :  { %v2232_v32 = vsel %vm291_vm2, %v2227_v42, 0 }
 0x625   :  { %v1688_v58 = vpack.c.bf16 %v1679_v15, %v1679_v15 }
 0x626   :  { %v2077_v20 = vpop.permute.xlu0 %2076 }
 0x627   :  { %v2082_v59 = vsel %vm291_vm2, %v2077_v20, 0  ;;  %v2277_v21 = vpop.permute.xlu1 %2276  ;;  %5251 = vmatmul.mubr.msk.bf16.vlgmr.msra.gmra.mrb[64].mxu0 %vm291_vm2, %v1688_v58 }
 0x628   :  { %5261 = vmatpush3.bf16.xpose.msra.mxu0 %v2082_v59  ;;  %5262 = vmatprep.mubr.msk.bf16.mxu0 %vm5719_vm1, %v5718_v6  ;;  %v2282_v39 = vsel %vm291_vm2, %v2277_v21, 0 }
 0x629   :  { %5272 = vmatprep.subr.bf16.mxu0 %v5718_v6 }
 0x62a   :  { %v2075_v22 = vpop.permute.xlu0 %2074 }
 0x62b   :  { %v2327_v5 = vpop.permute.xlu1 %2326 }
 0x62c   :  { %v2332_v33 = vsel %vm291_vm2, %v2327_v5, 0 }
 0x62d   :  { %v5554_v37 = vpop.eup %5553 }
 0x62e   :  { %v2125_v63 = vpop.permute.xlu0 %2124  ;;  %v1681_v4 = vmul.f32 %v5554_v37, %v6276_v2 }
 0x62f   :  { %5263 = vmatmul.mubr.msk.bf16.vlgmr.msra.gmra.mrb[68].mxu0 %vm291_vm2, %v2075_v22  ;;  %v2377_v54 = vpop.permute.xlu1 %2376 }
 0x630   :  { %5273 = vmatpush3.bf16.xpose.msra.mxu0 %v2182_v3  ;;  %v1689_v55 = vpack.c.bf16 %v1681_v4, %v1681_v4  ;;  %5274 = vmatprep.mubr.msk.bf16.mxu0 %vm5719_vm1, %v5718_v6  ;;  %v2382_v44 = vsel %vm291_vm2, %v2377_v54, 0 }
 0x631   :  { %5284 = vmatprep.subr.bf16.mxu0 %v5718_v6 }
 0x632   :  { %5257 = vmatmul.mubr.msk.bf16.vlgmr.msra.gmra.mrb[64].mxu1 %vm291_vm2, %v1689_v55  ;;  %v2175_v61 = vpop.permute.xlu0 %2174 }
 0x633   :  { %5267 = vmatpush3.bf16.xpose.msra.mxu1 %v2132_v60  ;;  %5268 = vmatprep.mubr.msk.bf16.mxu1 %vm5719_vm1, %v5718_v6  ;;  %v2427_v28 = vpop.permute.xlu1 %2426 }
 0x634   :  { %5278 = vmatprep.subr.bf16.mxu1 %v5718_v6  ;;  %v2432_v14 = vsel %vm291_vm2, %v2427_v28, 0 }
 0x636   :  { %v2225_v2 = vpop.permute.xlu0 %2224 }
 0x637   :  { %5275 = vmatmul.mubr.msk.bf16.vlgmr.msra.gmra.mrb[72].mxu0 %vm291_vm2, %v2175_v61  ;;  %v2425_v34 = vpop.permute.xlu1 %2424 }
 0x638   :  { %5285 = vmatpush3.bf16.xpose.msra.mxu0 %v2282_v39  ;;  %5286 = vmatprep.mubr.msk.bf16.mxu0 %vm5719_vm1, %v5718_v6 }
 0x639   :  { %5296 = vmatprep.subr.bf16.mxu0 %v5718_v6 }
 0x63a   :  { %5269 = vmatmul.mubr.msk.bf16.vlgmr.msra.gmra.mrb[68].mxu1 %vm291_vm2, %v2125_v63  ;;  %v2275_v10 = vpop.permute.xlu0 %2274 }
 0x63b   :  { %5279 = vmatpush3.bf16.xpose.msra.mxu1 %v2232_v32  ;;  %5280 = vmatprep.mubr.msk.bf16.mxu1 %vm5719_vm1, %v5718_v6  ;;  %v2587_v23 = vpop.permute.xlu1 %2586 }
 0x63c   :  { %5290 = vmatprep.subr.bf16.mxu1 %v5718_v6  ;;  %v2592_v45 = vsel %vm798_vm3, %v2587_v23, 0 }
 0x63e   :  { %v2325_v11 = vpop.permute.xlu0 %2324 }
 0x63f   :  { %5287 = vmatmul.mubr.msk.bf16.vlgmr.msra.gmra.mrb[76].mxu0 %vm291_vm2, %v2275_v10 }
 0x640   :  { %5297 = vmatpush3.bf16.xpose.msra.mxu0 %v2382_v44  ;;  %5298 = vmatprep.mubr.msk.bf16.mxu0 %vm5719_vm1, %v5718_v6 }
 0x641   :  { %5308 = vmatprep.subr.bf16.mxu0 %v5718_v6 }
 0x642   :  { %5281 = vmatmul.mubr.msk.bf16.vlgmr.msra.gmra.mrb[72].mxu1 %vm291_vm2, %v2225_v2  ;;  %v2375_v46 = vpop.permute.xlu0 %2374 }
 0x643   :  { %5291 = vmatpush3.bf16.xpose.msra.mxu1 %v2332_v33  ;;  %5292 = vmatprep.mubr.msk.bf16.mxu1 %vm5719_vm1, %v5718_v6 }
 0x644   :  { %5302 = vmatprep.subr.bf16.mxu1 %v5718_v6 }
 0x646   :  { %v2635_v49 = vpop.permute.xlu0 %2634 }
 0x647   :  { %5299 = vmatmul.mubr.msk.bf16.vlgmr.msra.gmra.mrb[80].mxu0 %vm291_vm2, %v2375_v46  ;;  %v2640_v53 = vsel %vm798_vm3, %v2635_v49, 0 }
 0x648   :  { %5309 = vmatpush3.bf16.msra.mxu0 %v2592_v45  ;;  %5310 = vmatprep.mubr.msk.bf16.mxu0 %vm5719_vm1, %v5718_v6 }
 0x649   :  { %5320 = vmatprep.subr.bf16.mxu0 %v5718_v6 }
 0x64a   :  { %5293 = vmatmul.mubr.msk.bf16.vlgmr.msra.gmra.mrb[76].mxu1 %vm291_vm2, %v2325_v11 }
 0x64b   :  { %5303 = vmatpush3.bf16.xpose.msra.mxu1 %v2432_v14  ;;  %5304 = vmatprep.mubr.msk.bf16.mxu1 %vm5719_vm1, %v5718_v6 }
 0x64c   :  { %5314 = vmatprep.subr.bf16.mxu1 %v5718_v6 }
 0x652   :  { %5305 = vmatmul.mubr.msk.bf16.vlgmr.msra.gmra.mrb[80].mxu1 %vm291_vm2, %v2425_v34  ;;  %v6408_v34 = vld [vmem:[#allocation2 + $0x8] sm:$0xff]  }
 0x653   :  { %5315 = vmatpush3.bf16.msra.mxu1 %v2640_v53  ;;  %5316 = vmatprep.mubr.msk.bf16.mxu1 %vm5719_vm1, %v5718_v6  ;;  %v4846_v44 = vunpack.c.l.bf16 %v6408_v34 }
 0x654   :  { %5326 = vmatprep.subr.bf16.mxu1 %v5718_v6 }
 0x6b5   :  { %v6394_v50 = vpop.f32.mrb[52].mxu0 }
 0x6b6   :  { %v5216_v9 = vpop.f32.mrb[53].mxu0 }
 0x6b7   :  { %v1735_v24 = vpop.f32.mrb[54].mxu0  ;;  %v6416_v9 = vld [vmem:[#allocation2 + $0x28] sm:$0xff]  }
 0x6b8   :  { %v5217_v51 = vpop.f32.mrb[55].mxu0 }
 0x6bd   :  { %v6396_v38 = vpop.f32.mrb[56].mxu0 }
 0x6be   :  { %v5228_v12 = vpop.f32.mrb[57].mxu0 }
 0x6bf   :  { %v1831_v8 = vpop.f32.mrb[58].mxu0 }
 0x6c0   :  { %v6398_v42 = vpop.f32.mrb[52].mxu1  ;;  %v5229_v15 = vpop.f32.mrb[59].mxu0  ;;  %v4862_v8 = vunpack.c.l.bf16 %v6416_v9 }
 0x6c1   :  { %v5222_v58 = vpop.f32.mrb[53].mxu1  ;;  %v6421_v15 = vld [vmem:[#allocation2 + $0x18] sm:$0xff]  }
 0x6c2   :  { %v1783_v20 = vpop.f32.mrb[54].mxu1 }
 0x6c3   :  { %v5223_v59 = vpop.f32.mrb[55].mxu1 }
 0x6c5   :  { %v6400_v21 = vpop.f32.mrb[60].mxu0 }
 0x6c6   :  { %v5240_v22 = vpop.f32.mrb[61].mxu0 }
 0x6c7   :  { %v1927_v5 = vpop.f32.mrb[62].mxu0 }
 0x6c8   :  { %v6402_v37 = vpop.f32.mrb[56].mxu1  ;;  %v5241_v63 = vpop.f32.mrb[63].mxu0  ;;  %v4854_v5 = vunpack.c.l.bf16 %v6421_v15 }
 0x6c9   :  { %v5234_v4 = vpop.f32.mrb[57].mxu1 }
 0x6ca   :  { %v1879_v3 = vpop.f32.mrb[58].mxu1 }
 0x6cb   :  { %v5235_v55 = vpop.f32.mrb[59].mxu1 }
 0x6d0   :  { %v6404_v60 = vpop.f32.mrb[60].mxu1 }
 0x6d1   :  { %v5246_v54 = vpop.f32.mrb[61].mxu1 }
 0x6d2   :  { %v1975_v61 = vpop.f32.mrb[62].mxu1 }
 0x6d3   :  { %v5247_v2 = vpop.f32.mrb[63].mxu1  ;;  %v6428_v61 = vld [vmem:[#allocation2 + $0x48] sm:$0xff]  }
 0x6fa   :  { %v6406_v39 = vpop.f32.mrb[64].mxu0 }
 0x6fb   :  { %v5252_v28 = vpop.f32.mrb[65].mxu0 }
 0x6fc   :  { %v2023_v32 = vpop.f32.mrb[66].mxu0 }
 0x6fd   :  { %v5253_v10 = vpop.f32.mrb[67].mxu0 }
 0x702   :  { %v2118_v11 = vpop.f32.mrb[68].mxu0 }
 0x703   :  { %v2119_v33 = vadd.f32 %v2118_v11, %v5937_v1  ;;  %v5264_v23 = vpop.f32.mrb[69].mxu0  ;;  %v6435_v11 = vld [vmem:[#allocation2 + $0x38] sm:$0xff]  }
 0x704   :  { %v2121_v46 = vpop.f32.mrb[70].mxu0 }
 0x705   :  { %v6412_v45 = vpop.f32.mrb[64].mxu1  ;;  %v5265_v14 = vpop.f32.mrb[71].mxu0  ;;  %v6414_v49 = vadd.f32 %v4846_v44, %v2119_v33  ;;  %v4878_v44 = vunpack.c.l.bf16 %v6428_v61 }
 0x706   :  { %v5258_v53 = vpop.f32.mrb[65].mxu1 }
 0x707   :  { %v2071_v24 = vpop.f32.mrb[66].mxu1  ;;  %v2490_v51 = vsel %vm291_vm2, %v6414_v49, -inf }
 0x708   :  { %v5259_v12 = vpop.f32.mrb[67].mxu1  ;;  %2491 = vmax.xlane.f32.xlu0 %v2490_v51  ;;  %v4870_v24 = vunpack.c.l.bf16 %v6435_v11 }
 0x70a   :  { %v2218_v58 = vpop.f32.mrb[72].mxu0 }
 0x70b   :  { %v2219_v20 = vadd.f32 %v2218_v58, %v5934_v0  ;;  %v5276_v59 = vpop.f32.mrb[73].mxu0 }
 0x70c   :  { %v2221_v22 = vpop.f32.mrb[74].mxu0  ;;  %v6442_v59 = vld [vmem:[#allocation2 + $0x68] sm:$0xff]  }
 0x70d   :  { %v2168_v63 = vpop.f32.mrb[68].mxu1  ;;  %v5277_v4 = vpop.f32.mrb[75].mxu0  ;;  %v6425_v3 = vadd.f32 %v4862_v8, %v2219_v20 }
 0x70e   :  { %v2169_v55 = vadd.f32 %v2168_v63, %v5960_v35  ;;  %v5270_v54 = vpop.f32.mrb[69].mxu1 }
 0x70f   :  { %v2171_v2 = vpop.f32.mrb[70].mxu1  ;;  %v2496_v28 = vsel %vm291_vm2, %v6425_v3, -inf  ;;  %v6446_v54 = vld [vmem:[#allocation2 + $0x58] sm:$0xff]  }
 0x710   :  { %v5271_v32 = vpop.f32.mrb[71].mxu1  ;;  %2497 = vmax.xlane.f32.xlu0 %v2496_v28  ;;  %v6432_v10 = vadd.f32 %v4854_v5, %v2169_v55  ;;  %v4894_v55 = vunpack.c.l.bf16 %v6442_v59 }
 0x712   :  { %v2318_v33 = vpop.f32.mrb[76].mxu0  ;;  %v2493_v23 = vsel %vm291_vm2, %v6432_v10, -inf }
 0x713   :  { %v2319_v46 = vadd.f32 %v2318_v33, %v5963_v36  ;;  %2494 = vmax.xlane.f32.xlu1 %v2493_v23  ;;  %v5288_v14 = vpop.f32.mrb[77].mxu0  ;;  %v4886_v23 = vunpack.c.l.bf16 %v6446_v54 }
 0x714   :  { %v2321_v53 = vpop.f32.mrb[78].mxu0 }
 0x715   :  { %v2268_v51 = vpop.f32.mrb[72].mxu1  ;;  %v5289_v12 = vpop.f32.mrb[79].mxu0  ;;  %v2486_v8 = vadd.f32 %v4878_v44, %v2319_v46 }
 0x716   :  { %v2269_v58 = vadd.f32 %v2268_v51, %v5979_v57  ;;  %v5282_v20 = vpop.f32.mrb[73].mxu1 }
 0x717   :  { %v2271_v22 = vpop.f32.mrb[74].mxu1  ;;  %v2502_v5 = vsel %vm291_vm2, %v2486_v8, -inf }
 0x718   :  { %v5283_v63 = vpop.f32.mrb[75].mxu1  ;;  %2503 = vmax.xlane.f32.xlu1 %v2502_v5  ;;  %v2485_v4 = vadd.f32 %v4870_v24, %v2269_v58  ;;  %v6456_v5 = vld [vmem:[#allocation2 + $0x78] sm:$0xff]  }
 0x71a   :  { %v2418_v2 = vpop.f32.mrb[80].mxu0  ;;  %v2499_v28 = vsel %vm291_vm2, %v2485_v4, -inf }
 0x71b   :  { %v2419_v32 = vadd.f32 %v2418_v2, %v5988_v62  ;;  %2500 = vmax.xlane.f32.xlu0 %v2499_v28  ;;  %v5300_v44 = vpop.f32.mrb[81].mxu0 }
 0x71c   :  { %v2421_v33 = vpop.f32.mrb[82].mxu0 }
 0x71d   :  { %v6451_v46 = vadd.f32 %v4894_v55, %v2419_v32  ;;  %v2368_v14 = vpop.f32.mrb[76].mxu1  ;;  %v5301_v53 = vpop.f32.mrb[83].mxu0  ;;  %v4902_v55 = vunpack.c.l.bf16 %v6456_v5 }
 0x71e   :  { %v2369_v24 = vadd.f32 %v2368_v14, %v6009_v40  ;;  %v5294_v51 = vpop.f32.mrb[77].mxu1 }
 0x71f   :  { %v2371_v12 = vpop.f32.mrb[78].mxu1  ;;  %v2508_v58 = vsel %vm291_vm2, %v6451_v46, -inf }
 0x720   :  { %v5295_v20 = vpop.f32.mrb[79].mxu1  ;;  %2509 = vmax.xlane.f32.xlu1 %v2508_v58  ;;  %v2487_v22 = vadd.f32 %v4886_v23, %v2369_v24  ;;  %v6466_v24 = vpop.permute.xlu1 %2682 }
 0x722   :  { %v2505_v63 = vsel %vm291_vm2, %v2487_v22, -inf }
 0x723   :  { %2506 = vmax.xlane.f32.xlu0 %v2505_v63 }
 0x724   :  { %v6469_v58 = vpop.permute.xlu1 %2730 }
 0x725   :  { %v2468_v2 = vpop.f32.mrb[80].mxu1 }
 0x726   :  { %v2469_v28 = vadd.f32 %v2468_v2, %v6017_v52  ;;  %v5306_v32 = vpop.f32.mrb[81].mxu1 }
 0x727   :  { %v2471_v44 = vpop.f32.mrb[82].mxu1 }
 0x728   :  { %v2489_v33 = vadd.f32 %v4902_v55, %v2469_v28  ;;  %v5307_v14 = vpop.f32.mrb[83].mxu1 }
 0x72a   :  { %v2511_v53 = vsel %vm291_vm2, %v2489_v33, -inf }
 0x72b   :  { %2512 = vmax.xlane.f32.xlu0 %v2511_v53 }
 0x731   :  { %2826 = vrot.lane.b32.xlu1 %v5848_v30, %s5726_s12 }
 0x741   :  { %2778 = vrot.lane.b32.xlu0 %v5844_v26, %s5726_s12 }
 0x795   :  { %v2492_v23 = vpop.xlane.xlu0 %2491 }
 0x796   :  { %v2514_v51 = vsub.f32 %v6414_v49, %v2492_v23 }
 0x798   :  { %v2522_v12 = vmul.f32 1.442695, %v2514_v51 }
 0x79a   :  { %5555 = vpow2.f32 %v2522_v12 }
 0x79d   :  { %v2498_v20 = vpop.xlane.xlu0 %2497 }
 0x79e   :  { %v2516_v63 = vsub.f32 %v6425_v3, %v2498_v20 }
 0x7a0   :  { %v2526_v55 = vmul.f32 1.442695, %v2516_v63  ;;  %v2495_v2 = vpop.xlane.xlu1 %2494 }
 0x7a1   :  { %v2515_v28 = vsub.f32 %v6432_v10, %v2495_v2 }
 0x7a2   :  { %5557 = vpow2.f32 %v2526_v55 }
 0x7a3   :  { %v2524_v32 = vmul.f32 1.442695, %v2515_v28 }
 0x7a4   :  { %v6473_v44 = vpop.eup %5555 }
 0x7a5   :  { %5559 = vpow2.f32 %v2524_v32  ;;  %v2504_v14 = vpop.xlane.xlu1 %2503  ;;  %v2538_v49 = vsel %vm291_vm2, %v6473_v44, 0.0 }
 0x7a6   :  { %v2518_v53 = vsub.f32 %v2486_v8, %v2504_v14  ;;  %2539 = vadd.xlane.f32.xlu1 %v2538_v49 }
 0x7a8   :  { %v2530_v23 = vmul.f32 1.442695, %v2518_v53  ;;  %v2501_v51 = vpop.xlane.xlu0 %2500 }
 0x7a9   :  { %v2517_v12 = vsub.f32 %v2485_v4, %v2501_v51 }
 0x7aa   :  { %5561 = vpow2.f32 %v2530_v23 }
 0x7ab   :  { %v2528_v3 = vmul.f32 1.442695, %v2517_v12 }
 0x7ac   :  { %v6477_v20 = vpop.eup %5557 }
 0x7ad   :  { %5563 = vpow2.f32 %v2528_v3  ;;  %v2544_v10 = vsel %vm291_vm2, %v6477_v20, 0.0  ;;  %v2510_v23 = vpop.xlane.xlu1 %2509 }
 0x7ae   :  { %2545 = vadd.xlane.f32.xlu1 %v2544_v10  ;;  %v2520_v51 = vsub.f32 %v6451_v46, %v2510_v23 }
 0x7af   :  { %v6481_v63 = vpop.eup %5559 }
 0x7b0   :  { %v2507_v55 = vpop.xlane.xlu0 %2506  ;;  %v2541_v2 = vsel %vm291_vm2, %v6481_v63, 0.0  ;;  %v2534_v12 = vmul.f32 1.442695, %v2520_v51 }
 0x7b1   :  { %v2519_v8 = vsub.f32 %v2487_v22, %v2507_v55  ;;  %2542 = vadd.xlane.f32.xlu0 %v2541_v2 }
 0x7b3   :  { %v2532_v28 = vmul.f32 1.442695, %v2519_v8 }
 0x7b4   :  { %v6485_v32 = vpop.eup %5561 }
 0x7b5   :  { %5565 = vpow2.f32 %v2532_v28  ;;  %v2550_v4 = vsel %vm291_vm2, %v6485_v32, 0.0 }
 0x7b6   :  { %2551 = vadd.xlane.f32.xlu1 %v2550_v4  ;;  %5567 = vpow2.f32 %v2534_v12 }
 0x7b7   :  { %v6489_v14 = vpop.eup %5563 }
 0x7b8   :  { %v2547_v49 = vsel %vm291_vm2, %v6489_v14, 0.0  ;;  %v2513_v3 = vpop.xlane.xlu0 %2512 }
 0x7b9   :  { %2548 = vadd.xlane.f32.xlu0 %v2547_v49  ;;  %v2521_v10 = vsub.f32 %v2489_v33, %v2513_v3  ;;  %v2827_v33 = vpop.permute.xlu1 %2826  ;;  %v2688_v3 = vsel %vm798_vm3, %v6466_v24, 0 }
 0x7bb   :  { %v2536_v55 = vmul.f32 1.442695, %v2521_v10 }
 0x7bc   :  { %v2779_v49 = vpop.permute.xlu0 %2778 }
 0x7bd   :  { %5569 = vpow2.f32 %v2536_v55  ;;  %v2784_v24 = vsel %vm798_vm3, %v2779_v49, 0 }
 0x7bf   :  { %v6493_v53 = vpop.eup %5565 }
 0x7c0   :  { %v2553_v22 = vsel %vm291_vm2, %v6493_v53, 0.0  ;;  %v6502_v2 = vpop.eup %5567 }
 0x7c1   :  { %2554 = vadd.xlane.f32.xlu0 %v2553_v22  ;;  %v2556_v8 = vsel %vm291_vm2, %v6502_v2, 0.0 }
 0x7c7   :  { %2922 = vrot.lane.b32.xlu1 %v5851_v31, %s5726_s12  ;;  %v6506_v28 = vpop.eup %5569 }
 0x7c8   :  { %v2559_v46 = vsel %vm291_vm2, %v6506_v28, 0.0 }
 0x7d7   :  { %2874 = vrot.lane.b32.xlu0 %v5846_v29, %s5726_s12 }
 0x7eb   :  { %2557 = vadd.xlane.f32.xlu1 %v2556_v8 }
 0x7f6   :  { %2560 = vadd.xlane.f32.xlu0 %v2559_v46 }
 0x7fc   :  { %3022 = vrot.lane.b32.xlu1 %v5840_v19, %s5727_s13 }
 0x800   :  { %3072 = vrot.lane.b32.xlu1 %v5832_v13, %s5727_s13 }
 0x804   :  { %3122 = vrot.lane.b32.xlu1 %v5838_v18, %s5727_s13 }
 0x808   :  { %3172 = vrot.lane.b32.xlu1 %v5844_v26, %s5727_s13 }
 0x80c   :  { %3222 = vrot.lane.b32.xlu1 %v5848_v30, %s5727_s13  ;;  %2972 = vrot.lane.b32.xlu0 %v5834_v16, %s5727_s13 }
 0x810   :  { %3272 = vrot.lane.b32.xlu1 %v5846_v29, %s5727_s13  ;;  %2970 = vrot.lane.b32.xlu0 %v5834_v16, %s5728_s0 }
 0x814   :  { %3322 = vrot.lane.b32.xlu1 %v5851_v31, %s5727_s13  ;;  %3020 = vrot.lane.b32.xlu0 %v5840_v19, %s5728_s0 }
 0x818   :  { %3320 = vrot.lane.b32.xlu1 %v5851_v31, %s5728_s0  ;;  %3070 = vrot.lane.b32.xlu0 %v5832_v13, %s5728_s0 }
 0x81c   :  { %3482 = vrot.lane.b32.xlu1 %v5834_v16, %s5729_s5  ;;  %3120 = vrot.lane.b32.xlu0 %v5838_v18, %s5728_s0 }
 0x820   :  { %3170 = vrot.lane.b32.xlu0 %v5844_v26, %s5728_s0 }
 0x824   :  { %3220 = vrot.lane.b32.xlu0 %v5848_v30, %s5728_s0 }
 0x828   :  { %3270 = vrot.lane.b32.xlu0 %v5846_v29, %s5728_s0 }
 0x833   :  { %v2540_v4 = vpop.xlane.xlu1 %2539 }
 0x834   :  { %5571 = vrcp.f32 %v2540_v4 }
 0x83b   :  { %v2546_v22 = vpop.xlane.xlu1 %2545 }
 0x83c   :  { %5573 = vrcp.f32 %v2546_v22 }
 0x83e   :  { %v5572_v23 = vpop.eup %5571  ;;  %v2543_v51 = vpop.xlane.xlu0 %2542 }
 0x83f   :  { %5575 = vrcp.f32 %v2543_v51  ;;  %v2563_v12 = vmul.f32 %v5572_v23, %v6473_v44 }
 0x841   :  { %v2578_v16 = vpack.c.bf16 %v2563_v12, %v2563_v12  ;;  %v2736_v12 = vsel %vm798_vm3, %v6469_v58, 0 }
 0x843   :  { %5311 = vmatmul.mubr.msk.bf16.vlgmr.msra.gmra.mrb[84].mxu0 %vm291_vm2, %v2578_v16  ;;  %v2552_v10 = vpop.xlane.xlu1 %2551 }
 0x844   :  { %5321 = vmatpush3.bf16.msra.mxu0 %v2688_v3  ;;  %5577 = vrcp.f32 %v2552_v10  ;;  %5322 = vmatprep.mubr.msk.bf16.mxu0 %vm5719_vm1, %v5718_v6 }
 0x845   :  { %5332 = vmatprep.subr.bf16.mxu0 %v5718_v6 }
 0x846   :  { %v5574_v55 = vpop.eup %5573  ;;  %v2549_v8 = vpop.xlane.xlu0 %2548 }
 0x847   :  { %5579 = vrcp.f32 %v2549_v8  ;;  %v2567_v46 = vmul.f32 %v5574_v55, %v6477_v20 }
 0x849   :  { %v5576_v44 = vpop.eup %5575  ;;  %v2580_v4 = vpack.c.bf16 %v2567_v46, %v2567_v46  ;;  %v2923_v46 = vpop.permute.xlu1 %2922 }
 0x84a   :  { %v2565_v22 = vmul.f32 %v5576_v44, %v6481_v63 }
 0x84b   :  { %5323 = vmatmul.mubr.msk.bf16.vlgmr.msra.gmra.mrb[88].mxu0 %vm291_vm2, %v2580_v4  ;;  %v2928_v4 = vsel %vm798_vm3, %v2923_v46, 0 }
 0x84c   :  { %5333 = vmatpush3.bf16.msra.mxu0 %v2784_v24  ;;  %v2579_v23 = vpack.c.bf16 %v2565_v22, %v2565_v22  ;;  %5334 = vmatprep.mubr.msk.bf16.mxu0 %vm5719_vm1, %v5718_v6 }
 0x84d   :  { %5344 = vmatprep.subr.bf16.mxu0 %v5718_v6 }
 0x84e   :  { %v5578_v51 = vpop.eup %5577  ;;  %5317 = vmatmul.mubr.msk.bf16.vlgmr.msra.gmra.mrb[84].mxu1 %vm291_vm2, %v2579_v23  ;;  %v2555_v20 = vpop.xlane.xlu0 %2554 }
 0x84f   :  { %5327 = vmatpush3.bf16.msra.mxu1 %v2736_v12  ;;  %5581 = vrcp.f32 %v2555_v20  ;;  %v2571_v63 = vmul.f32 %v5578_v51, %v6485_v32  ;;  %5328 = vmatprep.mubr.msk.bf16.mxu1 %vm5719_vm1, %v5718_v6  ;;  %v2832_v32 = vsel %vm798_vm3, %v2827_v33, 0 }
 0x850   :  { %5338 = vmatprep.subr.bf16.mxu1 %v5718_v6 }
 0x851   :  { %v5580_v49 = vpop.eup %5579  ;;  %v2582_v16 = vpack.c.bf16 %v2571_v63, %v2571_v63 }
 0x852   :  { %v2875_v3 = vpop.permute.xlu0 %2874  ;;  %v2569_v10 = vmul.f32 %v5580_v49, %v6489_v14 }
 0x853   :  { %v2880_v55 = vsel %vm798_vm3, %v2875_v3, 0  ;;  %5335 = vmatmul.mubr.msk.bf16.vlgmr.msra.gmra.mrb[92].mxu0 %vm291_vm2, %v2582_v16 }
 0x854   :  { %5345 = vmatpush3.bf16.msra.mxu0 %v2880_v55  ;;  %v2581_v58 = vpack.c.bf16 %v2569_v10, %v2569_v10  ;;  %5346 = vmatprep.mubr.msk.bf16.mxu0 %vm5719_vm1, %v5718_v6 }
 0x855   :  { %5356 = vmatprep.subr.bf16.mxu0 %v5718_v6 }
 0x856   :  { %5329 = vmatmul.mubr.msk.bf16.vlgmr.msra.gmra.mrb[88].mxu1 %vm291_vm2, %v2581_v58 }
 0x857   :  { %5339 = vmatpush3.bf16.msra.mxu1 %v2832_v32  ;;  %5340 = vmatprep.mubr.msk.bf16.mxu1 %vm5719_vm1, %v5718_v6 }
 0x858   :  { %5350 = vmatprep.subr.bf16.mxu1 %v5718_v6 }
 0x859   :  { %v5582_v14 = vpop.eup %5581 }
 0x85a   :  { %v2573_v8 = vmul.f32 %v5582_v14, %v6493_v53 }
 0x85c   :  { %v2583_v44 = vpack.c.bf16 %v2573_v8, %v2573_v8 }
 0x85e   :  { %5341 = vmatmul.mubr.msk.bf16.vlgmr.msra.gmra.mrb[92].mxu1 %vm291_vm2, %v2583_v44 }
 0x85f   :  { %5351 = vmatpush3.bf16.msra.mxu1 %v2928_v4  ;;  %5352 = vmatprep.mubr.msk.bf16.mxu1 %vm5719_vm1, %v5718_v6 }
 0x860   :  { %5362 = vmatprep.subr.bf16.mxu1 %v5718_v6 }
 0x878   :  { %v2558_v33 = vpop.xlane.xlu1 %2557 }
 0x879   :  { %5583 = vrcp.f32 %v2558_v33 }
 0x87c   :  { %v3023_v22 = vpop.permute.xlu1 %3022 }
 0x87d   :  { %v3028_v8 = vsel %vm291_vm2, %v3023_v22, 0 }
 0x880   :  { %v3073_v24 = vpop.permute.xlu1 %3072 }
 0x881   :  { %v3078_v32 = vsel %vm291_vm2, %v3073_v24, 0 }
 0x883   :  { %v5584_v23 = vpop.eup %5583  ;;  %v2561_v51 = vpop.xlane.xlu0 %2560 }
 0x884   :  { %v2575_v53 = vmul.f32 %v5584_v23, %v6502_v2  ;;  %5585 = vrcp.f32 %v2561_v51  ;;  %v3123_v12 = vpop.permute.xlu1 %3122 }
 0x885   :  { %v3128_v22 = vsel %vm291_vm2, %v3123_v12, 0 }
 0x886   :  { %v2584_v20 = vpack.c.bf16 %v2575_v53, %v2575_v53 }
 0x887   :  { %v2973_v63 = vpop.permute.xlu0 %2972 }
 0x888   :  { %v2978_v49 = vsel %vm291_vm2, %v2973_v63, 0  ;;  %v3173_v16 = vpop.permute.xlu1 %3172  ;;  %5347 = vmatmul.mubr.msk.bf16.vlgmr.msra.gmra.mrb[96].mxu0 %vm291_vm2, %v2584_v20 }
 0x889   :  { %5357 = vmatpush3.bf16.xpose.msra.mxu0 %v2978_v49  ;;  %5358 = vmatprep.mubr.msk.bf16.mxu0 %vm5719_vm1, %v5718_v6  ;;  %v3178_v4 = vsel %vm291_vm2, %v3173_v16, 0 }
 0x88a   :  { %5368 = vmatprep.subr.bf16.mxu0 %v5718_v6 }
 0x88b   :  { %v2971_v3 = vpop.permute.xlu0 %2970 }
 0x88c   :  { %v3223_v10 = vpop.permute.xlu1 %3222 }
 0x88d   :  { %v3228_v12 = vsel %vm291_vm2, %v3223_v10, 0 }
 0x88e   :  { %v5586_v55 = vpop.eup %5585 }
 0x88f   :  { %v2577_v2 = vmul.f32 %v5586_v55, %v6506_v28  ;;  %v3021_v58 = vpop.permute.xlu0 %3020 }
 0x890   :  { %5359 = vmatmul.mubr.msk.bf16.vlgmr.msra.gmra.mrb[100].mxu0 %vm291_vm2, %v2971_v3  ;;  %v3273_v46 = vpop.permute.xlu1 %3272 }
 0x891   :  { %5369 = vmatpush3.bf16.xpose.msra.mxu0 %v3078_v32  ;;  %v2585_v14 = vpack.c.bf16 %v2577_v2, %v2577_v2  ;;  %5370 = vmatprep.mubr.msk.bf16.mxu0 %vm5719_vm1, %v5718_v6  ;;  %v3278_v51 = vsel %vm291_vm2, %v3273_v46, 0 }
 0x892   :  { %5380 = vmatprep.subr.bf16.mxu0 %v5718_v6 }
 0x893   :  { %5353 = vmatmul.mubr.msk.bf16.vlgmr.msra.gmra.mrb[96].mxu1 %vm291_vm2, %v2585_v14  ;;  %v3071_v44 = vpop.permute.xlu0 %3070 }
 0x894   :  { %5363 = vmatpush3.bf16.xpose.msra.mxu1 %v3028_v8  ;;  %5364 = vmatprep.mubr.msk.bf16.mxu1 %vm5719_vm1, %v5718_v6  ;;  %v3323_v33 = vpop.permute.xlu1 %3322 }
 0x895   :  { %5374 = vmatprep.subr.bf16.mxu1 %v5718_v6  ;;  %v3328_v16 = vsel %vm291_vm2, %v3323_v33, 0 }
 0x897   :  { %v3121_v28 = vpop.permute.xlu0 %3120 }
 0x898   :  { %5371 = vmatmul.mubr.msk.bf16.vlgmr.msra.gmra.mrb[104].mxu0 %vm291_vm2, %v3071_v44  ;;  %v3321_v23 = vpop.permute.xlu1 %3320 }
 0x899   :  { %5381 = vmatpush3.bf16.xpose.msra.mxu0 %v3178_v4  ;;  %5382 = vmatprep.mubr.msk.bf16.mxu0 %vm5719_vm1, %v5718_v6 }
 0x89a   :  { %5392 = vmatprep.subr.bf16.mxu0 %v5718_v6 }
 0x89b   :  { %5365 = vmatmul.mubr.msk.bf16.vlgmr.msra.gmra.mrb[100].mxu1 %vm291_vm2, %v3021_v58  ;;  %v3171_v24 = vpop.permute.xlu0 %3170 }
 0x89c   :  { %5375 = vmatpush3.bf16.xpose.msra.mxu1 %v3128_v22  ;;  %5376 = vmatprep.mubr.msk.bf16.mxu1 %vm5719_vm1, %v5718_v6  ;;  %v3483_v20 = vpop.permute.xlu1 %3482 }
 0x89d   :  { %5386 = vmatprep.subr.bf16.mxu1 %v5718_v6  ;;  %v3488_v49 = vsel %vm798_vm3, %v3483_v20, 0 }
 0x89f   :  { %v3221_v53 = vpop.permute.xlu0 %3220 }
 0x8a0   :  { %5383 = vmatmul.mubr.msk.bf16.vlgmr.msra.gmra.mrb[108].mxu0 %vm291_vm2, %v3171_v24 }
 0x8a1   :  { %5393 = vmatpush3.bf16.xpose.msra.mxu0 %v3278_v51  ;;  %5394 = vmatprep.mubr.msk.bf16.mxu0 %vm5719_vm1, %v5718_v6 }
 0x8a2   :  { %5404 = vmatprep.subr.bf16.mxu0 %v5718_v6 }
 0x8a3   :  { %5377 = vmatmul.mubr.msk.bf16.vlgmr.msra.gmra.mrb[104].mxu1 %vm291_vm2, %v3121_v28  ;;  %v3271_v63 = vpop.permute.xlu0 %3270 }
 0x8a4   :  { %5387 = vmatpush3.bf16.xpose.msra.mxu1 %v3228_v12  ;;  %5388 = vmatprep.mubr.msk.bf16.mxu1 %vm5719_vm1, %v5718_v6 }
 0x8a5   :  { %5398 = vmatprep.subr.bf16.mxu1 %v5718_v6 }
 0x8a8   :  { %5395 = vmatmul.mubr.msk.bf16.vlgmr.msra.gmra.mrb[112].mxu0 %vm291_vm2, %v3271_v63 }
 0x8a9   :  { %5405 = vmatpush3.bf16.msra.mxu0 %v3488_v49  ;;  %5406 = vmatprep.mubr.msk.bf16.mxu0 %vm5719_vm1, %v5718_v6 }
 0x8aa   :  { %5416 = vmatprep.subr.bf16.mxu0 %v5718_v6 }
 0x8ab   :  { %5389 = vmatmul.mubr.msk.bf16.vlgmr.msra.gmra.mrb[108].mxu1 %vm291_vm2, %v3221_v53 }
 0x8ac   :  { %5399 = vmatpush3.bf16.xpose.msra.mxu1 %v3328_v16  ;;  %5400 = vmatprep.mubr.msk.bf16.mxu1 %vm5719_vm1, %v5718_v6 }
 0x8ad   :  { %5410 = vmatprep.subr.bf16.mxu1 %v5718_v6 }
 0x8b3   :  { %5401 = vmatmul.mubr.msk.bf16.vlgmr.msra.gmra.mrb[112].mxu1 %vm291_vm2, %v3321_v23 }
 0x8b4   :  { %5412 = vmatprep.mubr.msk.bf16.mxu1 %vm5719_vm1, %v5718_v6 }
 0x916   :  { %v6616_v3 = vpop.f32.mrb[84].mxu0 }
 0x917   :  { %v5312_v10 = vpop.f32.mrb[85].mxu0 }
 0x918   :  { %v2631_v55 = vpop.f32.mrb[86].mxu0 }
 0x919   :  { %v5313_v2 = vpop.f32.mrb[87].mxu0 }
 0x91e   :  { %v6618_v58 = vpop.f32.mrb[88].mxu0 }
 0x91f   :  { %v5324_v32 = vpop.f32.mrb[89].mxu0 }
 0x920   :  { %v2727_v14 = vpop.f32.mrb[90].mxu0 }
 0x921   :  { %v6620_v8 = vpop.f32.mrb[84].mxu1  ;;  %v5325_v46 = vpop.f32.mrb[91].mxu0 }
 0x922   :  { %v5318_v44 = vpop.f32.mrb[85].mxu1  ;;  %v4847_v46 = vunpack.c.h.bf16 %v6408_v34 }
 0x923   :  { %v2679_v28 = vpop.f32.mrb[86].mxu1 }
 0x924   :  { %v5319_v4 = vpop.f32.mrb[87].mxu1 }
 0x926   :  { %v6622_v33 = vpop.f32.mrb[92].mxu0 }
 0x927   :  { %v5336_v22 = vpop.f32.mrb[93].mxu0 }
 0x928   :  { %v2823_v24 = vpop.f32.mrb[94].mxu0 }
 0x929   :  { %v6624_v23 = vpop.f32.mrb[88].mxu1  ;;  %v5337_v51 = vpop.f32.mrb[95].mxu0 }
 0x92a   :  { %v5330_v53 = vpop.f32.mrb[89].mxu1 }
 0x92b   :  { %v2775_v12 = vpop.f32.mrb[90].mxu1 }
 0x92c   :  { %v5331_v20 = vpop.f32.mrb[91].mxu1 }
 0x931   :  { %v6626_v63 = vpop.f32.mrb[92].mxu1 }
 0x932   :  { %v5342_v49 = vpop.f32.mrb[93].mxu1 }
 0x933   :  { %v2871_v16 = vpop.f32.mrb[94].mxu1 }
 0x934   :  { %v5343_v10 = vpop.f32.mrb[95].mxu1 }
 0x935   :  { %v4863_v10 = vunpack.c.h.bf16 %v6416_v9 }
 0x95b   :  { %v6628_v55 = vpop.f32.mrb[96].mxu0 }
 0x95c   :  { %v5348_v2 = vpop.f32.mrb[97].mxu0 }
 0x95d   :  { %v2919_v32 = vpop.f32.mrb[98].mxu0 }
 0x95e   :  { %v5349_v14 = vpop.f32.mrb[99].mxu0 }
 0x95f   :  { %v4855_v14 = vunpack.c.h.bf16 %v6421_v15 }
 0x963   :  { %v3014_v44 = vpop.f32.mrb[100].mxu0 }
 0x964   :  { %v3015_v28 = vadd.f32 %v3014_v44, %v5937_v1  ;;  %v5360_v4 = vpop.f32.mrb[101].mxu0 }
 0x965   :  { %v3017_v22 = vpop.f32.mrb[102].mxu0 }
 0x966   :  { %v6632_v24 = vadd.f32 %v4847_v46, %v3015_v28  ;;  %v6634_v51 = vpop.f32.mrb[96].mxu1  ;;  %v5361_v53 = vpop.f32.mrb[103].mxu0 }
 0x967   :  { %v5354_v12 = vpop.f32.mrb[97].mxu1 }
 0x968   :  { %v2967_v20 = vpop.f32.mrb[98].mxu1  ;;  %v3386_v49 = vsel %vm291_vm2, %v6632_v24, -inf }
 0x969   :  { %v5355_v16 = vpop.f32.mrb[99].mxu1  ;;  %3387 = vmax.xlane.f32.xlu0 %v3386_v49 }
 0x96b   :  { %v3114_v34 = vpop.f32.mrb[104].mxu0 }
 0x96c   :  { %v3115_v2 = vadd.f32 %v3114_v34, %v5934_v0  ;;  %v5372_v1 = vpop.f32.mrb[105].mxu0  ;;  %v4879_v0 = vunpack.c.h.bf16 %v6428_v61  ;;  %v4871_v34 = vunpack.c.h.bf16 %v6435_v11 }
 0x96d   :  { %v3117_v32 = vpop.f32.mrb[106].mxu0 }
 0x96e   :  { %v6641_v46 = vadd.f32 %v4863_v10, %v3115_v2  ;;  %v3064_v44 = vpop.f32.mrb[100].mxu1  ;;  %v5373_v28 = vpop.f32.mrb[107].mxu0 }
 0x96f   :  { %v3065_v4 = vadd.f32 %v3064_v44, %v5960_v35  ;;  %v5366_v22 = vpop.f32.mrb[101].mxu1 }
 0x970   :  { %v3067_v53 = vpop.f32.mrb[102].mxu1  ;;  %v3392_v12 = vsel %vm291_vm2, %v6641_v46, -inf }
 0x971   :  { %v6646_v20 = vadd.f32 %v4855_v14, %v3065_v4  ;;  %v5367_v9 = vpop.f32.mrb[103].mxu1  ;;  %3393 = vmax.xlane.f32.xlu0 %v3392_v12 }
 0x973   :  { %v3214_v49 = vpop.f32.mrb[108].mxu0  ;;  %v3389_v15 = vsel %vm291_vm2, %v6646_v20, -inf }
 0x974   :  { %v3215_v16 = vadd.f32 %v3214_v49, %v5963_v36  ;;  %3390 = vmax.xlane.f32.xlu1 %v3389_v15  ;;  %v5384_v10 = vpop.f32.mrb[109].mxu0  ;;  %v4895_v36 = vunpack.c.h.bf16 %v6442_v59 }
 0x975   :  { %v3217_v35 = vpop.f32.mrb[110].mxu0 }
 0x976   :  { %v6653_v2 = vadd.f32 %v4879_v0, %v3215_v16  ;;  %v3164_v1 = vpop.f32.mrb[104].mxu1  ;;  %v5385_v32 = vpop.f32.mrb[111].mxu0 }
 0x977   :  { %v3165_v14 = vadd.f32 %v3164_v1, %v5979_v57  ;;  %v5378_v44 = vpop.f32.mrb[105].mxu1  ;;  %v4887_v57 = vunpack.c.h.bf16 %v6446_v54  ;;  %v4903_v54 = vunpack.c.h.bf16 %v6456_v5  ;;  %v5730_v5 = vmov 0  }
 0x978   :  { %v3167_v28 = vpop.f32.mrb[106].mxu1  ;;  %v3398_v61 = vsel %vm291_vm2, %v6653_v2, -inf  ;;  %5482 = vset.pattern.permute.xlu1 %v5730_v5  ;;  %5481 = vset.pattern.permute.xlu0 %v5730_v5 }
 0x979   :  { %v3381_v4 = vadd.f32 %v4871_v34, %v3165_v14  ;;  %v5379_v22 = vpop.f32.mrb[107].mxu1  ;;  %3399 = vmax.xlane.f32.xlu1 %v3398_v61 }
 0x97b   :  { %v3314_v53 = vpop.f32.mrb[112].mxu0  ;;  %v3395_v12 = vsel %vm291_vm2, %v3381_v4, -inf }
 0x97c   :  { %v3315_v11 = vadd.f32 %v3314_v53, %v5988_v62  ;;  %3396 = vmax.xlane.f32.xlu0 %v3395_v12  ;;  %v5396_v9 = vpop.f32.mrb[113].mxu0 }
 0x97d   :  { %v3317_v0 = vpop.f32.mrb[114].mxu0 }
 0x97e   :  { %v6662_v49 = vadd.f32 %v4895_v36, %v3315_v11  ;;  %v3264_v15 = vpop.f32.mrb[108].mxu1  ;;  %v5397_v16 = vpop.f32.mrb[115].mxu0 }
 0x97f   :  { %v3265_v10 = vadd.f32 %v3264_v15, %v6009_v40  ;;  %v5390_v35 = vpop.f32.mrb[109].mxu1 }
 0x980   :  { %v3267_v34 = vpop.f32.mrb[110].mxu1  ;;  %v3404_v59 = vsel %vm291_vm2, %v6662_v49, -inf }
 0x981   :  { %v6667_v1 = vadd.f32 %v4887_v57, %v3265_v10  ;;  %v5391_v32 = vpop.f32.mrb[111].mxu1  ;;  %3405 = vmax.xlane.f32.xlu1 %v3404_v59 }
 0x983   :  { %v3401_v62 = vsel %vm291_vm2, %v6667_v1, -inf }
 0x984   :  { %3402 = vmax.xlane.f32.xlu0 %v3401_v62 }
 0x986   :  { %v3364_v14 = vpop.f32.mrb[112].mxu1 }
 0x987   :  { %v3365_v44 = vadd.f32 %v3364_v14, %v6017_v52  ;;  %v5402_v28 = vpop.f32.mrb[113].mxu1 }
 0x988   :  { %v3367_v40 = vpop.f32.mrb[114].mxu1 }
 0x989   :  { %v3385_v61 = vadd.f32 %v4903_v54, %v3365_v44  ;;  %v5403_v22 = vpop.f32.mrb[115].mxu1 }
 0x98b   :  { %v3407_v36 = vsel %vm291_vm2, %v3385_v61, -inf }
 0x98c   :  { %3408 = vmax.xlane.f32.xlu0 %v3407_v36 }
 0x992   :  { %3578 = vrot.lane.b32.xlu1 %v5832_v13, %s5729_s5 }
 0x996   :  { %3626 = vrot.lane.b32.xlu1 %v5838_v18, %s5729_s5 }
 0x9a2   :  { %3530 = vrot.lane.b32.xlu0 %v5840_v19, %s5729_s5 }
 0x9f6   :  { %v3388_v52 = vpop.xlane.xlu0 %3387 }
 0x9f7   :  { %v3410_v53 = vsub.f32 %v6632_v24, %v3388_v52 }
 0x9f9   :  { %v3418_v12 = vmul.f32 1.442695, %v3410_v53 }
 0x9fb   :  { %5587 = vpow2.f32 %v3418_v12 }
 0x9fe   :  { %v3394_v11 = vpop.xlane.xlu0 %3393 }
 0x9ff   :  { %v3412_v9 = vsub.f32 %v6641_v46, %v3394_v11 }
 0xa01   :  { %v3422_v0 = vmul.f32 1.442695, %v3412_v9  ;;  %v3391_v57 = vpop.xlane.xlu1 %3390 }
 0xa02   :  { %v3411_v13 = vsub.f32 %v6646_v20, %v3391_v57 }
 0xa03   :  { %5589 = vpow2.f32 %v3422_v0 }
 0xa04   :  { %v3420_v18 = vmul.f32 1.442695, %v3411_v13 }
 0xa05   :  { %v6683_v15 = vpop.eup %5587 }
 0xa06   :  { %5591 = vpow2.f32 %v3420_v18  ;;  %v3434_v19 = vsel %vm291_vm2, %v6683_v15, 0.0  ;;  %v3400_v44 = vpop.xlane.xlu1 %3399 }
 0xa07   :  { %3435 = vadd.xlane.f32.xlu1 %v3434_v19  ;;  %v3414_v28 = vsub.f32 %v6653_v2, %v3400_v44  ;;  %v6757_v44 = vld [vmem:[%s7198_s2 + $0x20] sm:$0xff] }
 0xa09   :  { %v3397_v16 = vpop.xlane.xlu0 %3396  ;;  %v3426_v22 = vmul.f32 1.442695, %v3414_v28 }
 0xa0a   :  { %v3413_v24 = vsub.f32 %v3381_v4, %v3397_v16  ;;  %v6736_v16 = vld [vmem:[%s7198_s2 + $0x10] sm:$0xff] }
 0xa0c   :  { %v3424_v10 = vmul.f32 1.442695, %v3413_v24 }
 0xa0d   :  { %v6687_v35 = vpop.eup %5589 }
 0xa0e   :  { %5593 = vpow2.f32 %v3424_v10  ;;  %v3440_v46 = vsel %vm291_vm2, %v6687_v35, 0.0  ;;  %v3406_v40 = vpop.xlane.xlu1 %3405  ;;  %v6741_v10 = vld [vmem:[%s7198_s2 + $0x8] sm:$0xff] }
 0xa0f   :  { %3441 = vadd.xlane.f32.xlu1 %v3440_v46  ;;  %v3416_v36 = vsub.f32 %v6662_v49, %v3406_v40  ;;  %5595 = vpow2.f32 %v3426_v22  ;;  %v4028_v46 = vsel %vm4013_vm4, %v6736_v16, 0.0 }
 0xa10   :  { %v6691_v20 = vpop.eup %5591 }
 0xa11   :  { %v3437_v34 = vsel %vm291_vm2, %v6691_v20, 0.0  ;;  %v3403_v59 = vpop.xlane.xlu0 %3402  ;;  %v3430_v5 = vmul.f32 1.442695, %v3416_v36 }
 0xa12   :  { %3438 = vadd.xlane.f32.xlu0 %v3437_v34  ;;  %v3415_v52 = vsub.f32 %v6667_v1, %v3403_v59  ;;  %v6721_v1 = vld [vmem:[%s7198_s2] sm:$0xff]  ;;  %v4021_v34 = vsel %vm4013_vm4, %v6741_v10, 0.0 }
 0xa13   :  { %5597 = vpow2.f32 %v3430_v5  ;;  %v4014_v0 = vsel %vm4013_vm4, %v6721_v1, 0.0 }
 0xa14   :  { %v3428_v53 = vmul.f32 1.442695, %v3415_v52  ;;  %v4015_v13 = vrot.slane %v4014_v0, 4 }
 0xa16   :  { %5599 = vpow2.f32 %v3428_v53  ;;  %v4016_v19 = vadd.f32 %v4015_v13, %v4014_v0 }
 0xa18   :  { %v6695_v32 = vpop.eup %5593  ;;  %v4017_v24 = vrot.slane %v4016_v19, 2 }
 0xa19   :  { %v3409_v62 = vpop.xlane.xlu0 %3408  ;;  %v3443_v4 = vsel %vm291_vm2, %v6695_v32, 0.0 }
 0xa1a   :  { %3444 = vadd.xlane.f32.xlu0 %v3443_v4  ;;  %v3417_v12 = vsub.f32 %v3385_v61, %v3409_v62  ;;  %v4018_v59 = vadd.f32 %v4017_v24, %v4016_v19  ;;  %v6751_v62 = vld [vmem:[%s7198_s2 + $0x18] sm:$0xff]  ;;  %v4022_v4 = vrot.slane %v4021_v34, 4 }
 0xa1b   :  { %v4035_v28 = vsel %vm4013_vm4, %v6751_v62, 0.0 }
 0xa1c   :  { %v3432_v11 = vmul.f32 1.442695, %v3417_v12  ;;  %v4023_v40 = vadd.f32 %v4022_v4, %v4021_v34  ;;  %v4036_v5 = vrot.slane %v4035_v28, 4  ;;  %v4042_v12 = vsel %vm4013_vm4, %v6757_v44, 0.0 }
 0xa1d   :  { %v3531_v54 = vpop.permute.xlu0 %3530 }
 0xa1e   :  { %v3536_v14 = vsel %vm798_vm3, %v3531_v54, 0  ;;  %5601 = vpow2.f32 %v3432_v11  ;;  %v4024_v52 = vrot.slane %v4023_v40, 2 }
 0xa1f   :  { %5411 = vmatpush3.bf16.msra.mxu1 %v3536_v14  ;;  %v4019_v14 = vrot.slane %v4018_v59, 1 }
 0xa20   :  { %3722 = vrot.lane.b32.xlu1 %v5848_v30, %s5729_s5  ;;  %5422 = vmatprep.subr.bf16.mxu1 %v5718_v6  ;;  %v6708_v30 = vpop.eup %5595 }
 0xa21   :  { %v3446_v2 = vsel %vm291_vm2, %v6708_v30, 0.0  ;;  %v6712_v9 = vpop.eup %5597  ;;  %v4020_v36 = vadd.f32 %v4019_v14, %v4018_v59 }
 0xa22   :  { %v6716_v49 = vpop.eup %5599 }
 0xa23   :  { %v3449_v61 = vsel %vm291_vm2, %v6716_v49, 0.0  ;;  %v4070_v11 = vadd.f32 1e-06, %v4020_v36 }
 0xa28   :  { %v6727_v57 = vpop.eup %5601 }
 0xa29   :  { %v3455_v18 = vsel %vm291_vm2, %v6727_v57, 0.0 }
 0xa30   :  { %3674 = vrot.lane.b32.xlu0 %v5844_v26, %s5729_s5  ;;  %v3452_v26 = vsel %vm291_vm2, %v6712_v9, 0.0 }
 0xa44   :  { %3447 = vadd.xlane.f32.xlu1 %v3446_v2  ;;  %v4037_v2 = vadd.f32 %v4036_v5, %v4035_v28 }
 0xa46   :  { %v4038_v0 = vrot.slane %v4037_v2, 2 }
 0xa48   :  { %3453 = vadd.xlane.f32.xlu1 %v3452_v26  ;;  %v4043_v26 = vrot.slane %v4042_v12, 4  ;;  %v4039_v19 = vadd.f32 %v4038_v0, %v4037_v2 }
 0xa4a   :  { %v4040_v4 = vrot.slane %v4039_v19, 1 }
 0xa4f   :  { %3450 = vadd.xlane.f32.xlu0 %v3449_v61  ;;  %v4025_v61 = vadd.f32 %v4024_v52, %v4023_v40  ;;  %v4041_v40 = vadd.f32 %v4040_v4, %v4039_v19 }
 0xa51   :  { %v4026_v24 = vrot.slane %v4025_v61, 1  ;;  %v4073_v36 = vadd.f32 1e-06, %v4041_v40 }
 0xa53   :  { %3456 = vadd.xlane.f32.xlu0 %v3455_v18  ;;  %v4044_v18 = vadd.f32 %v4043_v26, %v4042_v12  ;;  %v4027_v59 = vadd.f32 %v4026_v24, %v4025_v61 }
 0xa55   :  { %v4045_v34 = vrot.slane %v4044_v18, 2  ;;  %v4071_v28 = vadd.f32 1e-06, %v4027_v59 }
 0xa59   :  { %3818 = vrot.lane.b32.xlu1 %v5851_v31, %s5729_s5  ;;  %v4029_v31 = vrot.slane %v4028_v46, 4 }
 0xa5b   :  { %v4030_v54 = vadd.f32 %v4029_v31, %v4028_v46 }
 0xa5d   :  { %4085 = vperm.xlu1 %5482, %v6741_v10   ;;  %v4031_v22 = vrot.slane %v4030_v54, 2 }
 0xa5f   :  { %v4032_v53 = vadd.f32 %v4031_v22, %v4030_v54  ;;  %v4046_v54 = vadd.f32 %v4045_v34, %v4044_v18  ;;  %v6787_v22 = vld [vmem:[%s7198_s2 + $0x30] sm:$0xff] }
 0xa61   :  { %4090 = vperm.xlu1 %5482, %v6736_v16   ;;  %v4033_v13 = vrot.slane %v4032_v53, 1  ;;  %v4047_v52 = vrot.slane %v4046_v54, 1 }
 0xa65   :  { %4100 = vperm.xlu1 %5482, %v6757_v44  }
 0xa69   :  { %3876 = vrot.lane.b32.xlu1 %v6398_v42, %s5731_s26  ;;  %3770 = vrot.lane.b32.xlu0 %v5846_v29, %s5729_s5  ;;  %v4034_v42 = vadd.f32 %v4033_v13, %v4032_v53  ;;  %v6775_v29 = vld [vmem:[%s7198_s2 + $0x28] sm:$0xff]  ;;  %v3579_v13 = vpop.permute.xlu1 %3578 }
 0xa6a   :  { %v4049_v46 = vsel %vm4013_vm4, %v6775_v29, 0.0 }
 0xa6b   :  { %v4050_v31 = vrot.slane %v4049_v46, 4 }
 0xa6d   :  { %4184 = vperm.xlu1 %5482, %v4070_v11   ;;  %4080 = vperm.xlu0 %5481, %v6721_v1   ;;  %v4051_v14 = vadd.f32 %v4050_v31, %v4049_v46  ;;  %v4048_v11 = vadd.f32 %v4047_v52, %v4046_v54  ;;  %v3627_v19 = vpop.permute.xlu1 %3626 }
 0xa6f   :  { %v4074_v26 = vadd.f32 1e-06, %v4048_v11 }
 0xa71   :  { %3878 = vrot.lane.b32.xlu1 %v6396_v38, %s5731_s26  ;;  %4095 = vperm.xlu0 %5481, %v6751_v62   ;;  %v4072_v38 = vadd.f32 1e-06, %v4034_v42 }
 0xa75   :  { %3908 = vrot.lane.b32.xlu1 %v6620_v8, %s5732_s3  ;;  %3874 = vrot.lane.b32.xlu0 %v6394_v50, %s5731_s26  ;;  %v4056_v8 = vsel %vm4013_vm4, %v6787_v22, 0.0  ;;  %v4052_v50 = vrot.slane %v4051_v14, 2 }
 0xa76   :  { %v4057_v5 = vrot.slane %v4056_v8, 4 }
 0xa77   :  { %v4053_v53 = vadd.f32 %v4052_v50, %v4051_v14  ;;  %v3632_v14 = vsel %vm798_vm3, %v3627_v19, 0 }
 0xa78   :  { %v4058_v12 = vadd.f32 %v4057_v5, %v4056_v8 }
 0xa79   :  { %4194 = vperm.xlu1 %5482, %v4072_v38   ;;  %4105 = vperm.xlu0 %5481, %v6775_v29   ;;  %v4054_v61 = vrot.slane %v4053_v53, 1 }
 0xa7a   :  { %v4059_v2 = vrot.slane %v4058_v12, 2 }
 0xa7b   :  { %v4055_v0 = vadd.f32 %v4054_v61, %v4053_v53 }
 0xa7d   :  { %3910 = vrot.lane.b32.xlu1 %v6618_v58, %s5732_s3  ;;  %4189 = vperm.xlu0 %5481, %v4071_v28   ;;  %v4060_v58 = vadd.f32 %v4059_v2, %v4058_v12 }
 0xa7f   :  { %v4061_v18 = vrot.slane %v4060_v58, 1 }
 0xa81   :  { %4199 = vperm.xlu1 %5482, %v4073_v36   ;;  %3906 = vrot.lane.b32.xlu0 %v6616_v3, %s5732_s3  ;;  %v6803_v3 = vld [vmem:[%s7198_s2 + $0x38] sm:$0xff]  ;;  %s5733_s2 = smov 24  }
 0xa85   :  { %3912 = vrot.lane.b32.xlu1 %v6624_v23, %s5732_s3  ;;  %4110 = vperm.xlu0 %5481, %v6787_v22   ;;  %v4075_v23 = vadd.f32 1e-06, %v4055_v0 }
 0xa89   :  { %4204 = vperm.xlu1 %5482, %v4074_v26   ;;  %3880 = vrot.lane.b32.xlu0 %v6402_v37, %s5731_s26  ;;  %v4062_v37 = vadd.f32 %v4061_v18, %v4060_v58 }
 0xa8b   :  { %v4076_v24 = vadd.f32 1e-06, %v4062_v37 }
 0xa8d   :  { %3914 = vrot.lane.b32.xlu1 %v6622_v33, %s5732_s3  ;;  %4115 = vperm.xlu0 %5481, %v6803_v3  }
 0xa91   :  { %4209 = vperm.xlu1 %5482, %v4075_v23   ;;  %3882 = vrot.lane.b32.xlu0 %v6400_v21, %s5731_s26 }
 0xa94   :  { %v3436_v42 = vpop.xlane.xlu1 %3435 }
 0xa95   :  { %5603 = vrcp.f32 %v3436_v42  ;;  %3916 = vrot.lane.b32.xlu1 %v6626_v63, %s5732_s3  ;;  %3884 = vrot.lane.b32.xlu0 %v6404_v60, %s5731_s26  ;;  %v3584_v60 = vsel %vm798_vm3, %v3579_v13, 0 }
 0xa99   :  { %4214 = vperm.xlu1 %5482, %v4076_v24   ;;  %3886 = vrot.lane.b32.xlu0 %v6406_v39, %s5731_s26 }
 0xa9c   :  { %v3442_v33 = vpop.xlane.xlu1 %3441 }
 0xa9d   :  { %5605 = vrcp.f32 %v3442_v33  ;;  %3918 = vrot.lane.b32.xlu1 %v6628_v55, %s5732_s3  ;;  %3888 = vrot.lane.b32.xlu0 %v6412_v45, %s5731_s26 }
 0xa9f   :  { %v5604_v21 = vpop.eup %5603  ;;  %v3439_v46 = vpop.xlane.xlu0 %3438 }
 0xaa0   :  { %v3459_v63 = vmul.f32 %v5604_v21, %v6683_v15  ;;  %5607 = vrcp.f32 %v3439_v46  ;;  %v3723_v28 = vpop.permute.xlu1 %3722 }
 0xaa1   :  { %v3728_v8 = vsel %vm798_vm3, %v3723_v28, 0 }
 0xaa2   :  { %v3474_v34 = vpack.c.bf16 %v3459_v63, %v3459_v63 }
 0xaa4   :  { %5407 = vmatmul.mubr.msk.bf16.vlgmr.msra.gmra.mrb[116].mxu0 %vm291_vm2, %v3474_v34 }
 0xaa5   :  { %5417 = vmatpush3.bf16.msra.mxu0 %v3584_v60  ;;  %5418 = vmatprep.mubr.msk.bf16.mxu0 %vm5719_vm1, %v5718_v6 }
 0xaa6   :  { %5428 = vmatprep.subr.bf16.mxu0 %v5718_v6 }
 0xaa7   :  { %v5606_v39 = vpop.eup %5605  ;;  %v3445_v55 = vpop.xlane.xlu0 %3444 }
 0xaa8   :  { %v3463_v45 = vmul.f32 %v5606_v39, %v6687_v35  ;;  %5609 = vrcp.f32 %v3445_v55 }
 0xaaa   :  { %v5608_v38 = vpop.eup %5607  ;;  %v3476_v31 = vpack.c.bf16 %v3463_v45, %v3463_v45 }
 0xaab   :  { %v3461_v15 = vmul.f32 %v5608_v38, %v6691_v20  ;;  %v3675_v59 = vpop.permute.xlu0 %3674 }
 0xaac   :  { %v3680_v4 = vsel %vm798_vm3, %v3675_v59, 0  ;;  %5419 = vmatmul.mubr.msk.bf16.vlgmr.msra.gmra.mrb[120].mxu0 %vm291_vm2, %v3476_v31 }
 0xaad   :  { %5429 = vmatpush3.bf16.msra.mxu0 %v3680_v4  ;;  %v3475_v54 = vpack.c.bf16 %v3461_v15, %v3461_v15  ;;  %5430 = vmatprep.mubr.msk.bf16.mxu0 %vm5719_vm1, %v5718_v6 }
 0xaae   :  { %5440 = vmatprep.subr.bf16.mxu0 %v5718_v6 }
 0xaaf   :  { %5413 = vmatmul.mubr.msk.bf16.vlgmr.msra.gmra.mrb[116].mxu1 %vm291_vm2, %v3475_v54 }
 0xab0   :  { %5423 = vmatpush3.bf16.msra.mxu1 %v3632_v14  ;;  %5424 = vmatprep.mubr.msk.bf16.mxu1 %vm5719_vm1, %v5718_v6 }
 0xab1   :  { %5434 = vmatprep.subr.bf16.mxu1 %v5718_v6 }
 0xab2   :  { %v5610_v35 = vpop.eup %5609 }
 0xab3   :  { %v3465_v20 = vmul.f32 %v5610_v35, %v6695_v32 }
 0xab5   :  { %v3477_v40 = vpack.c.bf16 %v3465_v20, %v3465_v20 }
 0xab7   :  { %5425 = vmatmul.mubr.msk.bf16.vlgmr.msra.gmra.mrb[120].mxu1 %vm291_vm2, %v3477_v40 }
 0xab8   :  { %5435 = vmatpush3.bf16.msra.mxu1 %v3728_v8  ;;  %5436 = vmatprep.mubr.msk.bf16.mxu1 %vm5719_vm1, %v5718_v6 }
 0xab9   :  { %5446 = vmatprep.subr.bf16.mxu1 %v5718_v6 }
 0xad1   :  { %v3448_v50 = vpop.xlane.xlu1 %3447 }
 0xad2   :  { %5611 = vrcp.f32 %v3448_v50 }
 0xad5   :  { %v3454_v36 = vpop.xlane.xlu1 %3453 }
 0xad6   :  { %5613 = vrcp.f32 %v3454_v36 }
 0xad9   :  { %v3819_v5 = vpop.permute.xlu1 %3818 }
 0xada   :  { %v3824_v24 = vsel %vm798_vm3, %v3819_v5, 0 }
 0xadc   :  { %v5612_v52 = vpop.eup %5611  ;;  %v3451_v53 = vpop.xlane.xlu0 %3450 }
 0xadd   :  { %v3467_v32 = vmul.f32 %v5612_v52, %v6708_v30  ;;  %5615 = vrcp.f32 %v3451_v53  ;;  %v6845_v12 = vpop.permute.xlu1 %4085 }
 0xadf   :  { %v3478_v11 = vpack.c.bf16 %v3467_v32, %v3467_v32 }
 0xae0   :  { %v5614_v2 = vpop.eup %5613  ;;  %v3457_v26 = vpop.xlane.xlu0 %3456 }
 0xae1   :  { %5617 = vrcp.f32 %v3457_v26  ;;  %v6847_v61 = vpop.permute.xlu1 %4090  ;;  %5431 = vmatmul.mubr.msk.bf16.vlgmr.msra.gmra.mrb[124].mxu0 %vm291_vm2, %v3478_v11  ;;  %v3471_v58 = vmul.f32 %v5614_v2, %v6712_v9 }
 0xae2   :  { %5442 = vmatprep.mubr.msk.bf16.mxu0 %vm5719_vm1, %v5718_v6 }
 0xae3   :  { %v3480_v18 = vpack.c.bf16 %v3471_v58, %v3471_v58 }
 0xae4   :  { %v3771_v0 = vpop.permute.xlu0 %3770 }
 0xae5   :  { %v3776_v13 = vsel %vm798_vm3, %v3771_v0, 0  ;;  %v6854_v30 = vpop.permute.xlu1 %4100 }
 0xae6   :  { %5441 = vmatpush3.bf16.msra.mxu0 %v3776_v13 }
 0xae7   :  { %v5616_v23 = vpop.eup %5615  ;;  %5452 = vmatprep.subr.bf16.mxu0 %v5718_v6 }
 0xae8   :  { %v3469_v19 = vmul.f32 %v5616_v23, %v6716_v49 }
 0xae9   :  { %v6858_v37 = vpop.permute.xlu1 %3876  ;;  %5443 = vmatmul.mubr.msk.bf16.vlgmr.msra.gmra.mrb[128].mxu0 %vm291_vm2, %v3480_v18 }
 0xaea   :  { %v3479_v42 = vpack.c.bf16 %v3469_v19, %v3469_v19  ;;  %5456 = vmatprep.mubr.msk.bf16.mxu0 %vm5719_vm1, %v5718_v6 }
 0xaeb   :  { %v5618_v9 = vpop.eup %5617 }
 0xaec   :  { %5437 = vmatmul.mubr.msk.bf16.vlgmr.msra.gmra.mrb[124].mxu1 %vm291_vm2, %v3479_v42  ;;  %v6865_v33 = vpop.permute.xlu0 %4080  ;;  %v3473_v49 = vmul.f32 %v5618_v9, %v6727_v57 }
 0xaed   :  { %5447 = vmatpush3.bf16.msra.mxu1 %v3824_v24  ;;  %v6867_v21 = vpop.permute.xlu1 %4184  ;;  %5448 = vmatprep.mubr.msk.bf16.mxu1 %vm5719_vm1, %v5718_v6 }
 0xaee   :  { %v3481_v34 = vpack.c.bf16 %v3473_v49, %v3473_v49  ;;  %5619 = vrcp.f32 %v6867_v21 }
 0xaf0   :  { %v6872_v46 = vpop.permute.xlu0 %4095 }
 0xaf1   :  { %v6874_v63 = vpop.permute.xlu1 %3878 }
 0xaf4   :  { %5449 = vmatmul.mubr.msk.bf16.vlgmr.msra.gmra.mrb[128].mxu1 %vm291_vm2, %v3481_v34  ;;  %v6877_v60 = vpop.permute.xlu0 %3874 }
 0xaf5   :  { %v6879_v39 = vpop.permute.xlu1 %3908 }
 0xaf8   :  { %v6881_v55 = vpop.permute.xlu0 %4105 }
 0xaf9   :  { %v6883_v45 = vpop.permute.xlu1 %4194 }
 0xafa   :  { %5621 = vrcp.f32 %v6883_v45 }
 0xafc   :  { %v6885_v38 = vpop.permute.xlu0 %4189 }
 0xafd   :  { %v6887_v31 = vpop.permute.xlu1 %3910  ;;  %5623 = vrcp.f32 %v6885_v38 }
 0xb00   :  { %v6889_v57 = vpop.permute.xlu0 %3906 }
 0xb01   :  { %v6891_v15 = vpop.permute.xlu1 %4199 }
 0xb02   :  { %5625 = vrcp.f32 %v6891_v15 }
 0xb04   :  { %v6893_v59 = vpop.permute.xlu0 %4110 }
 0xb05   :  { %v6895_v4 = vpop.permute.xlu1 %3912 }
 0xb08   :  { %v6897_v54 = vpop.permute.xlu0 %3880 }
 0xb09   :  { %v6899_v14 = vpop.permute.xlu1 %4204 }
 0xb0a   :  { %5627 = vrcp.f32 %v6899_v14 }
 0xb0c   :  { %v6901_v35 = vpop.permute.xlu0 %4115 }
 0xb0d   :  { %v3915_v20 = vpop.permute.xlu1 %3914 }
 0xb10   :  { %v3883_v28 = vpop.permute.xlu0 %3882 }
 0xb11   :  { %v3966_v40 = vsel %vm291_vm2, %v6194_v27, %v3883_v28  ;;  %v6905_v8 = vpop.permute.xlu1 %4209  ;;  %v4063_v27 = vsel %vm4013_vm4, %v6803_v3, 0.0 }
 0xb12   :  { %v6908_v50 = vsel %vm3970_vm5, %v3966_v40, %v3915_v20  ;;  %v4064_v2 = vrot.slane %v4063_v27, 4 }
 0xb14   :  { %v3885_v36 = vpop.permute.xlu0 %3884  ;;  %v4065_v26 = vadd.f32 %v4064_v2, %v4063_v27 }
 0xb15   :  { %v3967_v5 = vsel %vm291_vm2, %v6192_v43, %v3885_v36  ;;  %v3917_v52 = vpop.permute.xlu1 %3916 }
 0xb16   :  { %v6913_v53 = vsel %vm3970_vm5, %v3967_v5, %v3917_v52  ;;  %v4066_v58 = vrot.slane %v4065_v26, 2 }
 0xb18   :  { %v3887_v32 = vpop.permute.xlu0 %3886  ;;  %v4067_v0 = vadd.f32 %v4066_v58, %v4065_v26 }
 0xb19   :  { %v6917_v11 = vsel %vm291_vm2, %v6196_v48, %v3887_v32 }
 0xb1a   :  { %v4068_v19 = vrot.slane %v4067_v0, 1 }
 0xb1c   :  { %v4069_v42 = vadd.f32 %v4068_v19, %v4067_v0 }
 0xb1e   :  { %v4077_v28 = vadd.f32 1e-06, %v4069_v42 }
 0xb77   :  { %v3524_v13 = vpop.f32.mrb[116].mxu0 }
 0xb78   :  { %v5408_v23 = vpop.f32.mrb[117].mxu0  ;;  %3938 = vrot.lane.b32.xlu0 %v3524_v13, %s5733_s2 }
 0xb79   :  { %v3527_v43 = vpop.f32.mrb[118].mxu0 }
 0xb7a   :  { %v5409_v18 = vpop.f32.mrb[119].mxu0 }
 0xb7c   :  { %3920 = vrot.lane.b32.xlu0 %v6634_v51, %s5732_s3 }
 0xb7f   :  { %v3620_v48 = vpop.f32.mrb[120].mxu0 }
 0xb80   :  { %v5420_v9 = vpop.f32.mrb[121].mxu0  ;;  %3942 = vrot.lane.b32.xlu0 %v3620_v48, %s5733_s2 }
 0xb81   :  { %v3623_v24 = vpop.f32.mrb[122].mxu0 }
 0xb82   :  { %v3572_v49 = vpop.f32.mrb[116].mxu1  ;;  %v5421_v34 = vpop.f32.mrb[123].mxu0 }
 0xb83   :  { %3940 = vrot.lane.b32.xlu1 %v3572_v49, %s5733_s2  ;;  %v5414_v20 = vpop.f32.mrb[117].mxu1 }
 0xb84   :  { %v3575_v40 = vpop.f32.mrb[118].mxu1  ;;  %v3889_v20 = vpop.permute.xlu0 %3888 }
 0xb85   :  { %v5415_v36 = vpop.f32.mrb[119].mxu1 }
 0xb87   :  { %4219 = vperm.xlu1 %5482, %v4077_v28   ;;  %v3962_v28 = vsel %vm291_vm2, %v6184_v47, %v6877_v60 }
 0xb88   :  { %v3971_v40 = vsel %vm3970_vm5, %v3962_v28, %v6889_v57 }
 0xb8a   :  { %v3668_v5 = vpop.f32.mrb[120].mxu1 }
 0xb8b   :  { %3944 = vrot.lane.b32.xlu0 %v3668_v5, %s5733_s2  ;;  %v5426_v52 = vpop.f32.mrb[121].mxu1  ;;  %v6936_v5 = vpop.permute.xlu1 %4214 }
 0xb8c   :  { %v3671_v51 = vpop.f32.mrb[122].mxu1  ;;  %5629 = vrcp.f32 %v6936_v5 }
 0xb8d   :  { %v5427_v32 = vpop.f32.mrb[123].mxu1  ;;  %5631 = vrcp.f32 %v6905_v8 }
 0xbb4   :  { %v3716_v27 = vpop.f32.mrb[124].mxu0 }
 0xbb5   :  { %3946 = vrot.lane.b32.xlu0 %v3716_v27, %s5733_s2  ;;  %v5432_v2 = vpop.f32.mrb[125].mxu0  ;;  %v3969_v27 = vsel %vm291_vm2, %v6200_v7, %v3889_v20 }
 0xbb6   :  { %v3719_v26 = vpop.f32.mrb[126].mxu0 }
 0xbb7   :  { %v5433_v58 = vpop.f32.mrb[127].mxu0  ;;  %v3964_v26 = vsel %vm291_vm2, %v6188_v25, %v6874_v63 }
 0xbb8   :  { %v6956_v58 = vpop.permute.xlu1 %3918  ;;  %v3973_v7 = vsel %vm3970_vm5, %v3964_v26, %v6887_v31 }
 0xbbc   :  { %v3812_v0 = vpop.f32.mrb[128].mxu0 }
 0xbbd   :  { %3950 = vrot.lane.b32.xlu1 %v3812_v0, %s5733_s2  ;;  %v5444_v13 = vpop.f32.mrb[129].mxu0 }
 0xbbe   :  { %v3815_v23 = vpop.f32.mrb[130].mxu0 }
 0xbbf   :  { %v3764_v43 = vpop.f32.mrb[124].mxu1  ;;  %v5445_v18 = vpop.f32.mrb[131].mxu0 }
 0xbc0   :  { %3948 = vrot.lane.b32.xlu0 %v3764_v43, %s5733_s2  ;;  %v5438_v19 = vpop.f32.mrb[125].mxu1  ;;  %v3963_v43 = vsel %vm291_vm2, %v6186_v17, %v6858_v37 }
 0xbc1   :  { %v3767_v48 = vpop.f32.mrb[126].mxu1  ;;  %v3972_v63 = vsel %vm3970_vm5, %v3963_v43, %v6879_v39 }
 0xbc2   :  { %v5439_v42 = vpop.f32.mrb[127].mxu1 }
 0xbc7   :  { %v3860_v9 = vpop.f32.mrb[128].mxu1 }
 0xbc8   :  { %3952 = vrot.lane.b32.xlu0 %v3860_v9, %s5733_s2  ;;  %v5450_v24 = vpop.f32.mrb[129].mxu1 }
 0xbc9   :  { %v3863_v49 = vpop.f32.mrb[130].mxu1 }
 0xbca   :  { %v5451_v34 = vpop.f32.mrb[131].mxu1  ;;  %v5620_v49 = vpop.eup %5619 }
 0xbcb   :  { %v3965_v34 = vsel %vm291_vm2, %v6190_v41, %v6897_v54 }
 0xbea   :  { %v3939_v36 = vpop.permute.xlu0 %3938 }
 0xbeb   :  { %v6939_v52 = vsel %vm3979_vm6, %v3971_v40, %v3939_v36  ;;  %v3974_v36 = vsel %vm3970_vm5, %v3965_v34, %v6895_v4 }
 0xbec   :  { %v3988_v51 = vpack.c.bf16 %v6939_v52, %v6939_v52  ;;  %v4118_v32 = vmul.f32 %v6865_v33, %v6939_v52 }
 0xbee   :  { %3997 = vst.msk [vmem:[#allocation5] sm:$0xf] %vm3996_vm7, %v3988_v51  ;;  %v4126_v47 = vsel %vm98_vm0, %v4118_v32, 0.0  ;;  %v3921_v60 = vpop.permute.xlu0 %3920 }
 0xbef   :  { %v4127_v57 = vrot.slane %v4126_v47, 4  ;;  %v6950_v2 = vsel %vm3970_vm5, %v3969_v27, %v3921_v60 }
 0xbf1   :  { %v4128_v33 = vadd.f32 %v4127_v57, %v4126_v47 }
 0xbf2   :  { %v3943_v0 = vpop.permute.xlu0 %3942 }
 0xbf3   :  { %v4129_v13 = vrot.slane %v4128_v33, 2  ;;  %v6961_v23 = vsel %vm3979_vm6, %v3973_v7, %v3943_v0  ;;  %v5622_v0 = vpop.eup %5621 }
 0xbf4   :  { %v3990_v21 = vpack.c.bf16 %v6961_v23, %v6961_v23  ;;  %v4120_v25 = vmul.f32 %v6847_v61, %v6961_v23 }
 0xbf5   :  { %v3941_v18 = vpop.permute.xlu1 %3940  ;;  %v4130_v31 = vadd.f32 %v4129_v13, %v4128_v33 }
 0xbf6   :  { %3999 = vst.msk [vmem:[#allocation5 + $0x8] sm:$0xf] %vm3996_vm7, %v3990_v21  ;;  %v4140_v19 = vsel %vm98_vm0, %v4120_v25, 0.0  ;;  %v6975_v48 = vsel %vm3979_vm6, %v3972_v63, %v3941_v18  ;;  %v5624_v21 = vpop.eup %5623 }
 0xbf7   :  { %v4141_v42 = vrot.slane %v4140_v19, 4  ;;  %v3989_v17 = vpack.c.bf16 %v6975_v48, %v6975_v48  ;;  %v4119_v37 = vmul.f32 %v6845_v12, %v6975_v48  ;;  %v4131_v61 = vrot.slane %v4130_v31, 1 }
 0xbf9   :  { %v4142_v9 = vadd.f32 %v4141_v42, %v4140_v19  ;;  %3998 = vst.msk [vmem:[#allocation5 + $0x4] sm:$0xf] %vm3996_vm7, %v3989_v17  ;;  %v4133_v39 = vsel %vm98_vm0, %v4119_v37, 0.0  ;;  %v4132_v24 = vadd.f32 %v4131_v61, %v4130_v31  ;;  %v5626_v61 = vpop.eup %5625 }
 0xbfa   :  { %v4134_v20 = vrot.slane %v4133_v39, 4 }
 0xbfb   :  { %v4143_v28 = vrot.slane %v4142_v9, 2  ;;  %v4223_v40 = vmul.f32 %v5620_v49, %v4132_v24 }
 0xbfc   :  { %v4135_v12 = vadd.f32 %v4134_v20, %v4133_v39 }
 0xbfd   :  { %v3945_v51 = vpop.permute.xlu0 %3944  ;;  %v4238_v32 = vmul.f32 %v4223_v40, %v6939_v52  ;;  %v4144_v27 = vadd.f32 %v4143_v28, %v4142_v9 }
 0xbfe   :  { %v4136_v47 = vrot.slane %v4135_v12, 2  ;;  %v6992_v45 = vsel %vm3979_vm6, %v3974_v36, %v3945_v51 }
 0xbff   :  { %v3991_v41 = vpack.c.bf16 %v6992_v45, %v6992_v45  ;;  %v4121_v38 = vmul.f32 %v6872_v46, %v6992_v45  ;;  %v4246_v54 = vsel %vm98_vm0, %v4238_v32, 0.0  ;;  %v4145_v60 = vrot.slane %v4144_v27, 1 }
 0xc00   :  { %4247 = vadd.xlane.f32.xlu1 %v4246_v54  ;;  %v4137_v57 = vadd.f32 %v4136_v47, %v4135_v12 }
 0xc01   :  { %4000 = vst.msk [vmem:[#allocation5 + $0xc] sm:$0xf] %vm3996_vm7, %v3991_v41  ;;  %v4147_v4 = vsel %vm98_vm0, %v4121_v38, 0.0  ;;  %v4146_v7 = vadd.f32 %v4145_v60, %v4144_v27 }
 0xc02   :  { %v4148_v26 = vrot.slane %v4147_v4, 4  ;;  %v4138_v33 = vrot.slane %v4137_v57, 1 }
 0xc03   :  { %v4227_v63 = vmul.f32 %v5622_v0, %v4146_v7  ;;  %v5628_v7 = vpop.eup %5627 }
 0xc04   :  { %v4149_v13 = vadd.f32 %v4148_v26, %v4147_v4  ;;  %v4139_v43 = vadd.f32 %v4138_v33, %v4137_v57 }
 0xc05   :  { %v4240_v42 = vmul.f32 %v4227_v63, %v6961_v23 }
 0xc06   :  { %v4150_v25 = vrot.slane %v4149_v13, 2  ;;  %v4225_v46 = vmul.f32 %v5624_v21, %v4139_v43  ;;  %v4220_v40 = vpop.permute.xlu1 %4219 }
 0xc07   :  { %v4252_v15 = vsel %vm98_vm0, %v4240_v42, 0.0  ;;  %5633 = vrcp.f32 %v4220_v40 }
 0xc08   :  { %v4239_v18 = vmul.f32 %v4225_v46, %v6975_v48  ;;  %v4151_v31 = vadd.f32 %v4150_v25, %v4149_v13 }
 0xc0a   :  { %v4249_v19 = vsel %vm98_vm0, %v4239_v18, 0.0  ;;  %v4152_v17 = vrot.slane %v4151_v31, 1 }
 0xc0b   :  { %4250 = vadd.xlane.f32.xlu0 %v4249_v19 }
 0xc0c   :  { %v4153_v37 = vadd.f32 %v4152_v17, %v4151_v31 }
 0xc0e   :  { %v4229_v9 = vmul.f32 %v5626_v61, %v4153_v37  ;;  %v5630_v37 = vpop.eup %5629 }
 0xc0f   :  { %4253 = vadd.xlane.f32.xlu0 %v4252_v15 }
 0xc10   :  { %v4241_v39 = vmul.f32 %v4229_v9, %v6992_v45 }
 0xc12   :  { %v4255_v24 = vsel %vm98_vm0, %v4241_v39, 0.0 }
 0xc13   :  { %4256 = vadd.xlane.f32.xlu1 %v4255_v24  ;;  %v5632_v24 = vpop.eup %5631 }
 0xc14   :  { %v5634_v40 = vpop.eup %5633 }
 0xc27   :  { %v3947_v49 = vpop.permute.xlu0 %3946 }
 0xc28   :  { %v7010_v34 = vsel %vm3979_vm6, %v6908_v50, %v3947_v49  ;;  %v3977_v50 = vsel %vm3970_vm5, %v6917_v11, %v6956_v58 }
 0xc29   :  { %v3992_v20 = vpack.c.bf16 %v7010_v34, %v7010_v34  ;;  %v4122_v28 = vmul.f32 %v6854_v30, %v7010_v34 }
 0xc2b   :  { %4001 = vst.msk [vmem:[#allocation5 + $0x10] sm:$0xf] %vm3996_vm7, %v3992_v20  ;;  %v4154_v12 = vsel %vm98_vm0, %v4122_v28, 0.0 }
 0xc2c   :  { %v4155_v36 = vrot.slane %v4154_v12, 4 }
 0xc2e   :  { %v4156_v51 = vadd.f32 %v4155_v36, %v4154_v12 }
 0xc2f   :  { %v3951_v32 = vpop.permute.xlu1 %3950 }
 0xc30   :  { %v4157_v27 = vrot.slane %v4156_v51, 2  ;;  %v7023_v47 = vsel %vm3979_vm6, %v3977_v50, %v3951_v32 }
 0xc31   :  { %v3994_v30 = vpack.c.bf16 %v7023_v47, %v7023_v47  ;;  %v4124_v41 = vmul.f32 %v6893_v59, %v7023_v47 }
 0xc32   :  { %v3949_v38 = vpop.permute.xlu0 %3948  ;;  %v4158_v54 = vadd.f32 %v4157_v27, %v4156_v51 }
 0xc33   :  { %4003 = vst.msk [vmem:[#allocation5 + $0x18] sm:$0xf] %vm3996_vm7, %v3994_v30  ;;  %v4168_v14 = vsel %vm98_vm0, %v4124_v41, 0.0  ;;  %v7033_v11 = vsel %vm3979_vm6, %v6913_v53, %v3949_v38 }
 0xc34   :  { %v4169_v58 = vrot.slane %v4168_v14, 4  ;;  %v3993_v60 = vpack.c.bf16 %v7033_v11, %v7033_v11  ;;  %v4123_v57 = vmul.f32 %v6881_v55, %v7033_v11  ;;  %v4159_v4 = vrot.slane %v4158_v54, 1 }
 0xc36   :  { %v4170_v59 = vadd.f32 %v4169_v58, %v4168_v14  ;;  %4002 = vst.msk [vmem:[#allocation5 + $0x14] sm:$0xf] %vm3996_vm7, %v3993_v60  ;;  %v4161_v26 = vsel %vm98_vm0, %v4123_v57, 0.0  ;;  %v4160_v33 = vadd.f32 %v4159_v4, %v4158_v54 }
 0xc37   :  { %v4162_v0 = vrot.slane %v4161_v26, 4 }
 0xc38   :  { %v4171_v53 = vrot.slane %v4170_v59, 2  ;;  %v4231_v13 = vmul.f32 %v5628_v7, %v4160_v33 }
 0xc39   :  { %v4163_v43 = vadd.f32 %v4162_v0, %v4161_v26 }
 0xc3a   :  { %v3953_v21 = vpop.permute.xlu0 %3952  ;;  %v4242_v25 = vmul.f32 %v4231_v13, %v7010_v34  ;;  %v4172_v55 = vadd.f32 %v4171_v53, %v4170_v59 }
 0xc3b   :  { %v4164_v46 = vrot.slane %v4163_v43, 2  ;;  %v7046_v5 = vsel %vm3979_vm6, %v6950_v2, %v3953_v21 }
 0xc3c   :  { %v3995_v63 = vpack.c.bf16 %v7046_v5, %v7046_v5  ;;  %v4125_v18 = vmul.f32 %v6901_v35, %v7046_v5  ;;  %v4258_v8 = vsel %vm98_vm0, %v4242_v25, 0.0  ;;  %v4173_v31 = vrot.slane %v4172_v55, 1 }
 0xc3d   :  { %4259 = vadd.xlane.f32.xlu0 %v4258_v8  ;;  %v4165_v19 = vadd.f32 %v4164_v46, %v4163_v43 }
 0xc3e   :  { %4004 = vst.msk [vmem:[#allocation5 + $0x1c] sm:$0xf] %vm3996_vm7, %v3995_v63  ;;  %v4175_v42 = vsel %vm98_vm0, %v4125_v18, 0.0  ;;  %v4174_v17 = vadd.f32 %v4173_v31, %v4172_v55 }
 0xc3f   :  { %v4176_v61 = vrot.slane %v4175_v42, 4  ;;  %v4166_v2 = vrot.slane %v4165_v19, 1 }
 0xc40   :  { %v4235_v15 = vmul.f32 %v5630_v37, %v4174_v17 }
 0xc41   :  { %v4177_v9 = vadd.f32 %v4176_v61, %v4175_v42  ;;  %v4167_v39 = vadd.f32 %v4166_v2, %v4165_v19 }
 0xc42   :  { %v4244_v35 = vmul.f32 %v4235_v15, %v7023_v47 }
 0xc43   :  { %v4178_v49 = vrot.slane %v4177_v9, 2  ;;  %v4233_v20 = vmul.f32 %v5632_v24, %v4167_v39 }
 0xc44   :  { %v4264_v28 = vsel %vm98_vm0, %v4244_v35, 0.0 }
 0xc45   :  { %4265 = vadd.xlane.f32.xlu0 %v4264_v28  ;;  %v4243_v12 = vmul.f32 %v4233_v20, %v7033_v11  ;;  %v4179_v36 = vadd.f32 %v4178_v49, %v4177_v9 }
 0xc47   :  { %v4261_v51 = vsel %vm98_vm0, %v4243_v12, 0.0  ;;  %v4180_v50 = vrot.slane %v4179_v36, 1 }
 0xc48   :  { %4262 = vadd.xlane.f32.xlu1 %v4261_v51 }
 0xc49   :  { %v4181_v32 = vadd.f32 %v4180_v50, %v4179_v36 }
 0xc4b   :  { %v4237_v27 = vmul.f32 %v5634_v40, %v4181_v32 }
 0xc4d   :  { %v4245_v30 = vmul.f32 %v4237_v27, %v7046_v5 }
 0xc4f   :  { %v4267_v41 = vsel %vm98_vm0, %v4245_v30, 0.0 }
 0xc50   :  { %4268 = vadd.xlane.f32.xlu1 %v4267_v41 }
 0xc8d   :  { %v4248_v38 = vpop.xlane.xlu1 %4247 }
 0xc8e   :  { %v4270_v54 = vmul.f32 0.17677669, %v4248_v38 }
 0xc90   :  { %v4278_v14 = vadd.f32 %v4270_v54, %v6721_v1 }
 0xc92   :  { %v4286_v58 = vsel %vm4013_vm4, %v4278_v14, -inf }
 0xc93   :  { %v4287_v60 = vrot.slane %v4286_v58, 4 }
 0xc95   :  { %v4288_v57 = vmax.f32 %v4286_v58, %v4287_v60 }
 0xc97   :  { %v4289_v4 = vrot.slane %v4288_v57, 2 }
 0xc98   :  { %v4251_v59 = vpop.xlane.xlu0 %4250 }
 0xc99   :  { %v4290_v26 = vmax.f32 %v4288_v57, %v4289_v4  ;;  %v4271_v33 = vmul.f32 0.17677669, %v4251_v59 }
 0xc9b   :  { %v4291_v7 = vrot.slane %v4290_v26, 1  ;;  %v4279_v0 = vadd.f32 %v4271_v33, %v6741_v10 }
 0xc9c   :  { %v4254_v53 = vpop.xlane.xlu0 %4253 }
 0xc9d   :  { %v4292_v13 = vmax.f32 %v4290_v26, %v4291_v7  ;;  %v4293_v43 = vsel %vm4013_vm4, %v4279_v0, -inf  ;;  %v4272_v21 = vmul.f32 0.17677669, %v4254_v53 }
 0xc9e   :  { %v4294_v25 = vrot.slane %v4293_v43, 4 }
 0xc9f   :  { %v4342_v55 = vsub.f32 %v4278_v14, %v4292_v13  ;;  %v4280_v1 = vadd.f32 %v4272_v21, %v6736_v16 }
 0xca0   :  { %v4295_v46 = vmax.f32 %v4293_v43, %v4294_v25  ;;  %v4257_v63 = vpop.xlane.xlu1 %4256 }
 0xca1   :  { %v4350_v18 = vmul.f32 1.442695, %v4342_v55  ;;  %v4300_v8 = vsel %vm4013_vm4, %v4280_v1, -inf  ;;  %v4273_v31 = vmul.f32 0.17677669, %v4257_v63 }
 0xca2   :  { %v4296_v19 = vrot.slane %v4295_v46, 2  ;;  %v4301_v42 = vrot.slane %v4300_v8, 4 }
 0xca3   :  { %5635 = vpow2.f32 %v4350_v18  ;;  %v4281_v10 = vadd.f32 %v4273_v31, %v6751_v62 }
 0xca4   :  { %v4297_v17 = vmax.f32 %v4295_v46, %v4296_v19  ;;  %v4302_v37 = vmax.f32 %v4300_v8, %v4301_v42 }
 0xca5   :  { %v4307_v61 = vsel %vm4013_vm4, %v4281_v10, -inf }
 0xca6   :  { %v4298_v2 = vrot.slane %v4297_v17, 1  ;;  %v4303_v15 = vrot.slane %v4302_v37, 2  ;;  %v4308_v9 = vrot.slane %v4307_v61, 4 }
 0xca8   :  { %v4299_v39 = vmax.f32 %v4297_v17, %v4298_v2  ;;  %v4304_v16 = vmax.f32 %v4302_v37, %v4303_v15  ;;  %v4309_v24 = vmax.f32 %v4307_v61, %v4308_v9 }
 0xcaa   :  { %v4343_v35 = vsub.f32 %v4279_v0, %v4299_v39  ;;  %v4305_v49 = vrot.slane %v4304_v16, 1  ;;  %v4310_v20 = vrot.slane %v4309_v24, 2 }
 0xcac   :  { %v4352_v28 = vmul.f32 1.442695, %v4343_v35  ;;  %v4306_v12 = vmax.f32 %v4304_v16, %v4305_v49  ;;  %v4311_v36 = vmax.f32 %v4309_v24, %v4310_v20 }
 0xcad   :  { %v5636_v51 = vpop.eup %5635 }
 0xcae   :  { %v4366_v50 = vsel %vm4013_vm4, %v5636_v51, 0.0  ;;  %5637 = vpow2.f32 %v4352_v28  ;;  %v4344_v62 = vsub.f32 %v4280_v1, %v4306_v12  ;;  %v4312_v32 = vrot.slane %v4311_v36, 1 }
 0xcaf   :  { %v4367_v40 = vrot.slane %v4366_v50, 4 }
 0xcb0   :  { %v4354_v27 = vmul.f32 1.442695, %v4344_v62  ;;  %v4313_v30 = vmax.f32 %v4311_v36, %v4312_v32 }
 0xcb1   :  { %v4368_v41 = vadd.f32 %v4367_v40, %v4366_v50 }
 0xcb2   :  { %5639 = vpow2.f32 %v4354_v27  ;;  %v4345_v38 = vsub.f32 %v4281_v10, %v4313_v30 }
 0xcb3   :  { %v4369_v54 = vrot.slane %v4368_v41, 2 }
 0xcb4   :  { %v4356_v14 = vmul.f32 1.442695, %v4345_v38 }
 0xcb5   :  { %v4370_v58 = vadd.f32 %v4369_v54, %v4368_v41 }
 0xcb6   :  { %5641 = vpow2.f32 %v4356_v14 }
 0xcb7   :  { %v4371_v60 = vrot.slane %v4370_v58, 1 }
 0xcb8   :  { %v5638_v57 = vpop.eup %5637 }
 0xcb9   :  { %v4373_v4 = vsel %vm4013_vm4, %v5638_v57, 0.0  ;;  %v4372_v59 = vadd.f32 %v4371_v60, %v4370_v58 }
 0xcba   :  { %v4374_v26 = vrot.slane %v4373_v4, 4 }
 0xcbb   :  { %5643 = vrcp.f32 %v4372_v59 }
 0xcbc   :  { %v5640_v33 = vpop.eup %5639  ;;  %v4375_v7 = vadd.f32 %v4374_v26, %v4373_v4 }
 0xcbd   :  { %v4380_v0 = vsel %vm4013_vm4, %v5640_v33, 0.0 }
 0xcbe   :  { %v4376_v53 = vrot.slane %v4375_v7, 2  ;;  %v4381_v13 = vrot.slane %v4380_v0, 4 }
 0xcc0   :  { %v5642_v43 = vpop.eup %5641  ;;  %v4377_v21 = vadd.f32 %v4376_v53, %v4375_v7  ;;  %v4382_v25 = vadd.f32 %v4381_v13, %v4380_v0 }
 0xcc1   :  { %v4387_v55 = vsel %vm4013_vm4, %v5642_v43, 0.0 }
 0xcc2   :  { %v4383_v1 = vrot.slane %v4382_v25, 2  ;;  %v4388_v46 = vrot.slane %v4387_v55, 4  ;;  %v4378_v63 = vrot.slane %v4377_v21, 1 }
 0xcc4   :  { %v4384_v18 = vadd.f32 %v4383_v1, %v4382_v25  ;;  %v4389_v8 = vadd.f32 %v4388_v46, %v4387_v55  ;;  %v4379_v31 = vadd.f32 %v4378_v63, %v4377_v21 }
 0xcc5   :  { %v5644_v19 = vpop.eup %5643 }
 0xcc6   :  { %v4390_v42 = vrot.slane %v4389_v8, 2  ;;  %v4423_v10 = vmul.f32 %v5644_v19, %v5636_v51  ;;  %5645 = vrcp.f32 %v4379_v31  ;;  %v4385_v17 = vrot.slane %v4384_v18, 1 }
 0xcc8   :  { %v4391_v37 = vadd.f32 %v4390_v42, %v4389_v8  ;;  %4440 = vperm.xlu0 %5481, %v4423_v10   ;;  %v4386_v61 = vadd.f32 %v4385_v17, %v4384_v18 }
 0xcca   :  { %v4260_v2 = vpop.xlane.xlu0 %4259  ;;  %5647 = vrcp.f32 %v4386_v61  ;;  %v4392_v15 = vrot.slane %v4391_v37, 1 }
 0xccb   :  { %v4274_v9 = vmul.f32 0.17677669, %v4260_v2 }
 0xccc   :  { %v4393_v39 = vadd.f32 %v4392_v15, %v4391_v37 }
 0xccd   :  { %v4282_v16 = vadd.f32 %v4274_v9, %v6757_v44 }
 0xcce   :  { %5649 = vrcp.f32 %v4393_v39 }
 0xccf   :  { %v4314_v24 = vsel %vm4013_vm4, %v4282_v16, -inf }
 0xcd0   :  { %v5646_v35 = vpop.eup %5645  ;;  %v4315_v49 = vrot.slane %v4314_v24, 4 }
 0xcd1   :  { %v4425_v20 = vmul.f32 %v5646_v35, %v5638_v57 }
 0xcd2   :  { %v4316_v28 = vmax.f32 %v4314_v24, %v4315_v49  ;;  %v4266_v12 = vpop.xlane.xlu0 %4265 }
 0xcd3   :  { %v4276_v36 = vmul.f32 0.17677669, %v4266_v12  ;;  %4445 = vperm.xlu1 %5482, %v4425_v20  }
 0xcd4   :  { %v5648_v51 = vpop.eup %5647  ;;  %v4317_v50 = vrot.slane %v4316_v28, 2 }
 0xcd5   :  { %v4284_v62 = vadd.f32 %v4276_v36, %v6787_v22  ;;  %v4263_v32 = vpop.xlane.xlu1 %4262  ;;  %v4427_v40 = vmul.f32 %v5648_v51, %v5640_v33 }
 0xcd6   :  { %v4318_v27 = vmax.f32 %v4316_v28, %v4317_v50  ;;  %v4275_v30 = vmul.f32 0.17677669, %v4263_v32 }
 0xcd7   :  { %v4328_v44 = vsel %vm4013_vm4, %v4284_v62, -inf  ;;  %4450 = vperm.xlu1 %5482, %v4427_v40  }
 0xcd8   :  { %v5650_v41 = vpop.eup %5649  ;;  %v4319_v38 = vrot.slane %v4318_v27, 1  ;;  %v4329_v54 = vrot.slane %v4328_v44, 4  ;;  %v4283_v14 = vadd.f32 %v4275_v30, %v6775_v29 }
 0xcd9   :  { %v4429_v58 = vmul.f32 %v5650_v41, %v5642_v43 }
 0xcda   :  { %v4320_v60 = vmax.f32 %v4318_v27, %v4319_v38  ;;  %v4330_v57 = vmax.f32 %v4328_v44, %v4329_v54  ;;  %v4321_v4 = vsel %vm4013_vm4, %v4283_v14, -inf }
 0xcdb   :  { %v4322_v59 = vrot.slane %v4321_v4, 4  ;;  %4455 = vperm.xlu0 %5481, %v4429_v58  }
 0xcdc   :  { %v4346_v22 = vsub.f32 %v4282_v16, %v4320_v60  ;;  %v4331_v26 = vrot.slane %v4330_v57, 2 }
 0xcdd   :  { %v4323_v33 = vmax.f32 %v4321_v4, %v4322_v59  ;;  %v4269_v7 = vpop.xlane.xlu1 %4268 }
 0xcde   :  { %v4358_v0 = vmul.f32 1.442695, %v4346_v22  ;;  %v4332_v53 = vmax.f32 %v4330_v57, %v4331_v26  ;;  %v4277_v13 = vmul.f32 0.17677669, %v4269_v7 }
 0xcdf   :  { %v4324_v21 = vrot.slane %v4323_v33, 2 }
 0xce0   :  { %5651 = vpow2.f32 %v4358_v0  ;;  %v4333_v25 = vrot.slane %v4332_v53, 1  ;;  %v4285_v55 = vadd.f32 %v4277_v13, %v6803_v3 }
 0xce1   :  { %v4325_v29 = vmax.f32 %v4323_v33, %v4324_v21 }
 0xce2   :  { %v4334_v43 = vmax.f32 %v4332_v53, %v4333_v25  ;;  %v4335_v1 = vsel %vm4013_vm4, %v4285_v55, -inf }
 0xce3   :  { %v4326_v46 = vrot.slane %v4325_v29, 1  ;;  %v4336_v63 = vrot.slane %v4335_v1, 4 }
 0xce4   :  { %v4348_v18 = vsub.f32 %v4284_v62, %v4334_v43 }
 0xce5   :  { %v4327_v8 = vmax.f32 %v4325_v29, %v4326_v46  ;;  %v4337_v31 = vmax.f32 %v4335_v1, %v4336_v63  ;;  %v5489_v46 = vld [vmem:[%s7202_s6] sm:$0xff]   ;;  %v5490_v63 = vld [vmem:[%s7202_s6 + $0x8] sm:$0xff]   ;;  %s5734_s6 = smov [#allocation5]  }
 0xce6   :  { %v4362_v19 = vmul.f32 1.442695, %v4348_v18  ;;  %5453 = vmatpush3.bf16.msra.mxu0 %v5489_v46  ;;  %s4745_s0 = sshll.u32 %s5734_s6, 4  ;;  %s4746_s0 = int_to_ptr.vmem [resolvable:$true] %s4745_s0 }
 0xce7   :  { %v4347_v42 = vsub.f32 %v4283_v14, %v4327_v8  ;;  %v4338_v10 = vrot.slane %v4337_v31, 2  ;;  %5454 = vmatprep.subr.bf16.mxu0 %v5718_v6  ;;  %s5689_s5 = scalar_lea.vmem %s4746_s0, 512  ;;  %p5694_p9 = scmp.lt.s32.totalorder %s4746_s0, %s4746_s0 }
 0xce8   :  { %5653 = vpow2.f32 %v4362_v19  ;;  %p5690_p8 = scmp.ne.s32.totalorder %s4746_s0, %s5689_s5  ;;  %p5695_p10 = scmp.lt.s32.totalorder %s5689_s5, %s5689_s5 }
 0xce9   :  { %v4360_v17 = vmul.f32 1.442695, %v4347_v42  ;;  %v4339_v37 = vmax.f32 %v4337_v31, %v4338_v10 }
 0xcea   :  { %v5652_v61 = vpop.eup %5651  ;;  %5455 = vmatpush3.bf16.msra.mxu0 %v5490_v63  ;;  %p5696_p11 = por %p5695_p10, %p5694_p9 }
 0xceb   :  { %v4394_v2 = vsel %vm4013_vm4, %v5652_v61, 0.0  ;;  %5655 = vpow2.f32 %v4360_v17  ;;  %v4340_v3 = vrot.slane %v4339_v37, 1 }
 0xcec   :  { %v4395_v15 = vrot.slane %v4394_v2, 4  ;;  %p5697_p12 = pnand %p5696_p11, %p5690_p8 }
 0xced   :  { %v4341_v9 = vmax.f32 %v4339_v37, %v4340_v3 }
 0xcee   :  { %v4396_v39 = vadd.f32 %v4395_v15, %v4394_v2 }
 0xcef   :  { %v4349_v16 = vsub.f32 %v4285_v55, %v4341_v9 }
 0xcf0   :  { %v4397_v24 = vrot.slane %v4396_v39, 2 }
 0xcf1   :  { %v4364_v35 = vmul.f32 1.442695, %v4349_v16 }
 0xcf2   :  { %v5654_v49 = vpop.eup %5653  ;;  %v4398_v20 = vadd.f32 %v4397_v24, %v4396_v39 }
 0xcf3   :  { %v4408_v28 = vsel %vm4013_vm4, %v5654_v49, 0.0  ;;  %5657 = vpow2.f32 %v4364_v35 }
 0xcf4   :  { %v4409_v12 = vrot.slane %v4408_v28, 4  ;;  %v4399_v36 = vrot.slane %v4398_v20, 1 }
 0xcf5   :  { %v5656_v51 = vpop.eup %5655 }
 0xcf6   :  { %v4410_v50 = vadd.f32 %v4409_v12, %v4408_v28  ;;  %v4401_v62 = vsel %vm4013_vm4, %v5656_v51, 0.0  ;;  %v4400_v32 = vadd.f32 %v4399_v36, %v4398_v20 }
 0xcf7   :  { %v4402_v40 = vrot.slane %v4401_v62, 4 }
 0xcf8   :  { %v4411_v27 = vrot.slane %v4410_v50, 2  ;;  %5659 = vrcp.f32 %v4400_v32 }
 0xcf9   :  { %v4403_v30 = vadd.f32 %v4402_v40, %v4401_v62 }
 0xcfa   :  { %v4412_v44 = vadd.f32 %v4411_v27, %v4410_v50 }
 0xcfb   :  { %v4404_v41 = vrot.slane %v4403_v30, 2 }
 0xcfc   :  { %v4413_v38 = vrot.slane %v4412_v44, 1 }
 0xcfd   :  { %v5658_v54 = vpop.eup %5657  ;;  %v4405_v14 = vadd.f32 %v4404_v41, %v4403_v30 }
 0xcfe   :  { %v4415_v58 = vsel %vm4013_vm4, %v5658_v54, 0.0  ;;  %v4414_v60 = vadd.f32 %v4413_v38, %v4412_v44 }
 0xcff   :  { %v4416_v57 = vrot.slane %v4415_v58, 4  ;;  %v4406_v4 = vrot.slane %v4405_v14, 1 }
 0xd00   :  { %5661 = vrcp.f32 %v4414_v60 }
 0xd01   :  { %v4417_v59 = vadd.f32 %v4416_v57, %v4415_v58  ;;  %v4407_v22 = vadd.f32 %v4406_v4, %v4405_v14 }
 0xd02   :  { %v5660_v26 = vpop.eup %5659 }
 0xd03   :  { %v4418_v33 = vrot.slane %v4417_v59, 2  ;;  %v4431_v7 = vmul.f32 %v5660_v26, %v5652_v61  ;;  %5663 = vrcp.f32 %v4407_v22 }
 0xd05   :  { %v4419_v0 = vadd.f32 %v4418_v33, %v4417_v59  ;;  %4460 = vperm.xlu1 %5482, %v4431_v7  }
 0xd07   :  { %v4420_v53 = vrot.slane %v4419_v0, 1 }
 0xd09   :  { %v4421_v13 = vadd.f32 %v4420_v53, %v4419_v0 }
 0xd0a   :  { %v5662_v21 = vpop.eup %5661 }
 0xd0b   :  { %v4435_v25 = vmul.f32 %v5662_v21, %v5654_v49  ;;  %5665 = vrcp.f32 %v4421_v13 }
 0xd0d   :  { %v5664_v55 = vpop.eup %5663  ;;  %4470 = vperm.xlu1 %5482, %v4435_v25  }
 0xd0e   :  { %v4433_v29 = vmul.f32 %v5664_v55, %v5656_v51 }
 0xd10   :  { %4465 = vperm.xlu0 %5481, %v4433_v29  }
 0xd15   :  { %v5666_v43 = vpop.eup %5665 }
 0xd16   :  { %v4437_v1 = vmul.f32 %v5666_v43, %v5658_v54 }
 0xd18   :  { %4475 = vperm.xlu0 %5481, %v4437_v1  }
 0xd47   :  { %v4441_v8 = vpop.permute.xlu0 %4440 }
 0xd48   :  { %v4478_v17 = vmul.f32 %v4441_v8, %v6939_v52 }
 0xd4a   :  { %v4486_v3 = vsel %vm98_vm0, %v4478_v17, 0.0 }
 0xd4b   :  { %v4487_v16 = vrot.slane %v4486_v3, 4 }
 0xd4d   :  { %v4488_v49 = vadd.f32 %v4487_v16, %v4486_v3 }
 0xd4f   :  { %v4489_v50 = vrot.slane %v4488_v49, 2 }
 0xd51   :  { %v4490_v54 = vadd.f32 %v4489_v50, %v4488_v49 }
 0xd52   :  { %v4446_v18 = vpop.permute.xlu1 %4445 }
 0xd53   :  { %v4479_v42 = vmul.f32 %v4446_v18, %v6975_v48 }
 0xd55   :  { %v4493_v61 = vsel %vm98_vm0, %v4479_v42, 0.0 }
 0xd56   :  { %v4451_v31 = vpop.permute.xlu1 %4450  ;;  %v4494_v15 = vrot.slane %v4493_v61, 4 }
 0xd57   :  { %v4480_v10 = vmul.f32 %v4451_v31, %v6961_v23 }
 0xd58   :  { %v4495_v23 = vadd.f32 %v4494_v15, %v4493_v61 }
 0xd59   :  { %v4500_v2 = vsel %vm98_vm0, %v4480_v10, 0.0 }
 0xd5a   :  { %v4456_v19 = vpop.permute.xlu0 %4455  ;;  %v4501_v9 = vrot.slane %v4500_v2, 4  ;;  %v4496_v12 = vrot.slane %v4495_v23, 2 }
 0xd5b   :  { %v4481_v37 = vmul.f32 %v4456_v19, %v6992_v45 }
 0xd5c   :  { %v4502_v35 = vadd.f32 %v4501_v9, %v4500_v2  ;;  %v4497_v27 = vadd.f32 %v4496_v12, %v4495_v23 }
 0xd5d   :  { %v4507_v6 = vsel %vm98_vm0, %v4481_v37, 0.0 }
 0xd5e   :  { %v4508_v24 = vrot.slane %v4507_v6, 4  ;;  %v4503_v36 = vrot.slane %v4502_v35, 2  ;;  %v4498_v4 = vrot.slane %v4497_v27, 1 }
 0xd60   :  { %v4509_v20 = vadd.f32 %v4508_v24, %v4507_v6  ;;  %v4504_v44 = vadd.f32 %v4503_v36, %v4502_v35  ;;  %v4499_v53 = vadd.f32 %v4498_v4, %v4497_v27 }
 0xd62   :  { %v4510_v62 = vrot.slane %v4509_v20, 2  ;;  %v4505_v22 = vrot.slane %v4504_v44, 1  ;;  %v4543_v18 = vpack.c.bf16 %v4499_v53, %v4499_v53 }
 0xd64   :  { %v4511_v14 = vadd.f32 %v4510_v62, %v4509_v20  ;;  %v4506_v25 = vadd.f32 %v4505_v22, %v4504_v44  ;;  %v4570_v3 = vunpack.c.l.b16 %v4543_v18 }
 0xd66   :  { %v4512_v33 = vrot.slane %v4511_v14, 1  ;;  %v4544_v19 = vpack.c.bf16 %v4506_v25, %v4506_v25 }
 0xd68   :  { %v4513_v43 = vadd.f32 %v4512_v33, %v4511_v14 }
 0xd6a   :  { %v4545_v17 = vpack.c.bf16 %v4513_v43, %v4513_v43 }
 0xd6c   :  { %v4572_v16 = vunpack.c.l.b16 %v4545_v17 }
 0xd84   :  { %v4461_v39 = vpop.permute.xlu1 %4460 }
 0xd85   :  { %v4482_v48 = vmul.f32 %v4461_v39, %v7010_v34 }
 0xd87   :  { %v4514_v52 = vsel %vm98_vm0, %v4482_v48, 0.0 }
 0xd88   :  { %v4515_v45 = vrot.slane %v4514_v52, 4 }
 0xd8a   :  { %v4516_v28 = vadd.f32 %v4515_v45, %v4514_v52 }
 0xd8c   :  { %v4471_v51 = vpop.permute.xlu1 %4470  ;;  %v4517_v40 = vrot.slane %v4516_v28, 2 }
 0xd8d   :  { %v4484_v32 = vmul.f32 %v4471_v51, %v7023_v47  ;;  %v4491_v47 = vrot.slane %v4490_v54, 1 }
 0xd8e   :  { %v4518_v58 = vadd.f32 %v4517_v40, %v4516_v28 }
 0xd8f   :  { %v4528_v30 = vsel %vm98_vm0, %v4484_v32, 0.0  ;;  %v4466_v34 = vpop.permute.xlu0 %4465  ;;  %v4492_v29 = vadd.f32 %v4491_v47, %v4490_v54 }
 0xd90   :  { %v4529_v41 = vrot.slane %v4528_v30, 4  ;;  %v4483_v38 = vmul.f32 %v4466_v34, %v7033_v11  ;;  %v4519_v0 = vrot.slane %v4518_v58, 1 }
 0xd91   :  { %v4542_v10 = vpack.c.bf16 %v4492_v29, %v4492_v29 }
 0xd92   :  { %v4530_v60 = vadd.f32 %v4529_v41, %v4528_v30  ;;  %v4521_v57 = vsel %vm98_vm0, %v4483_v38, 0.0  ;;  %v4520_v46 = vadd.f32 %v4519_v0, %v4518_v58 }
 0xd93   :  { %v4522_v59 = vrot.slane %v4521_v57, 4  ;;  %v4569_v39 = vunpack.c.l.b16 %v4542_v10 }
 0xd94   :  { %v4531_v26 = vrot.slane %v4530_v60, 2  ;;  %v4546_v2 = vpack.c.bf16 %v4520_v46, %v4520_v46 }
 0xd95   :  { %v4523_v7 = vadd.f32 %v4522_v59, %v4521_v57  ;;  %v4578_v23 = vsel %vm4577_vm8, %v4570_v3, %v4569_v39 }
 0xd96   :  { %v4532_v55 = vadd.f32 %v4531_v26, %v4530_v60  ;;  %v4573_v48 = vunpack.c.l.b16 %v4546_v2 }
 0xd97   :  { %v4524_v13 = vrot.slane %v4523_v7, 2  ;;  %v4476_v21 = vpop.permute.xlu0 %4475 }
 0xd98   :  { %v4485_v11 = vmul.f32 %v4476_v21, %v7046_v5  ;;  %v4533_v42 = vrot.slane %v4532_v55, 1  ;;  %v4571_v5 = vunpack.c.l.b16 %v4544_v19 }
 0xd99   :  { %v4525_v1 = vadd.f32 %v4524_v13, %v4523_v7 }
 0xd9a   :  { %v4535_v63 = vsel %vm98_vm0, %v4485_v11, 0.0  ;;  %v4534_v9 = vadd.f32 %v4533_v42, %v4532_v55  ;;  %v4580_v45 = vsel %vm4579_vm9, %v4571_v5, %v4578_v23 }
 0xd9b   :  { %v4526_v8 = vrot.slane %v4525_v1, 1  ;;  %v4536_v31 = vrot.slane %v4535_v63, 4  ;;  %v4582_v20 = vsel %vm4581_vm10, %v4572_v16, %v4580_v45 }
 0xd9c   :  { %v4548_v49 = vpack.c.bf16 %v4534_v9, %v4534_v9  ;;  %v4584_v12 = vsel %vm4583_vm11, %v4573_v48, %v4582_v20 }
 0xd9d   :  { %v4527_v37 = vadd.f32 %v4526_v8, %v4525_v1  ;;  %v4537_v61 = vadd.f32 %v4536_v31, %v4535_v63 }
 0xd9e   :  { %v4575_v50 = vunpack.c.l.b16 %v4548_v49 }
 0xd9f   :  { %v4547_v6 = vpack.c.bf16 %v4527_v37, %v4527_v37  ;;  %v4538_v15 = vrot.slane %v4537_v61, 2 }
 0xda1   :  { %v4539_v24 = vadd.f32 %v4538_v15, %v4537_v61  ;;  %v4574_v52 = vunpack.c.l.b16 %v4547_v6 }
 0xda3   :  { %v4540_v35 = vrot.slane %v4539_v24, 1  ;;  %v4586_v36 = vsel %vm4585_vm12, %v4574_v52, %v4584_v12 }
 0xda4   :  { %v4588_v32 = vsel %vm4587_vm13, %v4575_v50, %v4586_v36 }
 0xda5   :  { %v4541_v28 = vadd.f32 %v4540_v35, %v4539_v24 }
 0xda7   :  { %v4549_v51 = vpack.c.bf16 %v4541_v28, %v4541_v28 }
 0xda9   :  { %v4576_v62 = vunpack.c.l.b16 %v4549_v51 }
 0xdab   :  { %v4590_v40 = vsel %vm4589_vm14, %v4576_v62, %v4588_v32 }
 0xdac   :  { %v4591_v27 = vpack.c.b16 %v4590_v40, %v4590_v40 }
 0xdae   :  { %5457 = vmatmul.mubr.msk.bf16.vlgmr.msra.gmra.mrb[132].mxu0 %vm98_vm0, %v4591_v27 }
 0xdaf   :  { %5700 = shalt.err (!%p5697_p12)
}
 0xdb0   :  { %s5701_s16 = scalar_lea.hbm %s7204_s8, 512 }
 0xdb1   :  { %p5702_p13 = scmp.ne.s32.totalorder %s7204_s8, %s5701_s16  ;;  %p5705_p0 = scmp.lt.u32.totalorder %s5701_s16, %s7204_s8 }
 0xdb3   :  { %p5707_p1 = pnand %p5705_p0, %p5702_p13 }
 0xdb5   :  { %5710 = shalt.err (!%p5707_p1)
}
 0xdb6   :  { %4751 = dma.vmem_to_hbm [thread:$0]  %s4746_s0, 512, %s7204_s8, [#allocation4], %s5716_s19, %s5716_s19, %s5717_s20   ;;  %v5735_v30 = vmov 1966171168   ;;  %vm4713_vm15 = vcmask 253952  }
 0xdb7   :  { %v4650_v34 = vunpack.c.l.s4 %v5735_v30  ;;  %v4836_v41 = vld [vmem:[%s7203_s7] ss:$0 sm:$0xff]  ;;  %vm4714_vm0 = vsmask.f32 256  ;;  %v4719_v43 = vld [vmem:[%s7205_s9 + $0x1] sm:$0x1] }
 0xdb8   :  { %vm7128_vm1 = vmand %vm4713_vm15, %vm4714_vm0  ;;  %v4722_v1 = vld [vmem:[%s7205_s9 + $0x2] sm:$0x1]  ;;  %v4728_v46 = vld [vmem:[%s7205_s9 + $0x4] sm:$0x1] }
 0xdb9   :  { %v4651_v44 = vunpack.c.0.s8 %v4650_v34  ;;  %v4725_v31 = vld [vmem:[%s7205_s9 + $0x3] sm:$0x1]  ;;  %v4731_v19 = vld [vmem:[%s7205_s9 + $0x5] sm:$0x1]  ;;  %v4734_v42 = vld [vmem:[%s7205_s9 + $0x6] sm:$0x1] }
 0xdba   :  { %v4737_v15 = vld [vmem:[%s7205_s9 + $0x7] sm:$0x1] }
 0xdbb   :  { %v4654_v38 = vsub.s32 %v4651_v44, %v5920_v56  ;;  %v4716_v56 = vld [vmem:[%s7205_s9] sm:$0x1] }
 0xe81   :  { %v4641_v54 = vpop.f32.mrb[132].mxu0 }
 0xe82   :  { %v4642_v14 = vadd.f32 %v4836_v41, %v4641_v54  ;;  %v5458_v58 = vpop.f32.mrb[133].mxu0 }
 0xe83   :  { %v4644_v60 = vpop.f32.mrb[134].mxu0 }
 0xe84   :  { %v4648_v57 = vcombine.high %v4642_v14, %v4642_v14  ;;  %v4655_v4 = vrot.slane %v4642_v14, %v4654_v38  ;;  %v5459_v59 = vpop.f32.mrb[135].mxu0 }
 0xe86   :  { %v4662_v22 = vrot.slane %v4648_v57, %v4654_v38  ;;  %v4663_v26 = vcombine.high %v4655_v4, %v4655_v4  ;;  %v4671_v47 = vrot.slane %v4655_v4, %v4654_v38 }
 0xe88   :  { %v4664_v33 = vcombine.high %v4662_v22, %v4662_v22  ;;  %v4678_v7 = vrot.slane %v4662_v22, %v4654_v38  ;;  %v4685_v0 = vrot.slane %v4663_v26, %v4654_v38  ;;  %v4693_v53 = vcombine.high %v4671_v47, %v4671_v47 }
 0xe89   :  { %v4705_v21 = vpack.c.bf16 %v4671_v47, %v4671_v47 }
 0xe8a   :  { %v4692_v25 = vrot.slane %v4664_v33, %v4654_v38  ;;  %v4694_v55 = vcombine.high %v4678_v7, %v4678_v7  ;;  %v4695_v11 = vcombine.high %v4685_v0, %v4685_v0  ;;  %v4706_v29 = vpack.c.bf16 %v4685_v0, %v4685_v0 }
 0xe8b   :  { %v4707_v63 = vpack.c.bf16 %v4693_v53, %v4693_v53  ;;  %v4709_v18 = vpack.c.bf16 %v4678_v7, %v4678_v7  ;;  %v4717_v8 = vsel %vm7128_vm1, %v4705_v21, %v4716_v56 }
 0xe8c   :  { %v4696_v10 = vcombine.high %v4692_v25, %v4692_v25  ;;  %v4708_v17 = vpack.c.bf16 %v4695_v11, %v4695_v11  ;;  %v4710_v37 = vpack.c.bf16 %v4692_v25, %v4692_v25  ;;  %v4711_v61 = vpack.c.bf16 %v4694_v55, %v4694_v55  ;;  %4718 = vst [vmem:[%s7205_s9] sm:$0x1] %v4717_v8 }
 0xe8d   :  { %v4720_v2 = vsel %vm7128_vm1, %v4706_v29, %v4719_v43  ;;  %v4723_v3 = vsel %vm7128_vm1, %v4707_v63, %v4722_v1  ;;  %v4729_v6 = vsel %vm7128_vm1, %v4709_v18, %v4728_v46 }
 0xe8e   :  { %v4712_v5 = vpack.c.bf16 %v4696_v10, %v4696_v10  ;;  %4721 = vst [vmem:[%s7205_s9 + $0x1] sm:$0x1] %v4720_v2  ;;  %4724 = vst [vmem:[%s7205_s9 + $0x2] sm:$0x1] %v4723_v3  ;;  %v4726_v9 = vsel %vm7128_vm1, %v4708_v17, %v4725_v31  ;;  %v4732_v39 = vsel %vm7128_vm1, %v4710_v37, %v4731_v19 }
 0xe8f   :  { %4730 = vst [vmem:[%s7205_s9 + $0x4] sm:$0x1] %v4729_v6  ;;  %v4735_v16 = vsel %vm7128_vm1, %v4711_v61, %v4734_v42  ;;  %4727 = vst [vmem:[%s7205_s9 + $0x3] sm:$0x1] %v4726_v9 }
 0xe90   :  { %4733 = vst [vmem:[%s7205_s9 + $0x5] sm:$0x1] %v4732_v39  ;;  %4736 = vst [vmem:[%s7205_s9 + $0x6] sm:$0x1] %v4735_v16  ;;  %v4738_v24 = vsel %vm7128_vm1, %v4712_v5, %v4737_v15 }
 0xe91   :  { %4739 = vst [vmem:[%s7205_s9 + $0x7] sm:$0x1] %v4738_v24 }
 0xe92   :  { %5713 = dma.done.wait [#allocation4], 512  }
 0xe93   :  { %5714 = vsyncadd [#allocation4], 4294966784 }
 0xe94   :  { %4759 = vsyncpa [#allocation3], 1 }
 0xe95   :  { %4760 = vsyncpa [#allocation4], 1 }

</bundles_post_ra>
